<compile_context>
chip_gen: v7x
topology: tpu7x:2x2x1
jax: 0.10.0
libtpu: 0.0.40
codegen_flags: <defaults>
</compile_context>

<pallas_src>
import functools

import jax
import jax.numpy as jnp
from jax.experimental import pallas as pl
from jax.experimental.pallas import tpu as pltpu


# ---------------------------------------------------------------------------
# Device-aware knobs.
# ---------------------------------------------------------------------------
def _device_knobs():
    """(fuse_recurrent, vmem_cap_bytes) for the local TPU generation."""
    try:
        kind = jax.devices()[0].device_kind.lower()
    except Exception:
        kind = ""
    # v2-v5 have a 128-deep MXU: padding the recurrent K to 2H=256 with a
    # block-diagonal whh doubles MXU passes there, so keep two K=H dots.
    fuse = not any(v in kind for v in ("v2", "v3", "v4", "v5"))
    # v7x has 64 MiB VMEM per TensorCore; v5e/v6e have 128 MiB.
    cap = (56 if "v7" in kind else 100) * 1024 * 1024
    return fuse, cap


def _lstm_block_bytes(T, b, feat, H, last_only):
    gcols = (4 if last_only else 8) * H
    x_blk = 2 * T * b * feat * 2                 # bf16 input block, dbl-buffered
    out_rows = b if last_only else T * b
    out_blk = 2 * out_rows * 2 * H * 2           # bf16 output block, dbl-buffered
    pg = T * b * gcols * 2                       # persistent bf16 pre-gate scratch
    pg_tmp = T * b * gcols * 4                   # transient f32 matmul result
    state = b * (2 * H * 2 + 2 * H * 4)          # h (bf16) + c (f32)
    return x_blk + out_blk + pg + pg_tmp + state


def _lstm_weight_bytes(feat, H):
    return 2 * (feat * 8 * H + 2 * H * 8 * H) * 2 + 2 * 8 * H * 4


def _pick_bblk(Bp, T, feat, H, last_only, cap):
    # Largest multiple-of-8 batch chunk (<=64) whose VMEM footprint fits.
    budget = cap - _lstm_weight_bytes(feat, H) - (12 << 20)
    best = 8
    for b in range(8, min(Bp, 64) + 1, 8):
        if Bp % b == 0 and _lstm_block_bytes(T, b, feat, H, last_only) <= budget:
            best = b
    return best
    # TODO(synk): for very long sequences (huge T) also chunk the time axis of
    # the hoisted input projection instead of only shrinking Bblk.


def _lstm_vmem_limit(T, b, feat, H, last_only, cap):
    need = (_lstm_block_bytes(T, b, feat, H, last_only)
            + _lstm_weight_bytes(feat, H) + (8 << 20))
    return int(min(max(need, 32 << 20), cap))


# ---------------------------------------------------------------------------
# Conv1d(k=3, pad=1) + BatchNorm(eval, bias folded) + ReLU + MaxPool1d(2),
# fused, one batch element per grid step.
# ---------------------------------------------------------------------------
def conv_bn_relu_pool_kernel(x_ref, w_ref, scale_ref, shift_ref, o_ref):
    # x_ref:  (1, L+2, Cin)  bf16, zero-padded along length (k=3, pad=1 halo)
    # w_ref:  (3, Cin, Cout) bf16 (torch (Cout, Cin, 3) transposed)
    # scale/shift: (1, Cout) f32 (eval BN affine, conv bias folded into shift)
    # o_ref:  (1, L//2, Cout) bf16 (post MaxPool1d(2))
    lin = x_ref.shape[1]
    lout = lin - 2
    half = lout // 2
    cout = w_ref.shape[2]

    x = x_ref[0]                                   # (L+2, Cin) bf16
    # Conv as 3 shifted matmuls (bf16 operands, f32 accumulation).
    # TODO(synk): conv1 (Cin=4) could use a K=12 im2col single matmul; skipped
    # since the sub-128-lane concat needs a relayout for a tiny absolute win.
    acc = jnp.dot(x[0:lout, :], w_ref[0], preferred_element_type=jnp.float32)
    acc = acc + jnp.dot(x[1:lout + 1, :], w_ref[1],
                        preferred_element_type=jnp.float32)
    acc = acc + jnp.dot(x[2:lout + 2, :], w_ref[2],
                        preferred_element_type=jnp.float32)

    # Eval-mode BatchNorm (conv bias folded into shift) + ReLU, f32 VPU.
    y = jnp.maximum(acc * scale_ref[...] + shift_ref[...], 0.0)

    # MaxPool1d(2) fully in registers: pairwise max over adjacent rows (no
    # VMEM scratch round-trip, no strided re-read).
    o_ref[0] = jnp.max(y.reshape(half, 2, cout), axis=1).astype(o_ref.dtype)


def conv_bn_relu_pool(x, w, scale, shift):
    # x: (B, L, Cin) channels-last bf16
    B, L, Cin = x.shape
    Cout = w.shape[2]
    half = L // 2
    xpad = jnp.pad(x, ((0, 0), (1, 1), (0, 0)))
    # TODO(synk): for realistic sEMG lengths (L in the thousands) tile the
    # length axis with a 2-row halo handled in-kernel instead of the wrapper
    # pad + whole-sequence blocks.
    return pl.pallas_call(
        conv_bn_relu_pool_kernel,
        out_shape=jax.ShapeDtypeStruct((B, half, Cout), jnp.bfloat16),
        grid=(B,),
        in_specs=[
            pl.BlockSpec((1, L + 2, Cin), lambda b: (b, 0, 0)),
            pl.BlockSpec((3, Cin, Cout), lambda b: (0, 0, 0)),
            pl.BlockSpec((1, Cout), lambda b: (0, 0)),
            pl.BlockSpec((1, Cout), lambda b: (0, 0)),
        ],
        out_specs=pl.BlockSpec((1, half, Cout), lambda b: (b, 0, 0)),
        compiler_params=pltpu.CompilerParams(
            dimension_semantics=("parallel",)),
    )(xpad, w, scale, shift)


# ---------------------------------------------------------------------------
# Bidirectional LSTM layer (full output sequence), batch-chunked grid.
#   x     : (T, Bp, In)  bf16, time-major
#   wih   : (In, 8H)     bf16  == [W_ih_fwd | W_ih_bwd]
#   whh   : (2H, 8H)     bf16  block-diagonal == [whh_f, 0; 0, whh_b]
#   bias  : (1, 8H)      f32   == [b_ih_f + b_hh_f | b_ih_b + b_hh_b]
#   out   : (T, Bp, 2H)  bf16  == [h_fwd(t) | h_bwd(t)] per row (PyTorch order)
# ---------------------------------------------------------------------------
def bilstm_kernel(x_ref, wih_ref, whh_ref, bias_ref, o_ref,
                  pg_ref, hc_ref, cf_ref, cb_ref, *, fuse):
    T, bb, feat = x_ref.shape
    H = whh_ref.shape[0] // 2

    # 1) Hoisted input projection for BOTH directions and ALL timesteps:
    #    one (T*Bblk, In) @ (In, 8H) MXU matmul; bias folded in; stored bf16.
    pg = jnp.dot(x_ref[...].reshape(T * bb, feat), wih_ref[...],
                 preferred_element_type=jnp.float32) + bias_ref[...]
    pg_ref[...] = pg.astype(pg_ref.dtype).reshape(T, bb, 8 * H)

    hc_ref[...] = jnp.zeros_like(hc_ref)
    cf_ref[...] = jnp.zeros_like(cf_ref)
    cb_ref[...] = jnp.zeros_like(cb_ref)

    def cell(gates, c):
        # PyTorch gate order: i, f, g, o (chunks of H).
        i = jax.nn.sigmoid(gates[:, 0:H])
        f = jax.nn.sigmoid(gates[:, H:2 * H])
        g = jnp.tanh(gates[:, 2 * H:3 * H])
        o = jax.nn.sigmoid(gates[:, 3 * H:4 * H])
        c_new = f * c + i * g
        return o * jnp.tanh(c_new), c_new

    # 2) Time recurrence: fwd processes time s, bwd processes time T-1-s.
    @pl.loop(0, T)
    def _(s):
        rt = T - 1 - s
        pg_f = pg_ref[s][:, 0:4 * H].astype(jnp.float32)
        pg_b = pg_ref[rt][:, 4 * H:8 * H].astype(jnp.float32)

        if fuse:
            # One (Bblk,2H)@(2H,8H) push per step; whh is block-diagonal so the
            # extra K rows are zeros and K=2H=256 exactly fills the v6e/v7x MXU.
            rec = jnp.dot(hc_ref[...], whh_ref[...],
                          preferred_element_type=jnp.float32)
            g_f = pg_f + rec[:, 0:4 * H]
            g_b = pg_b + rec[:, 4 * H:8 * H]
        else:
            # v5e and older (128-deep MXU): two K=H pushes.
            g_f = pg_f + jnp.dot(hc_ref[:, 0:H], whh_ref[0:H, 0:4 * H],
                                 preferred_element_type=jnp.float32)
            g_b = pg_b + jnp.dot(hc_ref[:, H:2 * H],
                                 whh_ref[H:2 * H, 4 * H:8 * H],
                                 preferred_element_type=jnp.float32)

        h_f, c_f = cell(g_f, cf_ref[...])
        h_b, c_b = cell(g_b, cb_ref[...])
        cf_ref[...] = c_f
        cb_ref[...] = c_b
        h_f = h_f.astype(jnp.bfloat16)
        h_b = h_b.astype(jnp.bfloat16)
        hc_ref[:, 0:H] = h_f
        hc_ref[:, H:2 * H] = h_b

        # Write both halves of the bidirectional output directly (no flip /
        # concat passes through HBM).
        o_ref[s, :, 0:H] = h_f
        o_ref[rt, :, H:2 * H] = h_b


def bilstm_apply(x_tm, p):
    T, Bp, feat = x_tm.shape
    H = p["whh"].shape[0] // 2
    fuse, cap = _device_knobs()
    bblk = _pick_bblk(Bp, T, feat, H, last_only=False, cap=cap)
    vmem = _lstm_vmem_limit(T, bblk, feat, H, last_only=False, cap=cap)
    kernel = functools.partial(bilstm_kernel, fuse=fuse)
    return pl.pallas_call(
        kernel,
        out_shape=jax.ShapeDtypeStruct((T, Bp, 2 * H), jnp.bfloat16),
        grid=(Bp // bblk,),
        in_specs=[
            pl.BlockSpec((T, bblk, feat), lambda i: (0, i, 0)),
            pl.BlockSpec((feat, 8 * H), lambda i: (0, 0)),
            pl.BlockSpec((2 * H, 8 * H), lambda i: (0, 0)),
            pl.BlockSpec((1, 8 * H), lambda i: (0, 0)),
        ],
        out_specs=pl.BlockSpec((T, bblk, 2 * H), lambda i: (0, i, 0)),
        scratch_shapes=[
            pltpu.VMEM((T, bblk, 8 * H), jnp.bfloat16),   # pre-gates (bf16)
            pltpu.VMEM((bblk, 2 * H), jnp.bfloat16),      # h  [fwd | bwd]
            pltpu.VMEM((bblk, H), jnp.float32),           # c fwd
            pltpu.VMEM((bblk, H), jnp.float32),           # c bwd
        ],
        compiler_params=pltpu.CompilerParams(
            dimension_semantics=("parallel",),
            vmem_limit_bytes=vmem),
    )(x_tm, p["wih"], p["whh"], p["bias"])


# ---------------------------------------------------------------------------
# Second LSTM layer, "last timestep only" variant: only out[:, -1, :] is
# consumed downstream, so the backward direction needs exactly one cell step
# (t = T-1, zero initial state) and the forward direction only its final h.
# ---------------------------------------------------------------------------
def bilstm_last_kernel(x_ref, wih_ref, whh_ref, bias_ref, o_ref,
                       pg_ref, hf_ref, cf_ref):
    T, bb, feat = x_ref.shape
    H = whh_ref.shape[0] // 2

    # Forward-direction pre-gates only (bwd needs just t = T-1, handled below).
    pg = jnp.dot(x_ref[...].reshape(T * bb, feat), wih_ref[:, 0:4 * H],
                 preferred_element_type=jnp.float32) + bias_ref[:, 0:4 * H]
    pg_ref[...] = pg.astype(pg_ref.dtype).reshape(T, bb, 4 * H)

    hf_ref[...] = jnp.zeros_like(hf_ref)
    cf_ref[...] = jnp.zeros_like(cf_ref)

    def cell(gates, c):
        i = jax.nn.sigmoid(gates[:, 0:H])
        f = jax.nn.sigmoid(gates[:, H:2 * H])
        g = jnp.tanh(gates[:, 2 * H:3 * H])
        o = jax.nn.sigmoid(gates[:, 3 * H:4 * H])
        c_new = f * c + i * g
        return o * jnp.tanh(c_new), c_new

    @pl.loop(0, T)
    def _(s):
        g_f = pg_ref[s].astype(jnp.float32) + jnp.dot(
            hf_ref[...], whh_ref[0:H, 0:4 * H],
            preferred_element_type=jnp.float32)
        h_f, c_f = cell(g_f, cf_ref[...])
        hf_ref[...] = h_f.astype(hf_ref.dtype)
        cf_ref[...] = c_f

    # Backward direction: at t = T-1 the bwd hidden/cell state is the zero
    # initial state, so one cell step with no recurrent matmul is exact.
    g_b = jnp.dot(x_ref[T - 1], wih_ref[:, 4 * H:8 * H],
                  preferred_element_type=jnp.float32) + bias_ref[:, 4 * H:8 * H]
    h_b, _ = cell(g_b, jnp.zeros((bb, H), jnp.float32))

    o_ref[:, 0:H] = hf_ref[...]
    o_ref[:, H:2 * H] = h_b.astype(o_ref.dtype)


def bilstm_last_apply(x_tm, p):
    T, Bp, feat = x_tm.shape
    H = p["whh"].shape[0] // 2
    _, cap = _device_knobs()
    bblk = _pick_bblk(Bp, T, feat, H, last_only=True, cap=cap)
    vmem = _lstm_vmem_limit(T, bblk, feat, H, last_only=True, cap=cap)
    return pl.pallas_call(
        bilstm_last_kernel,
        out_shape=jax.ShapeDtypeStruct((Bp, 2 * H), jnp.bfloat16),
        grid=(Bp // bblk,),
        in_specs=[
            pl.BlockSpec((T, bblk, feat), lambda i: (0, i, 0)),
            pl.BlockSpec((feat, 8 * H), lambda i: (0, 0)),
            pl.BlockSpec((2 * H, 8 * H), lambda i: (0, 0)),
            pl.BlockSpec((1, 8 * H), lambda i: (0, 0)),
        ],
        out_specs=pl.BlockSpec((bblk, 2 * H), lambda i: (i, 0)),
        scratch_shapes=[
            pltpu.VMEM((T, bblk, 4 * H), jnp.bfloat16),   # fwd pre-gates (bf16)
            pltpu.VMEM((bblk, H), jnp.bfloat16),          # h fwd
            pltpu.VMEM((bblk, H), jnp.float32),           # c fwd
        ],
        compiler_params=pltpu.CompilerParams(
            dimension_semantics=("parallel",),
            vmem_limit_bytes=vmem),
    )(x_tm, p["wih"], p["whh"], p["bias"])


# ---------------------------------------------------------------------------
# Head: Linear(256,256) + ReLU + Dropout(eval=identity) + Linear(256, classes)
# ---------------------------------------------------------------------------
def fc_kernel(x_ref, w1_ref, b1_ref, w2_ref, b2_ref, o_ref):
    h = jnp.dot(x_ref[...], w1_ref[...],
                preferred_element_type=jnp.float32) + b1_ref[...]
    h = jnp.maximum(h, 0.0).astype(w2_ref.dtype)
    # Dropout(p=0.5) is identity in eval mode.
    o_ref[...] = jnp.dot(h, w2_ref[...],
                         preferred_element_type=jnp.float32) + b2_ref[...]


def fc_apply(x, w1, b1, w2, b2):
    return pl.pallas_call(
        fc_kernel,
        out_shape=jax.ShapeDtypeStruct((x.shape[0], w2.shape[1]), jnp.float32),
    )(x, w1, b1, w2, b2)


# ---------------------------------------------------------------------------
# Full forward pass (glue in plain JAX; hot paths in the Pallas kernels above).
# ---------------------------------------------------------------------------
def cnn_lstm_forward(x_ncl, params):
    # x_ncl: (B, num_channels, L) -- PyTorch NCL layout
    B = x_ncl.shape[0]
    x = jnp.transpose(x_ncl, (0, 2, 1)).astype(jnp.bfloat16)   # (B, L, C)
    x = conv_bn_relu_pool(x, **params["conv1"])                # (B, L/2, 64)
    x = conv_bn_relu_pool(x, **params["conv2"])                # (B, L/4, 128)
    x = conv_bn_relu_pool(x, **params["conv3"])                # (B, L/8, 256)

    # Time-major for the LSTM; pad batch to a sublane-aligned multiple of 8 so
    # every per-timestep (Bblk, .) access is unmasked.
    x = jnp.transpose(x, (1, 0, 2))                            # (T, B, 256)
    B_pad = ((B + 7) // 8) * 8
    if B_pad != B:
        x = jnp.pad(x, ((0, 0), (0, B_pad - B), (0, 0)))

    x = bilstm_apply(x, params["lstm0"])                       # (T, Bp, 256)
    last = bilstm_last_apply(x, params["lstm1"])               # (Bp, 256) == out[:, -1, :]
    last = last[:B]
    fc = params["fc"]
    return fc_apply(last, fc["w1"], fc["b1"], fc["w2"], fc["b2"])


# ---------------------------------------------------------------------------
# Deterministic synthetic parameters (shapes follow CNNLSTM.__init__), already
# in kernel-ready layout: bf16 matmul weights, BN+bias folded, directions fused
# and whh stored block-diagonally.
# ---------------------------------------------------------------------------
def init_params(key, num_channels, num_classes, hidden=128):
    keys = iter(jax.random.split(key, 64))

    def nrm(shape, scale=0.1):
        return (scale * jax.random.normal(next(keys), shape)).astype(jnp.float32)

    def conv_block(cin, cout):
        w = nrm((3, cin, cout))            # torch weight (Cout, Cin, 3) transposed
        b = nrm((cout,))                   # conv bias
        gamma = 1.0 + nrm((cout,))
        beta = nrm((cout,))
        mean = nrm((cout,))
        var = 1.0 + 0.1 * jnp.abs(jax.random.normal(next(keys), (cout,)))
        scale = gamma / jnp.sqrt(var + 1e-5)
        shift = beta - mean * scale + b * scale     # conv bias folded into BN shift
        return dict(w=w.astype(jnp.bfloat16),
                    scale=scale.reshape(1, -1).astype(jnp.float32),
                    shift=shift.reshape(1, -1).astype(jnp.float32))

    def lstm_layer(in_size, h):
        wih_f = nrm((in_size, 4 * h))      # torch weight_ih_l* (4H, In) transposed
        wih_b = nrm((in_size, 4 * h))
        whh_f = nrm((h, 4 * h))            # torch weight_hh_l* (4H, H) transposed
        whh_b = nrm((h, 4 * h))
        bias_f = nrm((4 * h,)) + nrm((4 * h,))   # b_ih + b_hh (fwd)
        bias_b = nrm((4 * h,)) + nrm((4 * h,))   # b_ih + b_hh (bwd)
        whh = jnp.zeros((2 * h, 8 * h), jnp.float32)
        whh = whh.at[0:h, 0:4 * h].set(whh_f)
        whh = whh.at[h:2 * h, 4 * h:8 * h].set(whh_b)
        return dict(
            wih=jnp.concatenate([wih_f, wih_b], axis=1).astype(jnp.bfloat16),
            whh=whh.astype(jnp.bfloat16),
            bias=jnp.concatenate([bias_f, bias_b]).reshape(1, -1)
                    .astype(jnp.float32),
        )

    return {
        "conv1": conv_block(num_channels, 64),
        "conv2": conv_block(64, 128),
        "conv3": conv_block(128, 256),
        "lstm0": lstm_layer(256, hidden),
        "lstm1": lstm_layer(2 * hidden, hidden),
        "fc": dict(
            w1=nrm((2 * hidden, 256)).astype(jnp.bfloat16),
            b1=nrm((256,)).reshape(1, -1),
            w2=nrm((256, num_classes)).astype(jnp.bfloat16),
            b2=nrm((num_classes,)).reshape(1, -1),
        ),
    }


if __name__ == "__main__":
    B, C, L = 2, 4, 16          # L divisible by 8 (three MaxPool1d(2) stages)
    num_classes = 8

    x = jax.random.normal(jax.random.PRNGKey(0), (B, C, L), dtype=jnp.float32)
    params = init_params(jax.random.PRNGKey(42), num_channels=C,
                         num_classes=num_classes)

    fwd = jax.jit(functools.partial(cnn_lstm_forward, params=params))
    out = jax.block_until_ready(fwd(x))

    assert out.shape == (B, num_classes), out.shape
    assert out.dtype == jnp.float32
    assert bool(jnp.all(jnp.isfinite(out)))
    print("KERNEL_OK")
</pallas_src>

<mosaic_0001>
module attributes {stable_mosaic.version = 11 : i64} {
  func.func @conv_bn_relu_pool_kernel(%arg0: i32, %arg1: memref<1x18x4xbf16, #tpu.memory_space<vmem>>, %arg2: memref<3x4x64xbf16, #tpu.memory_space<vmem>>, %arg3: memref<1x64xf32, #tpu.memory_space<vmem>>, %arg4: memref<1x64xf32, #tpu.memory_space<vmem>>, %arg5: memref<1x8x64xbf16, #tpu.memory_space<vmem>>) attributes {dimension_semantics = [#tpu.dimension_semantics<parallel>], iteration_bounds = array<i64: 2>, scalar_prefetch = 0 : i64, scratch_operands = 0 : i64, tpu.core_type = #tpu.core_type<tc>, window_params = [{transform_indices = @transform_0, window_bounds = array<i64: 1, 18, 4>}, {pipeline_mode = #tpu.pipeline_mode<synchronous>, transform_indices = @transform_1, window_bounds = array<i64: 3, 4, 64>}, {pipeline_mode = #tpu.pipeline_mode<synchronous>, transform_indices = @transform_2, window_bounds = array<i64: 1, 64>}, {pipeline_mode = #tpu.pipeline_mode<synchronous>, transform_indices = @transform_3, window_bounds = array<i64: 1, 64>}, {transform_indices = @transform_4, window_bounds = array<i64: 1, 8, 64>}]} {
    %c0 = arith.constant 0 : index
    %c0_0 = arith.constant 0 : index
    %c0_1 = arith.constant 0 : index
    %0 = vector.load %arg1[%c0, %c0_0, %c0_1] : memref<1x18x4xbf16, #tpu.memory_space<vmem>>, vector<1x18x4xbf16>
    %1 = vector.shape_cast %0 : vector<1x18x4xbf16> to vector<18x4xbf16>
    %2 = vector.extract_strided_slice %1 {offsets = [0, 0], sizes = [16, 4], strides = [1, 1]} : vector<18x4xbf16> to vector<16x4xbf16>
    %c0_2 = arith.constant 0 : index
    %c0_3 = arith.constant 0 : index
    %c0_4 = arith.constant 0 : index
    %3 = vector.load %arg2[%c0_2, %c0_3, %c0_4] : memref<3x4x64xbf16, #tpu.memory_space<vmem>>, vector<1x4x64xbf16>
    %4 = vector.shape_cast %3 : vector<1x4x64xbf16> to vector<4x64xbf16>
    %cst = arith.constant dense<0.000000e+00> : vector<16x64xf32>
    %5 = tpu.matmul %2, %4, %cst {dimension_numbers = #tpu.dot_dimension_numbers<[1], [0], [0], [1], [0, 0, 1, 1], [], []>} : vector<16x4xbf16>, vector<4x64xbf16>, vector<16x64xf32> -> vector<16x64xf32>
    %6 = vector.extract_strided_slice %1 {offsets = [1, 0], sizes = [16, 4], strides = [1, 1]} : vector<18x4xbf16> to vector<16x4xbf16>
    %c1 = arith.constant 1 : index
    %c0_5 = arith.constant 0 : index
    %c0_6 = arith.constant 0 : index
    %7 = vector.load %arg2[%c1, %c0_5, %c0_6] : memref<3x4x64xbf16, #tpu.memory_space<vmem>>, vector<1x4x64xbf16>
    %8 = vector.shape_cast %7 : vector<1x4x64xbf16> to vector<4x64xbf16>
    %cst_7 = arith.constant dense<0.000000e+00> : vector<16x64xf32>
    %9 = tpu.matmul %6, %8, %cst_7 {dimension_numbers = #tpu.dot_dimension_numbers<[1], [0], [0], [1], [0, 0, 1, 1], [], []>} : vector<16x4xbf16>, vector<4x64xbf16>, vector<16x64xf32> -> vector<16x64xf32>
    %10 = arith.addf %5, %9 : vector<16x64xf32>
    %11 = vector.extract_strided_slice %1 {offsets = [2, 0], sizes = [16, 4], strides = [1, 1]} : vector<18x4xbf16> to vector<16x4xbf16>
    %c2 = arith.constant 2 : index
    %c0_8 = arith.constant 0 : index
    %c0_9 = arith.constant 0 : index
    %12 = vector.load %arg2[%c2, %c0_8, %c0_9] : memref<3x4x64xbf16, #tpu.memory_space<vmem>>, vector<1x4x64xbf16>
    %13 = vector.shape_cast %12 : vector<1x4x64xbf16> to vector<4x64xbf16>
    %cst_10 = arith.constant dense<0.000000e+00> : vector<16x64xf32>
    %14 = tpu.matmul %11, %13, %cst_10 {dimension_numbers = #tpu.dot_dimension_numbers<[1], [0], [0], [1], [0, 0, 1, 1], [], []>} : vector<16x4xbf16>, vector<4x64xbf16>, vector<16x64xf32> -> vector<16x64xf32>
    %15 = arith.addf %10, %14 : vector<16x64xf32>
    %c0_11 = arith.constant 0 : index
    %c0_12 = arith.constant 0 : index
    %16 = vector.load %arg3[%c0_11, %c0_12] : memref<1x64xf32, #tpu.memory_space<vmem>>, vector<1x64xf32>
    %17 = vector.broadcast %16 : vector<1x64xf32> to vector<16x64xf32>
    %18 = arith.mulf %15, %17 : vector<16x64xf32>
    %c0_13 = arith.constant 0 : index
    %c0_14 = arith.constant 0 : index
    %19 = vector.load %arg4[%c0_13, %c0_14] : memref<1x64xf32, #tpu.memory_space<vmem>>, vector<1x64xf32>
    %20 = vector.broadcast %19 : vector<1x64xf32> to vector<16x64xf32>
    %21 = arith.addf %18, %20 : vector<16x64xf32>
    %cst_15 = arith.constant 0.000000e+00 : f32
    %22 = vector.broadcast %cst_15 : f32 to vector<16x64xf32>
    %23 = arith.maximumf %21, %22 : vector<16x64xf32>
    %24 = vector.shape_cast %23 : vector<16x64xf32> to vector<8x2x64xf32>
    %cst_16 = arith.constant dense<0xFF800000> : vector<8x64xf32>
    %25 = vector.multi_reduction <maximumf>, %24, %cst_16 [1] : vector<8x2x64xf32> to vector<8x64xf32>
    %26 = arith.truncf %25 : vector<8x64xf32> to vector<8x64xbf16>
    %c0_17 = arith.constant 0 : index
    %c0_18 = arith.constant 0 : index
    %c0_19 = arith.constant 0 : index
    %27 = vector.load %arg5[%c0_17, %c0_18, %c0_19] : memref<1x8x64xbf16, #tpu.memory_space<vmem>>, vector<1x8x64xbf16>
    %28 = vector.shape_cast %27 : vector<1x8x64xbf16> to vector<8x64xbf16>
    %29 = vector.shape_cast %26 : vector<8x64xbf16> to vector<1x8x64xbf16>
    tpu.vector_store %arg5[%c0_17, %c0_18, %c0_19], %29 {strides = array<i32>} : memref<1x8x64xbf16, #tpu.memory_space<vmem>>, vector<1x8x64xbf16>,
    return
  }
  func.func @transform_0(%arg0: i32) -> (i32, i32, i32) {
    %c0_i32 = arith.constant 0 : i32
    %c0_i32_0 = arith.constant 0 : i32
    %c0_i32_1 = arith.constant 0 : i32
    return %arg0, %c0_i32, %c0_i32_0 : i32, i32, i32
  }
  func.func @transform_1(%arg0: i32) -> (i32, i32, i32) {
    %c0_i32 = arith.constant 0 : i32
    %c0_i32_0 = arith.constant 0 : i32
    %c0_i32_1 = arith.constant 0 : i32
    %c0_i32_2 = arith.constant 0 : i32
    return %c0_i32, %c0_i32_0, %c0_i32_1 : i32, i32, i32
  }
  func.func @transform_2(%arg0: i32) -> (i32, i32) {
    %c0_i32 = arith.constant 0 : i32
    %c0_i32_0 = arith.constant 0 : i32
    %c0_i32_1 = arith.constant 0 : i32
    return %c0_i32, %c0_i32_0 : i32, i32
  }
  func.func @transform_3(%arg0: i32) -> (i32, i32) {
    %c0_i32 = arith.constant 0 : i32
    %c0_i32_0 = arith.constant 0 : i32
    %c0_i32_1 = arith.constant 0 : i32
    return %c0_i32, %c0_i32_0 : i32, i32
  }
  func.func @transform_4(%arg0: i32) -> (i32, i32, i32) {
    %c0_i32 = arith.constant 0 : i32
    %c0_i32_0 = arith.constant 0 : i32
    %c0_i32_1 = arith.constant 0 : i32
    return %arg0, %c0_i32, %c0_i32_0 : i32, i32, i32
  }
}

module attributes {stable_mosaic.version = 11 : i64} {
  func.func @conv_bn_relu_pool_kernel(%arg0: i32, %arg1: memref<1x10x64xbf16, #tpu.memory_space<vmem>>, %arg2: memref<3x64x128xbf16, #tpu.memory_space<vmem>>, %arg3: memref<1x128xf32, #tpu.memory_space<vmem>>, %arg4: memref<1x128xf32, #tpu.memory_space<vmem>>, %arg5: memref<1x4x128xbf16, #tpu.memory_space<vmem>>) attributes {dimension_semantics = [#tpu.dimension_semantics<parallel>], iteration_bounds = array<i64: 2>, scalar_prefetch = 0 : i64, scratch_operands = 0 : i64, tpu.core_type = #tpu.core_type<tc>, window_params = [{transform_indices = @transform_0, window_bounds = array<i64: 1, 10, 64>}, {pipeline_mode = #tpu.pipeline_mode<synchronous>, transform_indices = @transform_1, window_bounds = array<i64: 3, 64, 128>}, {pipeline_mode = #tpu.pipeline_mode<synchronous>, transform_indices = @transform_2, window_bounds = array<i64: 1, 128>}, {pipeline_mode = #tpu.pipeline_mode<synchronous>, transform_indices = @transform_3, window_bounds = array<i64: 1, 128>}, {transform_indices = @transform_4, window_bounds = array<i64: 1, 4, 128>}]} {
    %c0 = arith.constant 0 : index
    %c0_0 = arith.constant 0 : index
    %c0_1 = arith.constant 0 : index
    %0 = vector.load %arg1[%c0, %c0_0, %c0_1] : memref<1x10x64xbf16, #tpu.memory_space<vmem>>, vector<1x10x64xbf16>
    %1 = vector.shape_cast %0 : vector<1x10x64xbf16> to vector<10x64xbf16>
    %2 = vector.extract_strided_slice %1 {offsets = [0, 0], sizes = [8, 64], strides = [1, 1]} : vector<10x64xbf16> to vector<8x64xbf16>
    %c0_2 = arith.constant 0 : index
    %c0_3 = arith.constant 0 : index
    %c0_4 = arith.constant 0 : index
    %3 = vector.load %arg2[%c0_2, %c0_3, %c0_4] : memref<3x64x128xbf16, #tpu.memory_space<vmem>>, vector<1x64x128xbf16>
    %4 = vector.shape_cast %3 : vector<1x64x128xbf16> to vector<64x128xbf16>
    %cst = arith.constant dense<0.000000e+00> : vector<8x128xf32>
    %5 = tpu.matmul %2, %4, %cst {dimension_numbers = #tpu.dot_dimension_numbers<[1], [0], [0], [1], [0, 0, 1, 1], [], []>} : vector<8x64xbf16>, vector<64x128xbf16>, vector<8x128xf32> -> vector<8x128xf32>
    %6 = vector.extract_strided_slice %1 {offsets = [1, 0], sizes = [8, 64], strides = [1, 1]} : vector<10x64xbf16> to vector<8x64xbf16>
    %c1 = arith.constant 1 : index
    %c0_5 = arith.constant 0 : index
    %c0_6 = arith.constant 0 : index
    %7 = vector.load %arg2[%c1, %c0_5, %c0_6] : memref<3x64x128xbf16, #tpu.memory_space<vmem>>, vector<1x64x128xbf16>
    %8 = vector.shape_cast %7 : vector<1x64x128xbf16> to vector<64x128xbf16>
    %cst_7 = arith.constant dense<0.000000e+00> : vector<8x128xf32>
    %9 = tpu.matmul %6, %8, %cst_7 {dimension_numbers = #tpu.dot_dimension_numbers<[1], [0], [0], [1], [0, 0, 1, 1], [], []>} : vector<8x64xbf16>, vector<64x128xbf16>, vector<8x128xf32> -> vector<8x128xf32>
    %10 = arith.addf %5, %9 : vector<8x128xf32>
    %11 = vector.extract_strided_slice %1 {offsets = [2, 0], sizes = [8, 64], strides = [1, 1]} : vector<10x64xbf16> to vector<8x64xbf16>
    %c2 = arith.constant 2 : index
    %c0_8 = arith.constant 0 : index
    %c0_9 = arith.constant 0 : index
    %12 = vector.load %arg2[%c2, %c0_8, %c0_9] : memref<3x64x128xbf16, #tpu.memory_space<vmem>>, vector<1x64x128xbf16>
    %13 = vector.shape_cast %12 : vector<1x64x128xbf16> to vector<64x128xbf16>
    %cst_10 = arith.constant dense<0.000000e+00> : vector<8x128xf32>
    %14 = tpu.matmul %11, %13, %cst_10 {dimension_numbers = #tpu.dot_dimension_numbers<[1], [0], [0], [1], [0, 0, 1, 1], [], []>} : vector<8x64xbf16>, vector<64x128xbf16>, vector<8x128xf32> -> vector<8x128xf32>
    %15 = arith.addf %10, %14 : vector<8x128xf32>
    %c0_11 = arith.constant 0 : index
    %c0_12 = arith.constant 0 : index
    %16 = vector.load %arg3[%c0_11, %c0_12] : memref<1x128xf32, #tpu.memory_space<vmem>>, vector<1x128xf32>
    %17 = vector.broadcast %16 : vector<1x128xf32> to vector<8x128xf32>
    %18 = arith.mulf %15, %17 : vector<8x128xf32>
    %c0_13 = arith.constant 0 : index
    %c0_14 = arith.constant 0 : index
    %19 = vector.load %arg4[%c0_13, %c0_14] : memref<1x128xf32, #tpu.memory_space<vmem>>, vector<1x128xf32>
    %20 = vector.broadcast %19 : vector<1x128xf32> to vector<8x128xf32>
    %21 = arith.addf %18, %20 : vector<8x128xf32>
    %cst_15 = arith.constant 0.000000e+00 : f32
    %22 = vector.broadcast %cst_15 : f32 to vector<8x128xf32>
    %23 = arith.maximumf %21, %22 : vector<8x128xf32>
    %24 = vector.shape_cast %23 : vector<8x128xf32> to vector<4x2x128xf32>
    %cst_16 = arith.constant dense<0xFF800000> : vector<4x128xf32>
    %25 = vector.multi_reduction <maximumf>, %24, %cst_16 [1] : vector<4x2x128xf32> to vector<4x128xf32>
    %26 = arith.truncf %25 : vector<4x128xf32> to vector<4x128xbf16>
    %c0_17 = arith.constant 0 : index
    %c0_18 = arith.constant 0 : index
    %c0_19 = arith.constant 0 : index
    %27 = vector.load %arg5[%c0_17, %c0_18, %c0_19] : memref<1x4x128xbf16, #tpu.memory_space<vmem>>, vector<1x4x128xbf16>
    %28 = vector.shape_cast %27 : vector<1x4x128xbf16> to vector<4x128xbf16>
    %29 = vector.shape_cast %26 : vector<4x128xbf16> to vector<1x4x128xbf16>
    tpu.vector_store %arg5[%c0_17, %c0_18, %c0_19], %29 {strides = array<i32>} : memref<1x4x128xbf16, #tpu.memory_space<vmem>>, vector<1x4x128xbf16>,
    return
  }
  func.func @transform_0(%arg0: i32) -> (i32, i32, i32) {
    %c0_i32 = arith.constant 0 : i32
    %c0_i32_0 = arith.constant 0 : i32
    %c0_i32_1 = arith.constant 0 : i32
    return %arg0, %c0_i32, %c0_i32_0 : i32, i32, i32
  }
  func.func @transform_1(%arg0: i32) -> (i32, i32, i32) {
    %c0_i32 = arith.constant 0 : i32
    %c0_i32_0 = arith.constant 0 : i32
    %c0_i32_1 = arith.constant 0 : i32
    %c0_i32_2 = arith.constant 0 : i32
    return %c0_i32, %c0_i32_0, %c0_i32_1 : i32, i32, i32
  }
  func.func @transform_2(%arg0: i32) -> (i32, i32) {
    %c0_i32 = arith.constant 0 : i32
    %c0_i32_0 = arith.constant 0 : i32
    %c0_i32_1 = arith.constant 0 : i32
    return %c0_i32, %c0_i32_0 : i32, i32
  }
  func.func @transform_3(%arg0: i32) -> (i32, i32) {
    %c0_i32 = arith.constant 0 : i32
    %c0_i32_0 = arith.constant 0 : i32
    %c0_i32_1 = arith.constant 0 : i32
    return %c0_i32, %c0_i32_0 : i32, i32
  }
  func.func @transform_4(%arg0: i32) -> (i32, i32, i32) {
    %c0_i32 = arith.constant 0 : i32
    %c0_i32_0 = arith.constant 0 : i32
    %c0_i32_1 = arith.constant 0 : i32
    return %arg0, %c0_i32, %c0_i32_0 : i32, i32, i32
  }
}

module attributes {stable_mosaic.version = 11 : i64} {
  func.func @conv_bn_relu_pool_kernel(%arg0: i32, %arg1: memref<1x6x128xbf16, #tpu.memory_space<vmem>>, %arg2: memref<3x128x256xbf16, #tpu.memory_space<vmem>>, %arg3: memref<1x256xf32, #tpu.memory_space<vmem>>, %arg4: memref<1x256xf32, #tpu.memory_space<vmem>>, %arg5: memref<1x2x256xbf16, #tpu.memory_space<vmem>>) attributes {dimension_semantics = [#tpu.dimension_semantics<parallel>], iteration_bounds = array<i64: 2>, scalar_prefetch = 0 : i64, scratch_operands = 0 : i64, tpu.core_type = #tpu.core_type<tc>, window_params = [{transform_indices = @transform_0, window_bounds = array<i64: 1, 6, 128>}, {pipeline_mode = #tpu.pipeline_mode<synchronous>, transform_indices = @transform_1, window_bounds = array<i64: 3, 128, 256>}, {pipeline_mode = #tpu.pipeline_mode<synchronous>, transform_indices = @transform_2, window_bounds = array<i64: 1, 256>}, {pipeline_mode = #tpu.pipeline_mode<synchronous>, transform_indices = @transform_3, window_bounds = array<i64: 1, 256>}, {transform_indices = @transform_4, window_bounds = array<i64: 1, 2, 256>}]} {
    %c0 = arith.constant 0 : index
    %c0_0 = arith.constant 0 : index
    %c0_1 = arith.constant 0 : index
    %0 = vector.load %arg1[%c0, %c0_0, %c0_1] : memref<1x6x128xbf16, #tpu.memory_space<vmem>>, vector<1x6x128xbf16>
    %1 = vector.shape_cast %0 : vector<1x6x128xbf16> to vector<6x128xbf16>
    %2 = vector.extract_strided_slice %1 {offsets = [0, 0], sizes = [4, 128], strides = [1, 1]} : vector<6x128xbf16> to vector<4x128xbf16>
    %c0_2 = arith.constant 0 : index
    %c0_3 = arith.constant 0 : index
    %c0_4 = arith.constant 0 : index
    %3 = vector.load %arg2[%c0_2, %c0_3, %c0_4] : memref<3x128x256xbf16, #tpu.memory_space<vmem>>, vector<1x128x256xbf16>
    %4 = vector.shape_cast %3 : vector<1x128x256xbf16> to vector<128x256xbf16>
    %cst = arith.constant dense<0.000000e+00> : vector<4x256xf32>
    %5 = tpu.matmul %2, %4, %cst {dimension_numbers = #tpu.dot_dimension_numbers<[1], [0], [0], [1], [0, 0, 1, 1], [], []>} : vector<4x128xbf16>, vector<128x256xbf16>, vector<4x256xf32> -> vector<4x256xf32>
    %6 = vector.extract_strided_slice %1 {offsets = [1, 0], sizes = [4, 128], strides = [1, 1]} : vector<6x128xbf16> to vector<4x128xbf16>
    %c1 = arith.constant 1 : index
    %c0_5 = arith.constant 0 : index
    %c0_6 = arith.constant 0 : index
    %7 = vector.load %arg2[%c1, %c0_5, %c0_6] : memref<3x128x256xbf16, #tpu.memory_space<vmem>>, vector<1x128x256xbf16>
    %8 = vector.shape_cast %7 : vector<1x128x256xbf16> to vector<128x256xbf16>
    %cst_7 = arith.constant dense<0.000000e+00> : vector<4x256xf32>
    %9 = tpu.matmul %6, %8, %cst_7 {dimension_numbers = #tpu.dot_dimension_numbers<[1], [0], [0], [1], [0, 0, 1, 1], [], []>} : vector<4x128xbf16>, vector<128x256xbf16>, vector<4x256xf32> -> vector<4x256xf32>
    %10 = arith.addf %5, %9 : vector<4x256xf32>
    %11 = vector.extract_strided_slice %1 {offsets = [2, 0], sizes = [4, 128], strides = [1, 1]} : vector<6x128xbf16> to vector<4x128xbf16>
    %c2 = arith.constant 2 : index
    %c0_8 = arith.constant 0 : index
    %c0_9 = arith.constant 0 : index
    %12 = vector.load %arg2[%c2, %c0_8, %c0_9] : memref<3x128x256xbf16, #tpu.memory_space<vmem>>, vector<1x128x256xbf16>
    %13 = vector.shape_cast %12 : vector<1x128x256xbf16> to vector<128x256xbf16>
    %cst_10 = arith.constant dense<0.000000e+00> : vector<4x256xf32>
    %14 = tpu.matmul %11, %13, %cst_10 {dimension_numbers = #tpu.dot_dimension_numbers<[1], [0], [0], [1], [0, 0, 1, 1], [], []>} : vector<4x128xbf16>, vector<128x256xbf16>, vector<4x256xf32> -> vector<4x256xf32>
    %15 = arith.addf %10, %14 : vector<4x256xf32>
    %c0_11 = arith.constant 0 : index
    %c0_12 = arith.constant 0 : index
    %16 = vector.load %arg3[%c0_11, %c0_12] : memref<1x256xf32, #tpu.memory_space<vmem>>, vector<1x256xf32>
    %17 = vector.broadcast %16 : vector<1x256xf32> to vector<4x256xf32>
    %18 = arith.mulf %15, %17 : vector<4x256xf32>
    %c0_13 = arith.constant 0 : index
    %c0_14 = arith.constant 0 : index
    %19 = vector.load %arg4[%c0_13, %c0_14] : memref<1x256xf32, #tpu.memory_space<vmem>>, vector<1x256xf32>
    %20 = vector.broadcast %19 : vector<1x256xf32> to vector<4x256xf32>
    %21 = arith.addf %18, %20 : vector<4x256xf32>
    %cst_15 = arith.constant 0.000000e+00 : f32
    %22 = vector.broadcast %cst_15 : f32 to vector<4x256xf32>
    %23 = arith.maximumf %21, %22 : vector<4x256xf32>
    %24 = vector.shape_cast %23 : vector<4x256xf32> to vector<2x2x256xf32>
    %cst_16 = arith.constant dense<0xFF800000> : vector<2x256xf32>
    %25 = vector.multi_reduction <maximumf>, %24, %cst_16 [1] : vector<2x2x256xf32> to vector<2x256xf32>
    %26 = arith.truncf %25 : vector<2x256xf32> to vector<2x256xbf16>
    %c0_17 = arith.constant 0 : index
    %c0_18 = arith.constant 0 : index
    %c0_19 = arith.constant 0 : index
    %27 = vector.load %arg5[%c0_17, %c0_18, %c0_19] : memref<1x2x256xbf16, #tpu.memory_space<vmem>>, vector<1x2x256xbf16>
    %28 = vector.shape_cast %27 : vector<1x2x256xbf16> to vector<2x256xbf16>
    %29 = vector.shape_cast %26 : vector<2x256xbf16> to vector<1x2x256xbf16>
    tpu.vector_store %arg5[%c0_17, %c0_18, %c0_19], %29 {strides = array<i32>} : memref<1x2x256xbf16, #tpu.memory_space<vmem>>, vector<1x2x256xbf16>,
    return
  }
  func.func @transform_0(%arg0: i32) -> (i32, i32, i32) {
    %c0_i32 = arith.constant 0 : i32
    %c0_i32_0 = arith.constant 0 : i32
    %c0_i32_1 = arith.constant 0 : i32
    return %arg0, %c0_i32, %c0_i32_0 : i32, i32, i32
  }
  func.func @transform_1(%arg0: i32) -> (i32, i32, i32) {
    %c0_i32 = arith.constant 0 : i32
    %c0_i32_0 = arith.constant 0 : i32
    %c0_i32_1 = arith.constant 0 : i32
    %c0_i32_2 = arith.constant 0 : i32
    return %c0_i32, %c0_i32_0, %c0_i32_1 : i32, i32, i32
  }
  func.func @transform_2(%arg0: i32) -> (i32, i32) {
    %c0_i32 = arith.constant 0 : i32
    %c0_i32_0 = arith.constant 0 : i32
    %c0_i32_1 = arith.constant 0 : i32
    return %c0_i32, %c0_i32_0 : i32, i32
  }
  func.func @transform_3(%arg0: i32) -> (i32, i32) {
    %c0_i32 = arith.constant 0 : i32
    %c0_i32_0 = arith.constant 0 : i32
    %c0_i32_1 = arith.constant 0 : i32
    return %c0_i32, %c0_i32_0 : i32, i32
  }
  func.func @transform_4(%arg0: i32) -> (i32, i32, i32) {
    %c0_i32 = arith.constant 0 : i32
    %c0_i32_0 = arith.constant 0 : i32
    %c0_i32_1 = arith.constant 0 : i32
    return %arg0, %c0_i32, %c0_i32_0 : i32, i32, i32
  }
}

module attributes {stable_mosaic.version = 11 : i64} {
  func.func @bilstm_kernel(%arg0: i32, %arg1: memref<2x8x256xbf16, #tpu.memory_space<vmem>>, %arg2: memref<256x1024xbf16, #tpu.memory_space<vmem>>, %arg3: memref<256x1024xbf16, #tpu.memory_space<vmem>>, %arg4: memref<1x1024xf32, #tpu.memory_space<vmem>>, %arg5: memref<2x8x256xbf16, #tpu.memory_space<vmem>>, %arg6: memref<2x8x1024xbf16, #tpu.memory_space<vmem>>, %arg7: memref<8x256xbf16, #tpu.memory_space<vmem>>, %arg8: memref<8x128xf32, #tpu.memory_space<vmem>>, %arg9: memref<8x128xf32, #tpu.memory_space<vmem>>) attributes {dimension_semantics = [#tpu.dimension_semantics<parallel>], iteration_bounds = array<i64: 1>, scalar_prefetch = 0 : i64, scratch_operands = 4 : i64, tpu.core_type = #tpu.core_type<tc>, window_params = [{transform_indices = @transform_0, window_bounds = array<i64: 2, 8, 256>}, {pipeline_mode = #tpu.pipeline_mode<synchronous>, transform_indices = @transform_1, window_bounds = array<i64: 256, 1024>}, {pipeline_mode = #tpu.pipeline_mode<synchronous>, transform_indices = @transform_2, window_bounds = array<i64: 256, 1024>}, {pipeline_mode = #tpu.pipeline_mode<synchronous>, transform_indices = @transform_3, window_bounds = array<i64: 1, 1024>}, {transform_indices = @transform_4, window_bounds = array<i64: 2, 8, 256>}]} {
    %c0 = arith.constant 0 : index
    %c0_0 = arith.constant 0 : index
    %c0_1 = arith.constant 0 : index
    %0 = vector.load %arg1[%c0, %c0_0, %c0_1] : memref<2x8x256xbf16, #tpu.memory_space<vmem>>, vector<2x8x256xbf16>
    %1 = vector.shape_cast %0 : vector<2x8x256xbf16> to vector<16x256xbf16>
    %c0_2 = arith.constant 0 : index
    %c0_3 = arith.constant 0 : index
    %2 = vector.load %arg2[%c0_2, %c0_3] : memref<256x1024xbf16, #tpu.memory_space<vmem>>, vector<256x1024xbf16>
    %cst = arith.constant dense<0.000000e+00> : vector<16x1024xf32>
    %3 = tpu.matmul %1, %2, %cst {dimension_numbers = #tpu.dot_dimension_numbers<[1], [0], [0], [1], [0, 0, 1, 1], [], []>} : vector<16x256xbf16>, vector<256x1024xbf16>, vector<16x1024xf32> -> vector<16x1024xf32>
    %c0_4 = arith.constant 0 : index
    %c0_5 = arith.constant 0 : index
    %4 = vector.load %arg4[%c0_4, %c0_5] : memref<1x1024xf32, #tpu.memory_space<vmem>>, vector<1x1024xf32>
    %5 = vector.broadcast %4 : vector<1x1024xf32> to vector<16x1024xf32>
    %6 = arith.addf %3, %5 : vector<16x1024xf32>
    %7 = arith.truncf %6 : vector<16x1024xf32> to vector<16x1024xbf16>
    %8 = vector.shape_cast %7 : vector<16x1024xbf16> to vector<2x8x1024xbf16>
    %c0_6 = arith.constant 0 : index
    %c0_7 = arith.constant 0 : index
    %c0_8 = arith.constant 0 : index
    %9 = vector.load %arg6[%c0_6, %c0_7, %c0_8] : memref<2x8x1024xbf16, #tpu.memory_space<vmem>>, vector<2x8x1024xbf16>
    tpu.vector_store %arg6[%c0_6, %c0_7, %c0_8], %8 {strides = array<i32>} : memref<2x8x1024xbf16, #tpu.memory_space<vmem>>, vector<2x8x1024xbf16>,
    %cst_9 = arith.constant 0.000000e+00 : bf16
    %10 = vector.broadcast %cst_9 : bf16 to vector<8x256xbf16>
    %c0_10 = arith.constant 0 : index
    %c0_11 = arith.constant 0 : index
    %11 = vector.load %arg7[%c0_10, %c0_11] : memref<8x256xbf16, #tpu.memory_space<vmem>>, vector<8x256xbf16>
    tpu.vector_store %arg7[%c0_10, %c0_11], %10 {strides = array<i32>} : memref<8x256xbf16, #tpu.memory_space<vmem>>, vector<8x256xbf16>,
    %cst_12 = arith.constant 0.000000e+00 : f32
    %12 = vector.broadcast %cst_12 : f32 to vector<8x128xf32>
    %c0_13 = arith.constant 0 : index
    %c0_14 = arith.constant 0 : index
    %13 = vector.load %arg8[%c0_13, %c0_14] : memref<8x128xf32, #tpu.memory_space<vmem>>, vector<8x128xf32>
    tpu.vector_store %arg8[%c0_13, %c0_14], %12 {strides = array<i32>} : memref<8x128xf32, #tpu.memory_space<vmem>>, vector<8x128xf32>,
    %cst_15 = arith.constant 0.000000e+00 : f32
    %14 = vector.broadcast %cst_15 : f32 to vector<8x128xf32>
    %c0_16 = arith.constant 0 : index
    %c0_17 = arith.constant 0 : index
    %15 = vector.load %arg9[%c0_16, %c0_17] : memref<8x128xf32, #tpu.memory_space<vmem>>, vector<8x128xf32>
    tpu.vector_store %arg9[%c0_16, %c0_17], %14 {strides = array<i32>} : memref<8x128xf32, #tpu.memory_space<vmem>>, vector<8x128xf32>,
    %c0_i32 = arith.constant 0 : i32
    %c2_i32 = arith.constant 2 : i32
    %16 = arith.addi %c0_i32, %c2_i32 : i32
    %c1_i32 = arith.constant 1 : i32
    scf.for %arg10 = %c0_i32 to %16 step %c1_i32  : i32 {
      %c1_i32_19 = arith.constant 1 : i32
      %17 = arith.muli %arg10, %c1_i32_19 : i32
      %c0_i32_20 = arith.constant 0 : i32
      %18 = arith.addi %c0_i32_20, %17 : i32
      %c1_i32_21 = arith.constant 1 : i32
      %19 = arith.subi %c1_i32_21, %18 : i32
      %20 = arith.index_cast %18 : i32 to index
      %c0_22 = arith.constant 0 : index
      %c0_23 = arith.constant 0 : index
      %21 = vector.load %arg6[%20, %c0_22, %c0_23] : memref<2x8x1024xbf16, #tpu.memory_space<vmem>>, vector<1x8x1024xbf16>
      %22 = vector.shape_cast %21 : vector<1x8x1024xbf16> to vector<8x1024xbf16>
      %23 = vector.extract_strided_slice %22 {offsets = [0, 0], sizes = [8, 512], strides = [1, 1]} : vector<8x1024xbf16> to vector<8x512xbf16>
      %24 = arith.extf %23 : vector<8x512xbf16> to vector<8x512xf32>
      %25 = arith.index_cast %19 : i32 to index
      %c0_24 = arith.constant 0 : index
      %c0_25 = arith.constant 0 : index
      %26 = vector.load %arg6[%25, %c0_24, %c0_25] : memref<2x8x1024xbf16, #tpu.memory_space<vmem>>, vector<1x8x1024xbf16>
      %27 = vector.shape_cast %26 : vector<1x8x1024xbf16> to vector<8x1024xbf16>
      %28 = vector.extract_strided_slice %27 {offsets = [0, 512], sizes = [8, 512], strides = [1, 1]} : vector<8x1024xbf16> to vector<8x512xbf16>
      %29 = arith.extf %28 : vector<8x512xbf16> to vector<8x512xf32>
      %c0_26 = arith.constant 0 : index
      %c0_27 = arith.constant 0 : index
      %30 = vector.load %arg7[%c0_26, %c0_27] : memref<8x256xbf16, #tpu.memory_space<vmem>>, vector<8x256xbf16>
      %c0_28 = arith.constant 0 : index
      %c0_29 = arith.constant 0 : index
      %31 = vector.load %arg3[%c0_28, %c0_29] : memref<256x1024xbf16, #tpu.memory_space<vmem>>, vector<256x1024xbf16>
      %cst_30 = arith.constant dense<0.000000e+00> : vector<8x1024xf32>
      %32 = tpu.matmul %30, %31, %cst_30 {dimension_numbers = #tpu.dot_dimension_numbers<[1], [0], [0], [1], [0, 0, 1, 1], [], []>} : vector<8x256xbf16>, vector<256x1024xbf16>, vector<8x1024xf32> -> vector<8x1024xf32>
      %33 = vector.extract_strided_slice %32 {offsets = [0, 0], sizes = [8, 512], strides = [1, 1]} : vector<8x1024xf32> to vector<8x512xf32>
      %34 = arith.addf %24, %33 : vector<8x512xf32>
      %35 = vector.extract_strided_slice %32 {offsets = [0, 512], sizes = [8, 512], strides = [1, 1]} : vector<8x1024xf32> to vector<8x512xf32>
      %36 = arith.addf %29, %35 : vector<8x512xf32>
      %c0_31 = arith.constant 0 : index
      %c0_32 = arith.constant 0 : index
      %37 = vector.load %arg8[%c0_31, %c0_32] : memref<8x128xf32, #tpu.memory_space<vmem>>, vector<8x128xf32>
      %38 = vector.extract_strided_slice %34 {offsets = [0, 0], sizes = [8, 128], strides = [1, 1]} : vector<8x512xf32> to vector<8x128xf32>
      %39 = arith.negf %38 : vector<8x128xf32>
      %40 = math.exp %39 : vector<8x128xf32>
      %cst_33 = arith.constant 1.000000e+00 : f32
      %41 = vector.broadcast %cst_33 : f32 to vector<8x128xf32>
      %42 = arith.addf %41, %40 : vector<8x128xf32>
      %43 = arith.divf %41, %42 : vector<8x128xf32>
      %44 = vector.extract_strided_slice %34 {offsets = [0, 128], sizes = [8, 128], strides = [1, 1]} : vector<8x512xf32> to vector<8x128xf32>
      %45 = arith.negf %44 : vector<8x128xf32>
      %46 = math.exp %45 : vector<8x128xf32>
      %cst_34 = arith.constant 1.000000e+00 : f32
      %47 = vector.broadcast %cst_34 : f32 to vector<8x128xf32>
      %48 = arith.addf %47, %46 : vector<8x128xf32>
      %49 = arith.divf %47, %48 : vector<8x128xf32>
      %50 = vector.extract_strided_slice %34 {offsets = [0, 256], sizes = [8, 128], strides = [1, 1]} : vector<8x512xf32> to vector<8x128xf32>
      %51 = math.tanh %50 : vector<8x128xf32>
      %52 = vector.extract_strided_slice %34 {offsets = [0, 384], sizes = [8, 128], strides = [1, 1]} : vector<8x512xf32> to vector<8x128xf32>
      %53 = arith.negf %52 : vector<8x128xf32>
      %54 = math.exp %53 : vector<8x128xf32>
      %cst_35 = arith.constant 1.000000e+00 : f32
      %55 = vector.broadcast %cst_35 : f32 to vector<8x128xf32>
      %56 = arith.addf %55, %54 : vector<8x128xf32>
      %57 = arith.divf %55, %56 : vector<8x128xf32>
      %58 = arith.mulf %49, %37 : vector<8x128xf32>
      %59 = arith.mulf %43, %51 : vector<8x128xf32>
      %60 = arith.addf %58, %59 : vector<8x128xf32>
      %61 = math.tanh %60 : vector<8x128xf32>
      %62 = arith.mulf %57, %61 : vector<8x128xf32>
      %c0_36 = arith.constant 0 : index
      %c0_37 = arith.constant 0 : index
      %63 = vector.load %arg9[%c0_36, %c0_37] : memref<8x128xf32, #tpu.memory_space<vmem>>, vector<8x128xf32>
      %64 = vector.extract_strided_slice %36 {offsets = [0, 0], sizes = [8, 128], strides = [1, 1]} : vector<8x512xf32> to vector<8x128xf32>
      %65 = arith.negf %64 : vector<8x128xf32>
      %66 = math.exp %65 : vector<8x128xf32>
      %cst_38 = arith.constant 1.000000e+00 : f32
      %67 = vector.broadcast %cst_38 : f32 to vector<8x128xf32>
      %68 = arith.addf %67, %66 : vector<8x128xf32>
      %69 = arith.divf %67, %68 : vector<8x128xf32>
      %70 = vector.extract_strided_slice %36 {offsets = [0, 128], sizes = [8, 128], strides = [1, 1]} : vector<8x512xf32> to vector<8x128xf32>
      %71 = arith.negf %70 : vector<8x128xf32>
      %72 = math.exp %71 : vector<8x128xf32>
      %cst_39 = arith.constant 1.000000e+00 : f32
      %73 = vector.broadcast %cst_39 : f32 to vector<8x128xf32>
      %74 = arith.addf %73, %72 : vector<8x128xf32>
      %75 = arith.divf %73, %74 : vector<8x128xf32>
      %76 = vector.extract_strided_slice %36 {offsets = [0, 256], sizes = [8, 128], strides = [1, 1]} : vector<8x512xf32> to vector<8x128xf32>
      %77 = math.tanh %76 : vector<8x128xf32>
      %78 = vector.extract_strided_slice %36 {offsets = [0, 384], sizes = [8, 128], strides = [1, 1]} : vector<8x512xf32> to vector<8x128xf32>
      %79 = arith.negf %78 : vector<8x128xf32>
      %80 = math.exp %79 : vector<8x128xf32>
      %cst_40 = arith.constant 1.000000e+00 : f32
      %81 = vector.broadcast %cst_40 : f32 to vector<8x128xf32>
      %82 = arith.addf %81, %80 : vector<8x128xf32>
      %83 = arith.divf %81, %82 : vector<8x128xf32>
      %84 = arith.mulf %75, %63 : vector<8x128xf32>
      %85 = arith.mulf %69, %77 : vector<8x128xf32>
      %86 = arith.addf %84, %85 : vector<8x128xf32>
      %87 = math.tanh %86 : vector<8x128xf32>
      %88 = arith.mulf %83, %87 : vector<8x128xf32>
      %c0_41 = arith.constant 0 : index
      %c0_42 = arith.constant 0 : index
      %89 = vector.load %arg8[%c0_41, %c0_42] : memref<8x128xf32, #tpu.memory_space<vmem>>, vector<8x128xf32>
      tpu.vector_store %arg8[%c0_41, %c0_42], %60 {strides = array<i32>} : memref<8x128xf32, #tpu.memory_space<vmem>>, vector<8x128xf32>,
      %c0_43 = arith.constant 0 : index
      %c0_44 = arith.constant 0 : index
      %90 = vector.load %arg9[%c0_43, %c0_44] : memref<8x128xf32, #tpu.memory_space<vmem>>, vector<8x128xf32>
      tpu.vector_store %arg9[%c0_43, %c0_44], %86 {strides = array<i32>} : memref<8x128xf32, #tpu.memory_space<vmem>>, vector<8x128xf32>,
      %91 = arith.truncf %62 : vector<8x128xf32> to vector<8x128xbf16>
      %92 = arith.truncf %88 : vector<8x128xf32> to vector<8x128xbf16>
      %c0_45 = arith.constant 0 : index
      %c0_46 = arith.constant 0 : index
      %93 = vector.load %arg7[%c0_45, %c0_46] : memref<8x256xbf16, #tpu.memory_space<vmem>>, vector<8x128xbf16>
      tpu.vector_store %arg7[%c0_45, %c0_46], %91 {strides = array<i32>} : memref<8x256xbf16, #tpu.memory_space<vmem>>, vector<8x128xbf16>,
      %c0_47 = arith.constant 0 : index
      %c128 = arith.constant 128 : index
      %94 = vector.load %arg7[%c0_47, %c128] : memref<8x256xbf16, #tpu.memory_space<vmem>>, vector<8x128xbf16>
      tpu.vector_store %arg7[%c0_47, %c128], %92 {strides = array<i32>} : memref<8x256xbf16, #tpu.memory_space<vmem>>, vector<8x128xbf16>,
      %95 = arith.index_cast %18 : i32 to index
      %c0_48 = arith.constant 0 : index
      %c0_49 = arith.constant 0 : index
      %96 = vector.load %arg5[%95, %c0_48, %c0_49] : memref<2x8x256xbf16, #tpu.memory_space<vmem>>, vector<1x8x128xbf16>
      %97 = vector.shape_cast %96 : vector<1x8x128xbf16> to vector<8x128xbf16>
      %98 = vector.shape_cast %91 : vector<8x128xbf16> to vector<1x8x128xbf16>
      tpu.vector_store %arg5[%95, %c0_48, %c0_49], %98 {strides = array<i32>} : memref<2x8x256xbf16, #tpu.memory_space<vmem>>, vector<1x8x128xbf16>,
      %99 = arith.index_cast %19 : i32 to index
      %c0_50 = arith.constant 0 : index
      %c128_51 = arith.constant 128 : index
      %100 = vector.load %arg5[%99, %c0_50, %c128_51] : memref<2x8x256xbf16, #tpu.memory_space<vmem>>, vector<1x8x128xbf16>
      %101 = vector.shape_cast %100 : vector<1x8x128xbf16> to vector<8x128xbf16>
      %102 = vector.shape_cast %92 : vector<8x128xbf16> to vector<1x8x128xbf16>
      tpu.vector_store %arg5[%99, %c0_50, %c128_51], %102 {strides = array<i32>} : memref<2x8x256xbf16, #tpu.memory_space<vmem>>, vector<1x8x128xbf16>,
    }
    %c2_i32_18 = arith.constant 2 : i32
    return
  }
  func.func @transform_0(%arg0: i32) -> (i32, i32, i32) {
    %c0_i32 = arith.constant 0 : i32
    %c0_i32_0 = arith.constant 0 : i32
    %c0_i32_1 = arith.constant 0 : i32
    return %c0_i32, %arg0, %c0_i32_0 : i32, i32, i32
  }
  func.func @transform_1(%arg0: i32) -> (i32, i32) {
    %c0_i32 = arith.constant 0 : i32
    %c0_i32_0 = arith.constant 0 : i32
    %c0_i32_1 = arith.constant 0 : i32
    return %c0_i32, %c0_i32_0 : i32, i32
  }
  func.func @transform_2(%arg0: i32) -> (i32, i32) {
    %c0_i32 = arith.constant 0 : i32
    %c0_i32_0 = arith.constant 0 : i32
    %c0_i32_1 = arith.constant 0 : i32
    return %c0_i32, %c0_i32_0 : i32, i32
  }
  func.func @transform_3(%arg0: i32) -> (i32, i32) {
    %c0_i32 = arith.constant 0 : i32
    %c0_i32_0 = arith.constant 0 : i32
    %c0_i32_1 = arith.constant 0 : i32
    return %c0_i32, %c0_i32_0 : i32, i32
  }
  func.func @transform_4(%arg0: i32) -> (i32, i32, i32) {
    %c0_i32 = arith.constant 0 : i32
    %c0_i32_0 = arith.constant 0 : i32
    %c0_i32_1 = arith.constant 0 : i32
    return %c0_i32, %arg0, %c0_i32_0 : i32, i32, i32
  }
}

module attributes {stable_mosaic.version = 11 : i64} {
  func.func @bilstm_last_kernel(%arg0: i32, %arg1: memref<2x8x256xbf16, #tpu.memory_space<vmem>>, %arg2: memref<256x1024xbf16, #tpu.memory_space<vmem>>, %arg3: memref<256x1024xbf16, #tpu.memory_space<vmem>>, %arg4: memref<1x1024xf32, #tpu.memory_space<vmem>>, %arg5: memref<8x256xbf16, #tpu.memory_space<vmem>>, %arg6: memref<2x8x512xbf16, #tpu.memory_space<vmem>>, %arg7: memref<8x128xbf16, #tpu.memory_space<vmem>>, %arg8: memref<8x128xf32, #tpu.memory_space<vmem>>) attributes {dimension_semantics = [#tpu.dimension_semantics<parallel>], iteration_bounds = array<i64: 1>, scalar_prefetch = 0 : i64, scratch_operands = 3 : i64, tpu.core_type = #tpu.core_type<tc>, window_params = [{transform_indices = @transform_0, window_bounds = array<i64: 2, 8, 256>}, {pipeline_mode = #tpu.pipeline_mode<synchronous>, transform_indices = @transform_1, window_bounds = array<i64: 256, 1024>}, {pipeline_mode = #tpu.pipeline_mode<synchronous>, transform_indices = @transform_2, window_bounds = array<i64: 256, 1024>}, {pipeline_mode = #tpu.pipeline_mode<synchronous>, transform_indices = @transform_3, window_bounds = array<i64: 1, 1024>}, {transform_indices = @transform_4, window_bounds = array<i64: 8, 256>}]} {
    %c0 = arith.constant 0 : index
    %c0_0 = arith.constant 0 : index
    %c0_1 = arith.constant 0 : index
    %0 = vector.load %arg1[%c0, %c0_0, %c0_1] : memref<2x8x256xbf16, #tpu.memory_space<vmem>>, vector<2x8x256xbf16>
    %1 = vector.shape_cast %0 : vector<2x8x256xbf16> to vector<16x256xbf16>
    %c0_2 = arith.constant 0 : index
    %c0_3 = arith.constant 0 : index
    %2 = vector.load %arg2[%c0_2, %c0_3] : memref<256x1024xbf16, #tpu.memory_space<vmem>>, vector<256x512xbf16>
    %cst = arith.constant dense<0.000000e+00> : vector<16x512xf32>
    %3 = tpu.matmul %1, %2, %cst {dimension_numbers = #tpu.dot_dimension_numbers<[1], [0], [0], [1], [0, 0, 1, 1], [], []>} : vector<16x256xbf16>, vector<256x512xbf16>, vector<16x512xf32> -> vector<16x512xf32>
    %c0_4 = arith.constant 0 : index
    %c0_5 = arith.constant 0 : index
    %4 = vector.load %arg4[%c0_4, %c0_5] : memref<1x1024xf32, #tpu.memory_space<vmem>>, vector<1x512xf32>
    %5 = vector.broadcast %4 : vector<1x512xf32> to vector<16x512xf32>
    %6 = arith.addf %3, %5 : vector<16x512xf32>
    %7 = arith.truncf %6 : vector<16x512xf32> to vector<16x512xbf16>
    %8 = vector.shape_cast %7 : vector<16x512xbf16> to vector<2x8x512xbf16>
    %c0_6 = arith.constant 0 : index
    %c0_7 = arith.constant 0 : index
    %c0_8 = arith.constant 0 : index
    %9 = vector.load %arg6[%c0_6, %c0_7, %c0_8] : memref<2x8x512xbf16, #tpu.memory_space<vmem>>, vector<2x8x512xbf16>
    tpu.vector_store %arg6[%c0_6, %c0_7, %c0_8], %8 {strides = array<i32>} : memref<2x8x512xbf16, #tpu.memory_space<vmem>>, vector<2x8x512xbf16>,
    %cst_9 = arith.constant 0.000000e+00 : bf16
    %10 = vector.broadcast %cst_9 : bf16 to vector<8x128xbf16>
    %c0_10 = arith.constant 0 : index
    %c0_11 = arith.constant 0 : index
    %11 = vector.load %arg7[%c0_10, %c0_11] : memref<8x128xbf16, #tpu.memory_space<vmem>>, vector<8x128xbf16>
    tpu.vector_store %arg7[%c0_10, %c0_11], %10 {strides = array<i32>} : memref<8x128xbf16, #tpu.memory_space<vmem>>, vector<8x128xbf16>,
    %cst_12 = arith.constant 0.000000e+00 : f32
    %12 = vector.broadcast %cst_12 : f32 to vector<8x128xf32>
    %c0_13 = arith.constant 0 : index
    %c0_14 = arith.constant 0 : index
    %13 = vector.load %arg8[%c0_13, %c0_14] : memref<8x128xf32, #tpu.memory_space<vmem>>, vector<8x128xf32>
    tpu.vector_store %arg8[%c0_13, %c0_14], %12 {strides = array<i32>} : memref<8x128xf32, #tpu.memory_space<vmem>>, vector<8x128xf32>,
    %c0_i32 = arith.constant 0 : i32
    %c2_i32 = arith.constant 2 : i32
    %14 = arith.addi %c0_i32, %c2_i32 : i32
    %c1_i32 = arith.constant 1 : i32
    scf.for %arg9 = %c0_i32 to %14 step %c1_i32  : i32 {
      %c1_i32_31 = arith.constant 1 : i32
      %52 = arith.muli %arg9, %c1_i32_31 : i32
      %c0_i32_32 = arith.constant 0 : i32
      %53 = arith.addi %c0_i32_32, %52 : i32
      %54 = arith.index_cast %53 : i32 to index
      %c0_33 = arith.constant 0 : index
      %c0_34 = arith.constant 0 : index
      %55 = vector.load %arg6[%54, %c0_33, %c0_34] : memref<2x8x512xbf16, #tpu.memory_space<vmem>>, vector<1x8x512xbf16>
      %56 = vector.shape_cast %55 : vector<1x8x512xbf16> to vector<8x512xbf16>
      %57 = arith.extf %56 : vector<8x512xbf16> to vector<8x512xf32>
      %c0_35 = arith.constant 0 : index
      %c0_36 = arith.constant 0 : index
      %58 = vector.load %arg7[%c0_35, %c0_36] : memref<8x128xbf16, #tpu.memory_space<vmem>>, vector<8x128xbf16>
      %c0_37 = arith.constant 0 : index
      %c0_38 = arith.constant 0 : index
      %59 = vector.load %arg3[%c0_37, %c0_38] : memref<256x1024xbf16, #tpu.memory_space<vmem>>, vector<128x512xbf16>
      %cst_39 = arith.constant dense<0.000000e+00> : vector<8x512xf32>
      %60 = tpu.matmul %58, %59, %cst_39 {dimension_numbers = #tpu.dot_dimension_numbers<[1], [0], [0], [1], [0, 0, 1, 1], [], []>} : vector<8x128xbf16>, vector<128x512xbf16>, vector<8x512xf32> -> vector<8x512xf32>
      %61 = arith.addf %57, %60 : vector<8x512xf32>
      %c0_40 = arith.constant 0 : index
      %c0_41 = arith.constant 0 : index
      %62 = vector.load %arg8[%c0_40, %c0_41] : memref<8x128xf32, #tpu.memory_space<vmem>>, vector<8x128xf32>
      %63 = vector.extract_strided_slice %61 {offsets = [0, 0], sizes = [8, 128], strides = [1, 1]} : vector<8x512xf32> to vector<8x128xf32>
      %64 = arith.negf %63 : vector<8x128xf32>
      %65 = math.exp %64 : vector<8x128xf32>
      %cst_42 = arith.constant 1.000000e+00 : f32
      %66 = vector.broadcast %cst_42 : f32 to vector<8x128xf32>
      %67 = arith.addf %66, %65 : vector<8x128xf32>
      %68 = arith.divf %66, %67 : vector<8x128xf32>
      %69 = vector.extract_strided_slice %61 {offsets = [0, 128], sizes = [8, 128], strides = [1, 1]} : vector<8x512xf32> to vector<8x128xf32>
      %70 = arith.negf %69 : vector<8x128xf32>
      %71 = math.exp %70 : vector<8x128xf32>
      %cst_43 = arith.constant 1.000000e+00 : f32
      %72 = vector.broadcast %cst_43 : f32 to vector<8x128xf32>
      %73 = arith.addf %72, %71 : vector<8x128xf32>
      %74 = arith.divf %72, %73 : vector<8x128xf32>
      %75 = vector.extract_strided_slice %61 {offsets = [0, 256], sizes = [8, 128], strides = [1, 1]} : vector<8x512xf32> to vector<8x128xf32>
      %76 = math.tanh %75 : vector<8x128xf32>
      %77 = vector.extract_strided_slice %61 {offsets = [0, 384], sizes = [8, 128], strides = [1, 1]} : vector<8x512xf32> to vector<8x128xf32>
      %78 = arith.negf %77 : vector<8x128xf32>
      %79 = math.exp %78 : vector<8x128xf32>
      %cst_44 = arith.constant 1.000000e+00 : f32
      %80 = vector.broadcast %cst_44 : f32 to vector<8x128xf32>
      %81 = arith.addf %80, %79 : vector<8x128xf32>
      %82 = arith.divf %80, %81 : vector<8x128xf32>
      %83 = arith.mulf %74, %62 : vector<8x128xf32>
      %84 = arith.mulf %68, %76 : vector<8x128xf32>
      %85 = arith.addf %83, %84 : vector<8x128xf32>
      %86 = math.tanh %85 : vector<8x128xf32>
      %87 = arith.mulf %82, %86 : vector<8x128xf32>
      %88 = arith.truncf %87 : vector<8x128xf32> to vector<8x128xbf16>
      %c0_45 = arith.constant 0 : index
      %c0_46 = arith.constant 0 : index
      %89 = vector.load %arg7[%c0_45, %c0_46] : memref<8x128xbf16, #tpu.memory_space<vmem>>, vector<8x128xbf16>
      tpu.vector_store %arg7[%c0_45, %c0_46], %88 {strides = array<i32>} : memref<8x128xbf16, #tpu.memory_space<vmem>>, vector<8x128xbf16>,
      %c0_47 = arith.constant 0 : index
      %c0_48 = arith.constant 0 : index
      %90 = vector.load %arg8[%c0_47, %c0_48] : memref<8x128xf32, #tpu.memory_space<vmem>>, vector<8x128xf32>
      tpu.vector_store %arg8[%c0_47, %c0_48], %85 {strides = array<i32>} : memref<8x128xf32, #tpu.memory_space<vmem>>, vector<8x128xf32>,
    }
    %c2_i32_15 = arith.constant 2 : i32
    %c1 = arith.constant 1 : index
    %c0_16 = arith.constant 0 : index
    %c0_17 = arith.constant 0 : index
    %15 = vector.load %arg1[%c1, %c0_16, %c0_17] : memref<2x8x256xbf16, #tpu.memory_space<vmem>>, vector<1x8x256xbf16>
    %16 = vector.shape_cast %15 : vector<1x8x256xbf16> to vector<8x256xbf16>
    %c0_18 = arith.constant 0 : index
    %c512 = arith.constant 512 : index
    %17 = vector.load %arg2[%c0_18, %c512] : memref<256x1024xbf16, #tpu.memory_space<vmem>>, vector<256x512xbf16>
    %cst_19 = arith.constant dense<0.000000e+00> : vector<8x512xf32>
    %18 = tpu.matmul %16, %17, %cst_19 {dimension_numbers = #tpu.dot_dimension_numbers<[1], [0], [0], [1], [0, 0, 1, 1], [], []>} : vector<8x256xbf16>, vector<256x512xbf16>, vector<8x512xf32> -> vector<8x512xf32>
    %c0_20 = arith.constant 0 : index
    %c512_21 = arith.constant 512 : index
    %19 = vector.load %arg4[%c0_20, %c512_21] : memref<1x1024xf32, #tpu.memory_space<vmem>>, vector<1x512xf32>
    %20 = vector.broadcast %19 : vector<1x512xf32> to vector<8x512xf32>
    %21 = arith.addf %18, %20 : vector<8x512xf32>
    %cst_22 = arith.constant 0.000000e+00 : f32
    %22 = vector.broadcast %cst_22 : f32 to vector<8x128xf32>
    %23 = vector.extract_strided_slice %21 {offsets = [0, 0], sizes = [8, 128], strides = [1, 1]} : vector<8x512xf32> to vector<8x128xf32>
    %24 = arith.negf %23 : vector<8x128xf32>
    %25 = math.exp %24 : vector<8x128xf32>
    %cst_23 = arith.constant 1.000000e+00 : f32
    %26 = vector.broadcast %cst_23 : f32 to vector<8x128xf32>
    %27 = arith.addf %26, %25 : vector<8x128xf32>
    %28 = arith.divf %26, %27 : vector<8x128xf32>
    %29 = vector.extract_strided_slice %21 {offsets = [0, 128], sizes = [8, 128], strides = [1, 1]} : vector<8x512xf32> to vector<8x128xf32>
    %30 = arith.negf %29 : vector<8x128xf32>
    %31 = math.exp %30 : vector<8x128xf32>
    %cst_24 = arith.constant 1.000000e+00 : f32
    %32 = vector.broadcast %cst_24 : f32 to vector<8x128xf32>
    %33 = arith.addf %32, %31 : vector<8x128xf32>
    %34 = arith.divf %32, %33 : vector<8x128xf32>
    %35 = vector.extract_strided_slice %21 {offsets = [0, 256], sizes = [8, 128], strides = [1, 1]} : vector<8x512xf32> to vector<8x128xf32>
    %36 = math.tanh %35 : vector<8x128xf32>
    %37 = vector.extract_strided_slice %21 {offsets = [0, 384], sizes = [8, 128], strides = [1, 1]} : vector<8x512xf32> to vector<8x128xf32>
    %38 = arith.negf %37 : vector<8x128xf32>
    %39 = math.exp %38 : vector<8x128xf32>
    %cst_25 = arith.constant 1.000000e+00 : f32
    %40 = vector.broadcast %cst_25 : f32 to vector<8x128xf32>
    %41 = arith.addf %40, %39 : vector<8x128xf32>
    %42 = arith.divf %40, %41 : vector<8x128xf32>
    %43 = arith.mulf %34, %22 : vector<8x128xf32>
    %44 = arith.mulf %28, %36 : vector<8x128xf32>
    %45 = arith.addf %43, %44 : vector<8x128xf32>
    %46 = math.tanh %45 : vector<8x128xf32>
    %47 = arith.mulf %42, %46 : vector<8x128xf32>
    %c0_26 = arith.constant 0 : index
    %c0_27 = arith.constant 0 : index
    %48 = vector.load %arg7[%c0_26, %c0_27] : memref<8x128xbf16, #tpu.memory_space<vmem>>, vector<8x128xbf16>
    %c0_28 = arith.constant 0 : index
    %c0_29 = arith.constant 0 : index
    %49 = vector.load %arg5[%c0_28, %c0_29] : memref<8x256xbf16, #tpu.memory_space<vmem>>, vector<8x128xbf16>
    tpu.vector_store %arg5[%c0_28, %c0_29], %48 {strides = array<i32>} : memref<8x256xbf16, #tpu.memory_space<vmem>>, vector<8x128xbf16>,
    %50 = arith.truncf %47 : vector<8x128xf32> to vector<8x128xbf16>
    %c0_30 = arith.constant 0 : index
    %c128 = arith.constant 128 : index
    %51 = vector.load %arg5[%c0_30, %c128] : memref<8x256xbf16, #tpu.memory_space<vmem>>, vector<8x128xbf16>
    tpu.vector_store %arg5[%c0_30, %c128], %50 {strides = array<i32>} : memref<8x256xbf16, #tpu.memory_space<vmem>>, vector<8x128xbf16>,
    return
  }
  func.func @transform_0(%arg0: i32) -> (i32, i32, i32) {
    %c0_i32 = arith.constant 0 : i32
    %c0_i32_0 = arith.constant 0 : i32
    %c0_i32_1 = arith.constant 0 : i32
    return %c0_i32, %arg0, %c0_i32_0 : i32, i32, i32
  }
  func.func @transform_1(%arg0: i32) -> (i32, i32) {
    %c0_i32 = arith.constant 0 : i32
    %c0_i32_0 = arith.constant 0 : i32
    %c0_i32_1 = arith.constant 0 : i32
    return %c0_i32, %c0_i32_0 : i32, i32
  }
  func.func @transform_2(%arg0: i32) -> (i32, i32) {
    %c0_i32 = arith.constant 0 : i32
    %c0_i32_0 = arith.constant 0 : i32
    %c0_i32_1 = arith.constant 0 : i32
    return %c0_i32, %c0_i32_0 : i32, i32
  }
  func.func @transform_3(%arg0: i32) -> (i32, i32) {
    %c0_i32 = arith.constant 0 : i32
    %c0_i32_0 = arith.constant 0 : i32
    %c0_i32_1 = arith.constant 0 : i32
    return %c0_i32, %c0_i32_0 : i32, i32
  }
  func.func @transform_4(%arg0: i32) -> (i32, i32) {
    %c0_i32 = arith.constant 0 : i32
    %c0_i32_0 = arith.constant 0 : i32
    return %arg0, %c0_i32 : i32, i32
  }
}

module attributes {stable_mosaic.version = 11 : i64} {
  func.func @fc_kernel(%arg0: memref<2x256xbf16, #tpu.memory_space<vmem>>, %arg1: memref<256x256xbf16, #tpu.memory_space<vmem>>, %arg2: memref<1x256xf32, #tpu.memory_space<vmem>>, %arg3: memref<256x8xbf16, #tpu.memory_space<vmem>>, %arg4: memref<1x8xf32, #tpu.memory_space<vmem>>, %arg5: memref<2x8xf32, #tpu.memory_space<vmem>>) attributes {dimension_semantics = [], scalar_prefetch = 0 : i64, scratch_operands = 0 : i64, tpu.core_type = #tpu.core_type<tc>} {
    %c0 = arith.constant 0 : index
    %c0_0 = arith.constant 0 : index
    %0 = vector.load %arg0[%c0, %c0_0] : memref<2x256xbf16, #tpu.memory_space<vmem>>, vector<2x256xbf16>
    %c0_1 = arith.constant 0 : index
    %c0_2 = arith.constant 0 : index
    %1 = vector.load %arg1[%c0_1, %c0_2] : memref<256x256xbf16, #tpu.memory_space<vmem>>, vector<256x256xbf16>
    %cst = arith.constant dense<0.000000e+00> : vector<2x256xf32>
    %2 = tpu.matmul %0, %1, %cst {dimension_numbers = #tpu.dot_dimension_numbers<[1], [0], [0], [1], [0, 0, 1, 1], [], []>} : vector<2x256xbf16>, vector<256x256xbf16>, vector<2x256xf32> -> vector<2x256xf32>
    %c0_3 = arith.constant 0 : index
    %c0_4 = arith.constant 0 : index
    %3 = vector.load %arg2[%c0_3, %c0_4] : memref<1x256xf32, #tpu.memory_space<vmem>>, vector<1x256xf32>
    %4 = vector.broadcast %3 : vector<1x256xf32> to vector<2x256xf32>
    %5 = arith.addf %2, %4 : vector<2x256xf32>
    %cst_5 = arith.constant 0.000000e+00 : f32
    %6 = vector.broadcast %cst_5 : f32 to vector<2x256xf32>
    %7 = arith.maximumf %5, %6 : vector<2x256xf32>
    %8 = arith.truncf %7 : vector<2x256xf32> to vector<2x256xbf16>
    %c0_6 = arith.constant 0 : index
    %c0_7 = arith.constant 0 : index
    %9 = vector.load %arg3[%c0_6, %c0_7] : memref<256x8xbf16, #tpu.memory_space<vmem>>, vector<256x8xbf16>
    %cst_8 = arith.constant dense<0.000000e+00> : vector<2x8xf32>
    %10 = tpu.matmul %8, %9, %cst_8 {dimension_numbers = #tpu.dot_dimension_numbers<[1], [0], [0], [1], [0, 0, 1, 1], [], []>} : vector<2x256xbf16>, vector<256x8xbf16>, vector<2x8xf32> -> vector<2x8xf32>
    %c0_9 = arith.constant 0 : index
    %c0_10 = arith.constant 0 : index
    %11 = vector.load %arg4[%c0_9, %c0_10] : memref<1x8xf32, #tpu.memory_space<vmem>>, vector<1x8xf32>
    %12 = vector.broadcast %11 : vector<1x8xf32> to vector<2x8xf32>
    %13 = arith.addf %10, %12 : vector<2x8xf32>
    %c0_11 = arith.constant 0 : index
    %c0_12 = arith.constant 0 : index
    %14 = vector.load %arg5[%c0_11, %c0_12] : memref<2x8xf32, #tpu.memory_space<vmem>>, vector<2x8xf32>
    tpu.vector_store %arg5[%c0_11, %c0_12], %13 {strides = array<i32>} : memref<2x8xf32, #tpu.memory_space<vmem>>, vector<2x8xf32>,
    return
  }
}

</mosaic_0001>

<bundles_post_ra>
// kernel: cnn_lstm_forward.7
= control target key start
LH: loop header
LB: loop body
LE: loop exit
PB: predicated region body
PF: predicated region fallthrough
CT: control target
= control target key end

     0   :  { %s811_s15 = smov 0   ;;  %s880_s0 = inlined_call_operand.vmem [shape: bf16[2,10,64], index: 0, kind: input, shape index: {}]   ;;  %s881_s1 = inlined_call_operand.vmem [shape: bf16[3,64,128], index: 1, kind: input, shape index: {}]   ;;  %s882_s2 = inlined_call_operand.vmem [shape: f32[1,128], index: 2, kind: input, shape index: {}]   ;;  %s883_s3 = inlined_call_operand.vmem [shape: f32[1,128], index: 3, kind: input, shape index: {}]   ;;  %s884_s4 = inlined_call_operand.vmem [shape: bf16[2,4,128], index: 4, kind: output, shape index: {}]  }
   0x1 LB: > { %s649_s16 = sadd.s32 4294967295, %s781_s15   ;;  %p653_p0 = scmp.ge.s32.totalorder %s781_s15, 1  ;;  %s781_s15 = sphi %s811_s15, %s14_s15  }
   0x2   : > { %p162_p1 = scmp.lt.s32.totalorder %s781_s15, 3 }
   0x4   : > { %p163_p2 = pnand %p653_p0, %p162_p1 }
   0x5   : > { %v762_v0 = vld [vmem:[%s881_s1] sm:$0xff] (!%p163_p2)   ;;  %v783_v1 = vmov (!%p163_p2), 0.0   ;;  %v763_v2 = vld [vmem:[%s881_s1 + $0x8] sm:$0xff] (!%p163_p2)   ;;  %vm784_vm0 = vmmov (!%p163_p2), 0   ;;  %p187_p3 = scmp.lt.s32.totalorder (!%p163_p2), %s649_s16, 1  ;;  %v764_v4 = vld [vmem:[%s881_s1 + $0x10] sm:$0xff] (!%p163_p2)   ;;  %v463_v27 = vlaneseq (!%p163_p2) }
   0x6   : > { %166 = sbr.rel (%p163_p2) target bundleno = 291 (0x123), region = 36  ;;  %722 = vmatprep.subr.bf16.mxu0 (!%p163_p2), %v783_v1  ;;  %710 = vmatprep.subr.bf16.mxu1 (!%p163_p2), %v783_v1  ;;  %v766_v3 = vld [vmem:[%s881_s1 + $0x20] sm:$0xff] (!%p163_p2)   ;;  %v769_v5 = vld [vmem:[%s881_s1 + $0x28] sm:$0xff] (!%p163_p2)   ;;  %v765_v8 = vld [vmem:[%s881_s1 + $0x18] sm:$0xff] (!%p163_p2)   ;;  %vm252_vm1 = vcmask (!%p163_p2), 523264   ;;  %vm480_vm2 = vcmask (!%p163_p2), 1041408  }
   0x7   : > { %723 = vmatpush3.bf16.msra.mxu0 (!%p163_p2), %v762_v0  ;;  %730 = vmatprep.mubr.msk.bf16.mxu0 (!%p163_p2), %vm784_vm0, %v783_v1  ;;  %v771_v10 = vld [vmem:[%s881_s1 + $0x30] sm:$0xff] (!%p163_p2)   ;;  %v768_v14 = vld [vmem:[%s881_s1 + $0x40] sm:$0xff] (!%p163_p2)   ;;  %v773_v15 = vld [vmem:[%s881_s1 + $0x38] sm:$0xff] (!%p163_p2)   ;;  %v785_v25 = vmov (!%p163_p2), 1983009808   ;;  %v464_v32 = vshrl.u32 (!%p163_p2), %v463_v27, 7 }
   0x8   : > { %724 = vmatprep.subr.bf16.mxu0 (!%p163_p2), %v783_v1  ;;  %718 = vmatprep.mubr.msk.bf16.mxu1 (!%p163_p2), %vm784_vm0, %v783_v1  ;;  %v770_v17 = vld [vmem:[%s881_s1 + $0x48] sm:$0xff] (!%p163_p2)   ;;  %v772_v18 = vld [vmem:[%s881_s1 + $0x50] sm:$0xff] (!%p163_p2)   ;;  %v774_v19 = vld [vmem:[%s881_s1 + $0x58] sm:$0xff] (!%p163_p2)   ;;  %v461_v26 = vunpack.c.l.s4 (!%p163_p2), %v785_v25  ;;  %vm578_vm3 = vcmask (!%p163_p2), 1041409   ;;  %vm581_vm4 = vcmask (!%p163_p2), 1042434   ;;  %vm584_vm5 = vcmask (!%p163_p2), 1043459  }
   0x9   : > { %711 = vmatpush3.bf16.msra.mxu1 (!%p163_p2), %v766_v3  ;;  %v689_v29 = vld [vmem:[%s882_s2] ss:$0 sm:$0xff] (!%p163_p2) }
   0xa   : > { %712 = vmatprep.subr.bf16.mxu1 (!%p163_p2), %v783_v1  ;;  %v462_v31 = vunpack.c.0.s8 (!%p163_p2), %v461_v26  ;;  %v690_v34 = vld [vmem:[%s883_s3] ss:$0 sm:$0xff] (!%p163_p2) }
   0xb   : > { %725 = vmatpush3.bf16.msra.mxu0 (!%p163_p2), %v763_v2 }
   0xc   : > { %726 = vmatprep.subr.bf16.mxu0 (!%p163_p2), %v783_v1  ;;  %v465_v39 = vsub.s32 (!%p163_p2), %v462_v31, %v464_v32 }
   0xd   : > { %s886_s16 = smov (!%p187_p3, %s649_s16), 1  ;;  %713 = vmatpush3.bf16.msra.mxu1 %v769_v5 }
   0xe   : > { %s694_s25 = sshll.u32 %s886_s16, 3  ;;  %714 = vmatprep.subr.bf16.mxu1 %v783_v1 }
   0xf   : > { %s191_s28 = scalar_lea.vmem %s880_s0, %s694_s25  ;;  %727 = vmatpush3.bf16.msra.mxu0 %v764_v4  ;;  %s656_s25 = sshll.u32 %s886_s16, 1 }
  0x10   : > { %v197_v6 = vld [vmem:[%s191_s28] sm:$0xf]  ;;  %v198_v7 = vld [vmem:[%s191_s28 + $0x4] sm:$0x1]  ;;  %728 = vmatprep.subr.bf16.mxu0 %v783_v1  ;;  %s195_s28 = scalar_lea.vmem %s884_s4, %s656_s25 }
  0x11   : > { %v665_v9 = vcombine.low %v197_v6, %v198_v7  ;;  %715 = vmatpush3.bf16.msra.mxu1 %v771_v10 }
  0x12   : > { %716 = vmatprep.subr.bf16.mxu1 %v783_v1 }
  0x13   : > { %v224_v11 = vshll.u32 %v665_v9, 16  ;;  %v222_v12 = vshrl.u32 %v665_v9, 16  ;;  %729 = vmatpush3.bf16.msra.mxu0 %v765_v8  ;;  %v372_v20 = vrot.slane %v665_v9, 1 }
  0x14   : > { %734 = vmatprep.subr.bf16.mxu0 %v783_v1 }
  0x15   : > { %v226_v13 = vrot.slane %v224_v11, 1  ;;  %717 = vmatpush3.bf16.msra.mxu1 %v773_v15 }
  0x16   : > { %731 = vmatmul.mubr.msk.bf16.vlgmr.msra.gmra.mrb[0].mxu0 %vm252_vm1, %v197_v6 }
  0x17   : > { %v227_v16 = vor.u32 %v226_v13, %v222_v12  ;;  %735 = vmatpush3.bf16.msra.mxu0 %v768_v14  ;;  %742 = vmatprep.mubr.msk.bf16.mxu0 %vm784_vm0, %v783_v1 }
  0x18   : > { %736 = vmatprep.subr.bf16.mxu0 %v783_v1 }
  0x19   : > { %719 = vmatmul.mubr.msk.bf16.vlgmr.msra.gmra.mrb[0].mxu1 %vm252_vm1, %v227_v16 }
  0x1b   : > { %737 = vmatpush3.bf16.msra.mxu0 %v770_v17 }
  0x1c   : > { %738 = vmatprep.subr.bf16.mxu0 %v783_v1 }
  0x1f   : > { %739 = vmatpush3.bf16.msra.mxu0 %v772_v18 }
  0x20   : > { %740 = vmatprep.subr.bf16.mxu0 %v783_v1 }
  0x23   : > { %741 = vmatpush3.bf16.msra.mxu0 %v774_v19 }
  0x26   : > { %743 = vmatmul.mubr.msk.bf16.vlgmr.msra.gmra.mrb[0].mxu0 %vm252_vm1, %v372_v20 }
  0xec   : > { %v290_v21 = vpop.f32.mrb[0].mxu1 }
  0xed   : > { %v720_v22 = vpop.f32.mrb[1].mxu1 }
  0xee   : > { %v293_v23 = vpop.f32.mrb[2].mxu1 }
  0xef   : > { %v721_v24 = vpop.f32.mrb[3].mxu1 }
  0xf9   : > { %v434_v28 = vpop.f32.mrb[0].mxu0 }
  0xfa   : > { %v746_v30 = vadd.f32 %v434_v28, %v290_v21  ;;  %v744_v33 = vpop.f32.mrb[1].mxu0 }
  0xfb   : > { %v437_v35 = vpop.f32.mrb[2].mxu0 }
  0xfc   : > { %v448_v36 = vmul.f32 %v746_v30, %v689_v29  ;;  %v745_v37 = vpop.f32.mrb[3].mxu0 }
  0xfe   : > { %v456_v38 = vadd.f32 %v690_v34, %v448_v36 }
 0x100   : > { %v457_v40 = vmax.f32 %v456_v38, 0.0 }
 0x102   : > { %v459_v41 = vcombine.high %v457_v40, %v457_v40  ;;  %v466_v42 = vrot.slane %v457_v40, %v465_v39 }
 0x104   : > { %v473_v43 = vrot.slane %v459_v41, %v465_v39  ;;  %v474_v44 = vcombine.high %v466_v42, %v466_v42  ;;  %v481_v45 = vsel %vm480_vm2, %v466_v42, -inf }
 0x105   : > { %v482_v46 = vrot.slane %v481_v45, 4 }
 0x106   : > { %v475_v47 = vcombine.high %v473_v43, %v473_v43  ;;  %v488_v48 = vsel %vm480_vm2, %v474_v44, -inf  ;;  %v495_v49 = vsel %vm480_vm2, %v473_v43, -inf }
 0x107   : > { %v483_v50 = vmax.f32 %v481_v45, %v482_v46  ;;  %v489_v51 = vrot.slane %v488_v48, 4  ;;  %v496_v52 = vrot.slane %v495_v49, 4 }
 0x108   : > { %v502_v53 = vsel %vm480_vm2, %v475_v47, -inf }
 0x109   : > { %v484_v54 = vrot.slane %v483_v50, 2  ;;  %v490_v55 = vmax.f32 %v488_v48, %v489_v51  ;;  %v497_v56 = vmax.f32 %v495_v49, %v496_v52  ;;  %v503_v57 = vrot.slane %v502_v53, 4 }
 0x10b   : > { %v485_v58 = vmax.f32 %v483_v50, %v484_v54  ;;  %v491_v59 = vrot.slane %v490_v55, 2  ;;  %v498_v60 = vrot.slane %v497_v56, 2  ;;  %v504_v61 = vmax.f32 %v502_v53, %v503_v57 }
 0x10d   : > { %v486_v62 = vrot.slane %v485_v58, 1  ;;  %v492_v63 = vmax.f32 %v490_v55, %v491_v59  ;;  %v499_v0 = vmax.f32 %v497_v56, %v498_v60  ;;  %v505_v1 = vrot.slane %v504_v61, 2 }
 0x10f   : > { %v487_v2 = vmax.f32 %v485_v58, %v486_v62  ;;  %v493_v3 = vrot.slane %v492_v63, 1  ;;  %v500_v4 = vrot.slane %v499_v0, 1  ;;  %v506_v5 = vmax.f32 %v504_v61, %v505_v1 }
 0x111   : > { %v494_v6 = vmax.f32 %v492_v63, %v493_v3  ;;  %v501_v7 = vmax.f32 %v499_v0, %v500_v4  ;;  %v507_v8 = vrot.slane %v506_v5, 1  ;;  %v509_v9 = vpack.c.bf16 %v487_v2, %v487_v2 }
 0x113   : > { %v508_v10 = vmax.f32 %v506_v5, %v507_v8  ;;  %v510_v11 = vpack.c.bf16 %v494_v6, %v494_v6  ;;  %v511_v12 = vpack.c.bf16 %v501_v7, %v501_v7  ;;  %v523_v13 = vrot.slane %v509_v9, %v465_v39 }
 0x115   : > { %v512_v14 = vpack.c.bf16 %v508_v10, %v508_v10  ;;  %v530_v15 = vrot.slane %v510_v11, %v465_v39  ;;  %v537_v16 = vrot.slane %v511_v12, %v465_v39  ;;  %v551_v18 = vrot.slane %v523_v13, %v465_v39 }
 0x117   : > { %v544_v17 = vrot.slane %v512_v14, %v465_v39  ;;  %v558_v19 = vrot.slane %v530_v15, %v465_v39  ;;  %v565_v20 = vrot.slane %v537_v16, %v465_v39  ;;  %v573_v24 = vunpack.c.l.b16 %v551_v18 }
 0x119   : > { %v572_v21 = vrot.slane %v544_v17, %v465_v39  ;;  %v574_v22 = vunpack.c.l.b16 %v558_v19  ;;  %v575_v23 = vunpack.c.l.b16 %v565_v20 }
 0x11b   : > { %v576_v25 = vunpack.c.l.b16 %v572_v21  ;;  %v577_v26 = vrot.slane %v574_v22, 7  ;;  %v580_v27 = vrot.slane %v575_v23, 6 }
 0x11d   : > { %v579_v28 = vsel %vm578_vm3, %v577_v26, %v573_v24  ;;  %v583_v29 = vrot.slane %v576_v25, 5 }
 0x11e   : > { %v582_v30 = vsel %vm581_vm4, %v580_v27, %v579_v28 }
 0x11f   : > { %v585_v31 = vsel %vm584_vm5, %v583_v29, %v582_v30 }
 0x120   : > { %v586_v32 = vpack.c.b16 %v585_v31, %v585_v31 }
 0x122   : > { %691 = vst.sshfl [vmem:[%s195_s28] sm:$0x3 pattern:$0x76325410] %v586_v32 }
 0x123 PF: > { %s14_s15 = sadd.s32 1, %s781_s15  }
 0x124   : > { %p11_p4 = scmp.ge.s32.totalorder %s14_s15, 4  }
 0x126   :  { %13 = sbr.rel (!%p11_p4) target bundleno = 1 (0x1), region = 68 }

// kernel: cnn_lstm_forward.6
= control target key start
LH: loop header
LB: loop body
LE: loop exit
PB: predicated region body
PF: predicated region fallthrough
CT: control target
= control target key end

     0   :  { %s720_s15 = smov 0   ;;  %s775_s0 = inlined_call_operand.vmem [shape: bf16[2,18,4], index: 0, kind: input, shape index: {}]   ;;  %s776_s1 = inlined_call_operand.vmem [shape: bf16[3,4,64], index: 1, kind: input, shape index: {}]   ;;  %s777_s2 = inlined_call_operand.vmem [shape: f32[1,64], index: 2, kind: input, shape index: {}]   ;;  %s778_s3 = inlined_call_operand.vmem [shape: f32[1,64], index: 3, kind: input, shape index: {}]   ;;  %s779_s4 = inlined_call_operand.vmem [shape: bf16[2,8,64], index: 4, kind: output, shape index: {}]  }
   0x1 LB: > { %s606_s16 = sadd.s32 4294967295, %s690_s15   ;;  %p610_p0 = scmp.ge.s32.totalorder %s690_s15, 1  ;;  %s690_s15 = sphi %s720_s15, %s14_s15  }
   0x2   : > { %p162_p1 = scmp.lt.s32.totalorder %s690_s15, 3 }
   0x4   : > { %p163_p2 = pnand %p610_p0, %p162_p1 }
   0x5   : > { %v200_v0 = vld [vmem:[%s776_s1] sm:$0x3] (!%p163_p2)  ;;  %vm228_vm0 = vcmask (!%p163_p2), 1041408   ;;  %p187_p3 = scmp.lt.s32.totalorder (!%p163_p2), %s606_s16, 1  ;;  %v692_v1 = vmov (!%p163_p2), 0.0   ;;  %vm693_vm1 = vmmov (!%p163_p2), 0   ;;  %v400_v24 = vlaneseq (!%p163_p2) }
   0x6   : > { %166 = sbr.rel (%p163_p2) target bundleno = 282 (0x11a), region = 36  ;;  %652 = vmatprep.subr.bf16.mxu0 (!%p163_p2), %v692_v1  ;;  %v276_v2 = vsel (!%p163_p2), %vm228_vm0, %v200_v0, 0  ;;  %654 = vmatprep.mubr.msk.bf16.mxu0 (!%p163_p2), %vm693_vm1, %v692_v1  ;;  %v613_v3 = vld [vmem:[%s776_s1 + $0x2] sm:$0x3] (!%p163_p2)  ;;  %v618_v5 = vld [vmem:[%s776_s1 + $0x4] sm:$0x3] (!%p163_p2) }
   0x7   : > { %653 = vmatpush3.bf16.msra.mxu0 (!%p163_p2), %v276_v2  ;;  %646 = vmatprep.subr.bf16.mxu1 (!%p163_p2), %v692_v1  ;;  %v230_v4 = vsel (!%p163_p2), %vm228_vm0, %v613_v3, 0  ;;  %vm224_vm2 = vcmask (!%p163_p2), 31744   ;;  %v329_v7 = vsel (!%p163_p2), %vm228_vm0, %v618_v5, 0  ;;  %vm211_vm3 = vsmask.f32 (!%p163_p2), 7424 }
   0x8   : > { %658 = vmatprep.subr.bf16.mxu0 (!%p163_p2), %v692_v1  ;;  %647 = vmatpush3.bf16.msra.mxu1 (!%p163_p2), %v230_v4  ;;  %vm321_vm4 = vcmask (!%p163_p2), 1046528   ;;  %v694_v22 = vmov (!%p163_p2), 1983009808   ;;  %v620_v27 = vld [vmem:[%s777_s2] ss:$0 sm:$0xff] (!%p163_p2)  ;;  %v401_v30 = vshrl.u32 (!%p163_p2), %v400_v24, 7 }
   0x9   : > { %648 = vmatprep.mubr.msk.bf16.mxu1 (!%p163_p2), %vm693_vm1, %v692_v1  ;;  %v398_v23 = vunpack.c.l.s4 (!%p163_p2), %v694_v22  ;;  %v621_v32 = vld [vmem:[%s778_s3] ss:$0 sm:$0xff] (!%p163_p2)  ;;  %vm438_vm5 = vcmask (!%p163_p2), 517120   ;;  %vm535_vm6 = vcmask (!%p163_p2), 1041409   ;;  %vm537_vm7 = vcmask (!%p163_p2), 1042434  }
   0xa   : > { %vm539_vm8 = vcmask (!%p163_p2), 1043459   ;;  %vm541_vm9 = vcmask (!%p163_p2), 1044484   ;;  %vm543_vm10 = vcmask (!%p163_p2), 1045509   ;;  %vm545_vm11 = vcmask (!%p163_p2), 1046534  }
   0xb   : > { %v399_v29 = vunpack.c.0.s8 (!%p163_p2), %v398_v23  ;;  %vm547_vm12 = vcmask (!%p163_p2), 1047559   ;;  %vm551_vm13 = vcmask (!%p163_p2), 519168  }
   0xd   : > { %s781_s16 = smov (!%p187_p3, %s606_s16), 1  ;;  %v402_v38 = vsub.s32 %v399_v29, %v401_v30 }
   0xe   : > { %s670_s21 = smul.u32 12, %s781_s16  ;;  %s612_s5 = sshll.u32 %s781_s16, 2 }
   0xf   : > { %s195_s8 = scalar_lea.vmem %s779_s4, %s612_s5 }
  0x10   : > { %s191_s26 = scalar_lea.vmem %s775_s0, %s670_s21 }
  0x11   : > { %v682_v6 = vld [vmem:[%s191_s26] sm:$0xff]   ;;  %v683_v8 = vld [vmem:[%s191_s26 + $0x8] ss:$0 sps:$4 sm:$0x11]  }
  0x12   : > { %655 = vmatmul.mubr.msk.bf16.vlgmr.msra.gmra.mrb[0].mxu0 %vm224_vm2, %v682_v6  ;;  %v213_v9 = vshrl.u32 %v682_v6, 16  ;;  %v215_v10 = vshll.u32 %v682_v6, 16  ;;  %v220_v11 = vshll.u32 %v683_v8, 16  ;;  %v322_v15 = vrot.slane %v682_v6, 1 }
  0x13   : > { %659 = vmatpush3.bf16.msra.mxu0 %v329_v7  ;;  %660 = vmatprep.mubr.msk.bf16.mxu0 %vm693_vm1, %v692_v1  ;;  %v323_v16 = vrot.slane %v683_v8, 1 }
  0x14   : > { %v217_v12 = vrot.slane %v215_v10, 1  ;;  %v222_v13 = vrot.slane %v220_v11, 1 }
  0x15   : > { %v324_v18 = vsel %vm321_vm4, %v322_v15, %v323_v16 }
  0x16   : > { %v218_v14 = vor.u32 %v217_v12, %v213_v9 }
  0x18   : > { %v223_v17 = vsel %vm211_vm3, %v218_v14, %v222_v13 }
  0x19   : > { %649 = vmatmul.mubr.msk.bf16.vlgmr.msra.gmra.mrb[0].mxu1 %vm224_vm2, %v223_v17 }
  0x1e   : > { %661 = vmatmul.mubr.msk.bf16.vlgmr.msra.gmra.mrb[0].mxu0 %vm224_vm2, %v324_v18 }
  0xec   : > { %v266_v19 = vpop.f32.mrb[0].mxu1 }
  0xed   : > { %v650_v20 = vpop.f32.mrb[1].mxu1 }
  0xee   : > { %v269_v21 = vpop.f32.mrb[2].mxu1 }
  0xef   : > { %v651_v25 = vpop.f32.mrb[3].mxu1 }
  0xf1   : > { %v365_v26 = vpop.f32.mrb[0].mxu0 }
  0xf2   : > { %v664_v28 = vadd.f32 %v365_v26, %v266_v19  ;;  %v662_v31 = vpop.f32.mrb[1].mxu0 }
  0xf3   : > { %v368_v33 = vpop.f32.mrb[2].mxu0 }
  0xf4   : > { %v381_v34 = vmul.f32 %v664_v28, %v620_v27  ;;  %v665_v35 = vadd.f32 %v368_v33, %v269_v21  ;;  %v663_v36 = vpop.f32.mrb[3].mxu0 }
  0xf6   : > { %v390_v37 = vadd.f32 %v621_v32, %v381_v34  ;;  %v382_v39 = vmul.f32 %v665_v35, %v620_v27 }
  0xf8   : > { %v392_v40 = vmax.f32 %v390_v37, 0.0  ;;  %v391_v41 = vadd.f32 %v621_v32, %v382_v39 }
  0xfa   : > { %v396_v42 = vcombine.high %v392_v40, %v392_v40  ;;  %v403_v43 = vrot.slane %v392_v40, %v402_v38  ;;  %v393_v44 = vmax.f32 %v391_v41, 0.0 }
  0xfc   : > { %v410_v45 = vrot.slane %v396_v42, %v402_v38  ;;  %v411_v46 = vcombine.high %v403_v43, %v403_v43  ;;  %v439_v47 = vsel %vm438_vm5, %v403_v43, -inf  ;;  %v413_v48 = vcombine.high %v393_v44, %v393_v44 }
  0xfd   : > { %v440_v49 = vrot.slane %v439_v47, 4  ;;  %v420_v50 = vrot.slane %v393_v44, %v402_v38 }
  0xfe   : > { %v412_v51 = vcombine.high %v410_v45, %v410_v45  ;;  %v446_v52 = vsel %vm438_vm5, %v411_v46, -inf  ;;  %v453_v53 = vsel %vm438_vm5, %v410_v45, -inf  ;;  %v427_v54 = vrot.slane %v413_v48, %v402_v38 }
  0xff   : > { %v441_v55 = vmax.f32 %v439_v47, %v440_v49  ;;  %v447_v56 = vrot.slane %v446_v52, 4  ;;  %v454_v57 = vrot.slane %v453_v53, 4  ;;  %v428_v58 = vcombine.high %v420_v50, %v420_v50 }
 0x100   : > { %v460_v59 = vsel %vm438_vm5, %v412_v51, -inf  ;;  %v429_v60 = vcombine.high %v427_v54, %v427_v54  ;;  %v467_v61 = vsel %vm438_vm5, %v420_v50, -inf  ;;  %v481_v62 = vsel %vm438_vm5, %v427_v54, -inf }
 0x101   : > { %v442_v63 = vrot.slane %v441_v55, 2  ;;  %v448_v0 = vmax.f32 %v446_v52, %v447_v56  ;;  %v455_v1 = vmax.f32 %v453_v53, %v454_v57  ;;  %v461_v2 = vrot.slane %v460_v59, 4 }
 0x102   : > { %v468_v3 = vrot.slane %v467_v61, 4  ;;  %v474_v4 = vsel %vm438_vm5, %v428_v58, -inf  ;;  %v482_v5 = vrot.slane %v481_v62, 4  ;;  %v488_v6 = vsel %vm438_vm5, %v429_v60, -inf }
 0x103   : > { %v443_v7 = vmax.f32 %v441_v55, %v442_v63  ;;  %v449_v8 = vrot.slane %v448_v0, 2  ;;  %v456_v9 = vrot.slane %v455_v1, 2  ;;  %v462_v10 = vmax.f32 %v460_v59, %v461_v2 }
 0x104   : > { %v469_v11 = vmax.f32 %v467_v61, %v468_v3  ;;  %v475_v12 = vrot.slane %v474_v4, 4  ;;  %v483_v13 = vmax.f32 %v481_v62, %v482_v5  ;;  %v489_v14 = vrot.slane %v488_v6, 4 }
 0x105   : > { %v444_v15 = vrot.slane %v443_v7, 1  ;;  %v450_v16 = vmax.f32 %v448_v0, %v449_v8  ;;  %v457_v17 = vmax.f32 %v455_v1, %v456_v9  ;;  %v463_v18 = vrot.slane %v462_v10, 2 }
 0x106   : > { %v470_v19 = vrot.slane %v469_v11, 2  ;;  %v476_v20 = vmax.f32 %v474_v4, %v475_v12  ;;  %v484_v21 = vrot.slane %v483_v13, 2  ;;  %v490_v22 = vmax.f32 %v488_v6, %v489_v14 }
 0x107   : > { %v445_v23 = vmax.f32 %v443_v7, %v444_v15  ;;  %v451_v24 = vrot.slane %v450_v16, 1  ;;  %v458_v25 = vrot.slane %v457_v17, 1  ;;  %v464_v26 = vmax.f32 %v462_v10, %v463_v18 }
 0x108   : > { %v471_v27 = vmax.f32 %v469_v11, %v470_v19  ;;  %v477_v28 = vrot.slane %v476_v20, 2  ;;  %v485_v29 = vmax.f32 %v483_v13, %v484_v21  ;;  %v491_v30 = vrot.slane %v490_v22, 2 }
 0x109   : > { %v452_v31 = vmax.f32 %v450_v16, %v451_v24  ;;  %v459_v32 = vmax.f32 %v457_v17, %v458_v25  ;;  %v465_v33 = vrot.slane %v464_v26, 1  ;;  %v632_v34 = vpack.c.bf16 %v445_v23, %v445_v23 }
 0x10a   : > { %v472_v35 = vrot.slane %v471_v27, 1  ;;  %v478_v36 = vmax.f32 %v476_v20, %v477_v28  ;;  %v486_v37 = vrot.slane %v485_v29, 1  ;;  %v492_v38 = vmax.f32 %v490_v22, %v491_v30 }
 0x10b   : > { %v466_v39 = vmax.f32 %v464_v26, %v465_v33  ;;  %v633_v40 = vpack.c.bf16 %v452_v31, %v452_v31  ;;  %v634_v41 = vpack.c.bf16 %v459_v32, %v459_v32  ;;  %v527_v47 = vunpack.c.l.b16 %v632_v34 }
 0x10c   : > { %v473_v42 = vmax.f32 %v471_v27, %v472_v35  ;;  %v479_v43 = vrot.slane %v478_v36, 1  ;;  %v487_v44 = vmax.f32 %v485_v29, %v486_v37  ;;  %v493_v45 = vrot.slane %v492_v38, 1 }
 0x10d   : > { %v635_v46 = vpack.c.bf16 %v466_v39, %v466_v39  ;;  %v528_v48 = vunpack.c.l.b16 %v633_v40  ;;  %v529_v49 = vunpack.c.l.b16 %v634_v41 }
 0x10e   : > { %v480_v50 = vmax.f32 %v478_v36, %v479_v43  ;;  %v494_v51 = vmax.f32 %v492_v38, %v493_v45  ;;  %v636_v52 = vpack.c.bf16 %v473_v42, %v473_v42  ;;  %v638_v55 = vpack.c.bf16 %v487_v44, %v487_v44 }
 0x10f   : > { %v530_v53 = vunpack.c.l.b16 %v635_v46  ;;  %v536_v54 = vsel %vm535_vm6, %v528_v48, %v527_v47 }
 0x110   : > { %v538_v56 = vsel %vm537_vm7, %v529_v49, %v536_v54  ;;  %v637_v57 = vpack.c.bf16 %v480_v50, %v480_v50  ;;  %v639_v58 = vpack.c.bf16 %v494_v51, %v494_v51  ;;  %v531_v59 = vunpack.c.l.b16 %v636_v52 }
 0x111   : > { %v540_v60 = vsel %vm539_vm8, %v530_v53, %v538_v56  ;;  %v533_v63 = vunpack.c.l.b16 %v638_v55 }
 0x112   : > { %v532_v61 = vunpack.c.l.b16 %v637_v57  ;;  %v542_v62 = vsel %vm541_vm9, %v531_v59, %v540_v60  ;;  %v534_v0 = vunpack.c.l.b16 %v639_v58 }
 0x114   : > { %v544_v1 = vsel %vm543_vm10, %v532_v61, %v542_v62 }
 0x115   : > { %v546_v2 = vsel %vm545_vm11, %v533_v63, %v544_v1 }
 0x116   : > { %v548_v3 = vsel %vm547_vm12, %v534_v0, %v546_v2 }
 0x117   : > { %v549_v4 = vpack.c.b16 %v548_v3, %v548_v3 }
 0x119   : > { %552 = vst.msk [vmem:[%s195_s8] sm:$0xf] %vm551_vm13, %v549_v4 }
 0x11a PF: > { %s14_s15 = sadd.s32 1, %s690_s15  }
 0x11b   : > { %p11_p4 = scmp.ge.s32.totalorder %s14_s15, 4  }
 0x11d   :  { %13 = sbr.rel (!%p11_p4) target bundleno = 1 (0x1), region = 68 }

// kernel: cnn_lstm_forward.8
= control target key start
LH: loop header
LB: loop body
LE: loop exit
PB: predicated region body
PF: predicated region fallthrough
CT: control target
= control target key end

     0   :  { %9 = vsyncpa [#allocation3], 0  ;;  %s1150_s15 = smov 0   ;;  %s1367_s0 = inlined_call_operand.vmem [shape: bf16[2,6,128], index: 0, kind: input, shape index: {}]   ;;  %s1368_s1 = inlined_call_operand.vmem [shape: bf16[3,128,256], index: 1, kind: input, shape index: {}]   ;;  %s1369_s2 = inlined_call_operand.vmem [shape: f32[1,256], index: 2, kind: input, shape index: {}]   ;;  %s1370_s3 = inlined_call_operand.hbm [shape: f32[1,256], index: 3, kind: input, shape index: {}]   ;;  %s1371_s4 = inlined_call_operand.vmem [shape: bf16[2,2,256], index: 4, kind: output, shape index: {}]  }
   0x1 LB: > { %s1156_s16 = sadd.s32 4294967295, %s1118_s15   ;;  %p885_p0 = scmp.ge.s32.totalorder %s1118_s15, 1  ;;  %s1118_s15 = sphi %s1150_s15, %s15_s15  }
   0x2   : > { %p135_p1 = scmp.lt.s32.totalorder %s1118_s15, 3  ;;  %p1372_p3 = scmp.eq.s32.totalorder %s1156_s16, 0 }
   0x3   : > { %s1120_s18 = smov [#allocation2]   ;;  %s1080_s23 = scalar_lea.hbm %s1370_s3, 32 }
   0x4   : > { %p1160_p2 = pnand %p885_p0, %p135_p1  ;;  %s154_s19 = sshll.u32 %s1120_s18, 4  ;;  %s155_s19 = int_to_ptr.vmem [resolvable:$true] %s154_s19 }
   0x5   : > { %p1081_p6 = scmp.ne.s32.totalorder %s1370_s3, %s1080_s23  ;;  %p1087_p10 = scmp.lt.u32.totalorder %s1080_s23, %s1370_s3 }
   0x6   : > { %s1374_s17 = scalar_select %p1160_p2, 1, 0 }
   0x7   : > { %p988_p4 = pneg %p1160_p2 }
   0x9   : > { %p1169_p5 = pnand %p1372_p3, %p988_p4 }
   0xb   : > { %p1082_p7 = pneg %p1169_p5 }
   0xd   : > { %p1083_p8 = pnand %p1082_p7, %p1081_p6 }
   0xf   : > { %p1084_p9 = pneg %p1083_p8 }
  0x11   : > { %p1089_p11 = pnand %p1087_p10, %p1084_p9 }
  0x13   : > { %1092 = shalt.err (!%p1089_p11)
}
  0x14   : > { %s1093_s28 = scalar_lea.vmem %s155_s19, 32  ;;  %p1101_p1 = scmp.lt.s32.totalorder %s155_s19, %s155_s19 }
  0x15   : > { %p1094_p12 = scmp.ne.s32.totalorder %s155_s19, %s1093_s28  ;;  %p1102_p4 = scmp.lt.s32.totalorder %s1093_s28, %s1093_s28 }
  0x17   : > { %p1096_p13 = pnand %p1094_p12, %p1082_p7  ;;  %p1103_p3 = por %p1102_p4, %p1101_p1 }
  0x19   : > { %p1097_p0 = pneg %p1096_p13 }
  0x1b   : > { %p1104_p2 = pnand %p1103_p3, %p1097_p0 }
  0x1d   : > { %1107 = shalt.err (!%p1104_p2)
}
  0x1e   : > { %991 = dma.hbm_to_vmem [thread:$0]  (!%p1169_p5), %s1370_s3, 32, %s155_s19, [#allocation3]  }
  0x1f   : > { %p1376_p6 = scmp.ne.s32.totalorder %s1374_s17, 0 }
  0x20   : > { %p1377_p8 = scmp.eq.s32.totalorder (!%p1376_p6), %s1156_s16, 0 }
  0x21   : > { %174 = sbr.rel (%p1376_p6) target bundleno = 371 (0x173), region = 36 }
  0x28   : > { %1113 = dma.done.wait (%p1377_p8), [#allocation3], 32   ;;  %p1378_p7 = pmov %p1377_p8 }
  0x29   : > { %v1121_v0 = vmov 0   ;;  %v1007_v1 = vld [vmem:[%s1368_s1 + $0x4] ss:$8 sps:$4 sm:$0xff]   ;;  %v1009_v2 = vld [vmem:[%s1368_s1] ss:$8 sps:$4 sm:$0xff]   ;;  %p198_p2 = scmp.lt.s32.totalorder %s1156_s16, 1  ;;  %v638_v60 = vlaneseq }
  0x2a   : > { %1115 = vsyncadd (%p1378_p7), [#allocation3], 4294967264  ;;  %485 = vmatprep.mubr.bf16.mxu0 %v1121_v0  ;;  %364 = vmatprep.mubr.bf16.mxu1 %v1121_v0  ;;  %v1010_v3 = vld [vmem:[%s1368_s1 + $0x14] ss:$8 sps:$4 sm:$0xff]   ;;  %v1012_v4 = vld [vmem:[%s1368_s1 + $0x10] ss:$8 sps:$4 sm:$0xff]  }
  0x2b   : > { %453 = vmatprep.subr.bf16.mxu0 %v1007_v1  ;;  %v1013_v5 = vld [vmem:[%s1368_s1 + $0x24] ss:$8 sps:$4 sm:$0xff]   ;;  %v1015_v6 = vld [vmem:[%s1368_s1 + $0x20] ss:$8 sps:$4 sm:$0xff]   ;;  %v1016_v7 = vld [vmem:[%s1368_s1 + $0x34] ss:$8 sps:$4 sm:$0xff]  }
  0x2c   : > { %454 = vmatpush1.bf16.msra.mxu0 %v1009_v2  ;;  %v1018_v8 = vld [vmem:[%s1368_s1 + $0x30] ss:$8 sps:$4 sm:$0xff]   ;;  %v1030_v9 = vld [vmem:[%s1368_s1 + $0x84] ss:$8 sps:$4 sm:$0xff]   ;;  %v1033_v10 = vld [vmem:[%s1368_s1 + $0x80] ss:$8 sps:$4 sm:$0xff]  }
  0x2d   : > { %455 = vmatprep.subr.bf16.mxu0 %v1010_v3  ;;  %v1019_v11 = vld [vmem:[%s1368_s1 + $0x44] ss:$8 sps:$4 sm:$0xff]   ;;  %332 = vmatprep.subr.bf16.mxu1 %v1030_v9  ;;  %v1037_v12 = vld [vmem:[%s1368_s1 + $0x94] ss:$8 sps:$4 sm:$0xff]   ;;  %v1040_v13 = vld [vmem:[%s1368_s1 + $0x90] ss:$8 sps:$4 sm:$0xff]  }
  0x2e   : > { %333 = vmatpush1.bf16.msra.mxu1 %v1033_v10  ;;  %v1021_v14 = vld [vmem:[%s1368_s1 + $0x40] ss:$8 sps:$4 sm:$0xff]   ;;  %v1022_v15 = vld [vmem:[%s1368_s1 + $0x54] ss:$8 sps:$4 sm:$0xff]   ;;  %v1044_v16 = vld [vmem:[%s1368_s1 + $0xa4] ss:$8 sps:$4 sm:$0xff]  }
  0x2f   : > { %334 = vmatprep.subr.bf16.mxu1 %v1037_v12  ;;  %v1024_v17 = vld [vmem:[%s1368_s1 + $0x50] ss:$8 sps:$4 sm:$0xff]   ;;  %s1380_s16 = smov (!%p198_p2, %s1156_s16), 1  ;;  %v1046_v18 = vld [vmem:[%s1368_s1 + $0xa0] ss:$8 sps:$4 sm:$0xff]   ;;  %v1350_v61 = vshrl.u32 %v638_v60, 7 }
  0x30   : > { %456 = vmatpush1.bf16.msra.mxu0 %v1012_v4  ;;  %v1050_v19 = vld [vmem:[%s1368_s1 + $0xb4] ss:$8 sps:$4 sm:$0xff]   ;;  %v1025_v20 = vld [vmem:[%s1368_s1 + $0x64] ss:$8 sps:$4 sm:$0xff]   ;;  %v1027_v21 = vld [vmem:[%s1368_s1 + $0x60] ss:$8 sps:$4 sm:$0xff]  }
  0x31   : > { %457 = vmatprep.subr.bf16.mxu0 %v1013_v5  ;;  %s890_s25 = sshll.u32 %s1380_s16, 2  ;;  %v1052_v22 = vld [vmem:[%s1368_s1 + $0xb0] ss:$8 sps:$4 sm:$0xff]   ;;  %v1056_v23 = vld [vmem:[%s1368_s1 + $0xc4] ss:$8 sps:$4 sm:$0xff]   ;;  %v640_v62 = vsub.s32 0, %v1350_v61 }
  0x32   : > { %335 = vmatpush1.bf16.msra.mxu1 %v1040_v13  ;;  %v1028_v24 = vld [vmem:[%s1368_s1 + $0x74] ss:$8 sps:$4 sm:$0xff]   ;;  %v1032_v25 = vld [vmem:[%s1368_s1 + $0x70] ss:$8 sps:$4 sm:$0xff]   ;;  %s201_s10 = scalar_lea.vmem %s1367_s0, %s890_s25  ;;  %v1036_v26 = vld [vmem:[%s1368_s1 + $0x104] ss:$8 sps:$4 sm:$0xff]  }
  0x33   : > { %336 = vmatprep.subr.bf16.mxu1 %v1044_v16  ;;  %v1058_v27 = vld [vmem:[%s1368_s1 + $0xc0] ss:$8 sps:$4 sm:$0xff]   ;;  %v1062_v28 = vld [vmem:[%s1368_s1 + $0xd4] ss:$8 sps:$4 sm:$0xff]   ;;  %v1064_v32 = vld [vmem:[%s1368_s1 + $0xd0] ss:$8 sps:$4 sm:$0xff]  }
  0x34   : > { %458 = vmatpush1.bf16.msra.mxu0 %v1015_v6  ;;  %v207_v29 = vld [vmem:[%s201_s10] sm:$0x7]  ;;  %v1068_v33 = vld [vmem:[%s1368_s1 + $0xe4] ss:$8 sps:$4 sm:$0xff]   ;;  %v1043_v34 = vld [vmem:[%s1368_s1 + $0x114] ss:$8 sps:$4 sm:$0xff]  }
  0x35   : > { %459 = vmatprep.subr.bf16.mxu0 %v1016_v7  ;;  %v908_v30 = vcombine.low %v207_v29, %v207_v29  ;;  %v1034_v31 = vld [vmem:[%s1368_s1 + $0x100] ss:$8 sps:$4 sm:$0xff]   ;;  %v1041_v37 = vld [vmem:[%s1368_s1 + $0x110] ss:$8 sps:$4 sm:$0xff]   ;;  %v1074_v38 = vld [vmem:[%s1368_s1 + $0xf4] ss:$8 sps:$4 sm:$0xff]  }
  0x36   : > { %337 = vmatpush1.bf16.msra.mxu1 %v1046_v18  ;;  %v1070_v36 = vld [vmem:[%s1368_s1 + $0xe0] ss:$8 sps:$4 sm:$0xff]   ;;  %v1049_v39 = vld [vmem:[%s1368_s1 + $0x124] ss:$8 sps:$4 sm:$0xff]   ;;  %v1076_v42 = vld [vmem:[%s1368_s1 + $0xf0] ss:$8 sps:$4 sm:$0xff]  }
  0x37   : > { %338 = vmatprep.subr.bf16.mxu1 %v1050_v19  ;;  %v247_v35 = vshll.u32 %v908_v30, 16  ;;  %v245_v40 = vshrl.u32 %v908_v30, 16  ;;  %v1047_v43 = vld [vmem:[%s1368_s1 + $0x120] ss:$8 sps:$4 sm:$0xff]   ;;  %v1055_v44 = vld [vmem:[%s1368_s1 + $0x134] ss:$8 sps:$4 sm:$0xff]  }
  0x38   : > { %460 = vmatpush1.bf16.msra.mxu0 %v1018_v8  ;;  %v1053_v46 = vld [vmem:[%s1368_s1 + $0x130] ss:$8 sps:$4 sm:$0xff]   ;;  %v1061_v47 = vld [vmem:[%s1368_s1 + $0x144] ss:$8 sps:$4 sm:$0xff]   ;;  %v1059_v48 = vld [vmem:[%s1368_s1 + $0x140] ss:$8 sps:$4 sm:$0xff]  }
  0x39   : > { %461 = vmatprep.subr.bf16.mxu0 %v1019_v11  ;;  %v249_v41 = vrot.slane %v247_v35, 1  ;;  %v1067_v49 = vld [vmem:[%s1368_s1 + $0x154] ss:$8 sps:$4 sm:$0xff]   ;;  %v1065_v50 = vld [vmem:[%s1368_s1 + $0x150] ss:$8 sps:$4 sm:$0xff]   ;;  %v511_v55 = vrot.slane %v908_v30, 1 }
  0x3a   : > { %339 = vmatpush1.bf16.msra.mxu1 %v1052_v22  ;;  %v1073_v51 = vld [vmem:[%s1368_s1 + $0x164] ss:$8 sps:$4 sm:$0xff]   ;;  %v1071_v52 = vld [vmem:[%s1368_s1 + $0x160] ss:$8 sps:$4 sm:$0xff]   ;;  %v1079_v53 = vld [vmem:[%s1368_s1 + $0x174] ss:$8 sps:$4 sm:$0xff]  }
  0x3b   : > { %340 = vmatprep.subr.bf16.mxu1 %v1056_v23  ;;  %v250_v45 = vor.u32 %v249_v41, %v245_v40  ;;  %v1077_v54 = vld [vmem:[%s1368_s1 + $0x170] ss:$8 sps:$4 sm:$0xff]   ;;  %v636_v63 = vld [vmem:[%s1369_s2] sm:$0x3]  ;;  %v1122_v5 = vmov 1983009808  }
  0x3c   : > { %462 = vmatpush1.bf16.msra.mxu0 %v1021_v14  ;;  %v650_v1 = vld [vmem:[#allocation2] sm:$0x3]  ;;  %v641_v2 = vrot.slane %v636_v63, %v640_v62  ;;  %v670_v6 = vunpack.c.l.s4 %v1122_v5  ;;  %vm697_vm0 = vcmask 1041408   ;;  %vm797_vm1 = vcmask 1041409   ;;  %s891_s11 = sshll.u32 %s1380_s16, 1 }
  0x3d   : > { %463 = vmatprep.subr.bf16.mxu0 %v1022_v15  ;;  %v655_v8 = vrot.slane %v650_v1, %v640_v62  ;;  %s205_s14 = scalar_lea.vmem %s1371_s4, %s891_s11 }
  0x3e   : > { %341 = vmatpush1.bf16.msra.mxu1 %v1058_v27  ;;  %v671_v16 = vunpack.c.0.s8 %v670_v6 }
  0x3f   : > { %342 = vmatprep.subr.bf16.mxu1 %v1062_v28 }
  0x40   : > { %464 = vmatpush1.bf16.msra.mxu0 %v1024_v17 }
  0x41   : > { %465 = vmatprep.subr.bf16.mxu0 %v1025_v20 }
  0x42   : > { %343 = vmatpush1.bf16.msra.mxu1 %v1064_v32 }
  0x43   : > { %344 = vmatprep.subr.bf16.mxu1 %v1068_v33 }
  0x44   : > { %466 = vmatpush1.bf16.msra.mxu0 %v1027_v21  ;;  %v674_v21 = vsub.s32 %v671_v16, %v1350_v61 }
  0x45   : > { %467 = vmatprep.subr.bf16.mxu0 %v1028_v24 }
  0x46   : > { %345 = vmatpush1.bf16.msra.mxu1 %v1070_v36  ;;  %v1123_v36 = vmov 1966171168  }
  0x47   : > { %346 = vmatprep.subr.bf16.mxu1 %v1074_v38 }
  0x48   : > { %468 = vmatpush1.bf16.msra.mxu0 %v1032_v25 }
  0x49   : > { %593 = vmatprep.subr.bf16.mxu0 %v1036_v26 }
  0x4a   : > { %347 = vmatpush1.bf16.msra.mxu1 %v1076_v42 }
  0x4b   : > { %486 = vmatmul.mubr.bf16.vlgmr.msra.gmra.mrb[0].mxu0 %v207_v29 }
  0x4c   : > { %594 = vmatpush1.bf16.msra.mxu0 %v1034_v31  ;;  %625 = vmatprep.mubr.bf16.mxu0 %v1121_v0  ;;  %v644_v0 = vsub.s32 1, %v1350_v61 }
  0x4d   : > { %595 = vmatprep.subr.bf16.mxu0 %v1043_v34  ;;  %365 = vmatmul.mubr.bf16.vlgmr.msra.gmra.mrb[0].mxu1 %v250_v45 }
  0x4e   : > { %v645_v4 = vrot.slane %v636_v63, %v644_v0  ;;  %v659_v11 = vrot.slane %v650_v1, %v644_v0 }
  0x50   : > { %596 = vmatpush1.bf16.msra.mxu0 %v1041_v37  ;;  %v736_v37 = vunpack.c.l.s4 %v1123_v36 }
  0x51   : > { %597 = vmatprep.subr.bf16.mxu0 %v1049_v39 }
  0x54   : > { %598 = vmatpush1.bf16.msra.mxu0 %v1047_v43 }
  0x55   : > { %599 = vmatprep.subr.bf16.mxu0 %v1055_v44 }
  0x58   : > { %600 = vmatpush1.bf16.msra.mxu0 %v1053_v46 }
  0x59   : > { %601 = vmatprep.subr.bf16.mxu0 %v1061_v47  ;;  %v737_v47 = vunpack.c.0.s8 %v736_v37 }
  0x5c   : > { %602 = vmatpush1.bf16.msra.mxu0 %v1059_v48  ;;  %v1124_v48 = vmov 1935823168  }
  0x5d   : > { %603 = vmatprep.subr.bf16.mxu0 %v1067_v49  ;;  %v765_v49 = vunpack.c.l.s4 %v1124_v48 }
  0x60   : > { %604 = vmatpush1.bf16.msra.mxu0 %v1065_v50 }
  0x61   : > { %605 = vmatprep.subr.bf16.mxu0 %v1073_v51 }
  0x64   : > { %606 = vmatpush1.bf16.msra.mxu0 %v1071_v52 }
  0x65   : > { %607 = vmatprep.subr.bf16.mxu0 %v1079_v53 }
  0x68   : > { %608 = vmatpush1.bf16.msra.mxu0 %v1077_v54 }
  0x6b   : > { %626 = vmatmul.mubr.bf16.vlgmr.msra.gmra.mrb[0].mxu0 %v511_v55 }
 0x120   : > { %v366_v56 = vpop.f32.mrb[0].mxu1 }
 0x121   : > { %v368_v57 = vpop.f32.mrb[1].mxu1 }
 0x122   : > { %v370_v58 = vpop.f32.mrb[2].mxu1 }
 0x123   : > { %v371_v59 = vpop.f32.mrb[3].mxu1  ;;  %v740_v58 = vsub.s32 %v737_v47, %v1350_v61 }
 0x13e   : > { %v627_v3 = vpop.f32.mrb[0].mxu0 }
 0x13f   : > { %v978_v7 = vadd.f32 %v627_v3, %v366_v56  ;;  %v629_v9 = vpop.f32.mrb[1].mxu0 }
 0x140   : > { %v979_v10 = vadd.f32 %v629_v9, %v368_v57  ;;  %v631_v12 = vpop.f32.mrb[2].mxu0  ;;  %v766_v57 = vunpack.c.0.s8 %v765_v49 }
 0x141   : > { %v648_v13 = vmul.f32 %v978_v7, %v641_v2  ;;  %v632_v14 = vpop.f32.mrb[3].mxu0 }
 0x142   : > { %v649_v15 = vmul.f32 %v979_v10, %v645_v4  ;;  %v769_v2 = vsub.s32 %v766_v57, %v1350_v61 }
 0x143   : > { %v662_v17 = vadd.f32 %v655_v8, %v648_v13 }
 0x144   : > { %v663_v18 = vadd.f32 %v659_v11, %v649_v15 }
 0x145   : > { %v664_v19 = vmax.f32 %v662_v17, 0.0 }
 0x146   : > { %v665_v20 = vmax.f32 %v663_v18, 0.0 }
 0x148   : > { %v668_v22 = vcombine.low %v664_v19, %v665_v20 }
 0x14a   : > { %v675_v23 = vrot.slane %v668_v22, %v674_v21 }
 0x14c   : > { %v676_v24 = vcombine.high %v675_v23, %v675_v23  ;;  %v683_v25 = vrot.slane %v675_v23, %v674_v21 }
 0x14e   : > { %v684_v26 = vcombine.high %v683_v25, %v683_v25  ;;  %v691_v27 = vrot.slane %v676_v24, %v674_v21  ;;  %v698_v28 = vsel %vm697_vm0, %v683_v25, -inf }
 0x14f   : > { %v699_v29 = vrot.slane %v698_v28, 4 }
 0x150   : > { %v692_v30 = vcombine.high %v691_v27, %v691_v27  ;;  %v705_v31 = vsel %vm697_vm0, %v684_v26, -inf  ;;  %v712_v32 = vsel %vm697_vm0, %v691_v27, -inf }
 0x151   : > { %v700_v33 = vmax.f32 %v698_v28, %v699_v29  ;;  %v706_v34 = vrot.slane %v705_v31, 4  ;;  %v713_v35 = vrot.slane %v712_v32, 4 }
 0x152   : > { %v719_v38 = vsel %vm697_vm0, %v692_v30, -inf }
 0x153   : > { %v701_v39 = vrot.slane %v700_v33, 2  ;;  %v707_v40 = vmax.f32 %v705_v31, %v706_v34  ;;  %v714_v41 = vmax.f32 %v712_v32, %v713_v35  ;;  %v720_v42 = vrot.slane %v719_v38, 4 }
 0x155   : > { %v702_v43 = vmax.f32 %v700_v33, %v701_v39  ;;  %v708_v44 = vrot.slane %v707_v40, 2  ;;  %v715_v45 = vrot.slane %v714_v41, 2  ;;  %v721_v46 = vmax.f32 %v719_v38, %v720_v42 }
 0x157   : > { %v703_v50 = vrot.slane %v702_v43, 1  ;;  %v709_v51 = vmax.f32 %v707_v40, %v708_v44  ;;  %v716_v52 = vmax.f32 %v714_v41, %v715_v45  ;;  %v722_v53 = vrot.slane %v721_v46, 2 }
 0x159   : > { %v710_v54 = vrot.slane %v709_v51, 1  ;;  %v717_v55 = vrot.slane %v716_v52, 1  ;;  %v723_v56 = vmax.f32 %v721_v46, %v722_v53  ;;  %v704_v59 = vmax.f32 %v702_v43, %v703_v50 }
 0x15b   : > { %v711_v60 = vmax.f32 %v709_v51, %v710_v54  ;;  %v724_v62 = vrot.slane %v723_v56, 1  ;;  %v718_v63 = vmax.f32 %v716_v52, %v717_v55 }
 0x15d   : > { %v725_v0 = vmax.f32 %v723_v56, %v724_v62  ;;  %v973_v1 = vpack.c.bf16 %v711_v60, %v704_v59 }
 0x15f   : > { %v741_v3 = vrot.slane %v973_v1, %v740_v58  ;;  %v974_v4 = vpack.c.bf16 %v725_v0, %v718_v63 }
 0x161   : > { %v748_v5 = vrot.slane %v741_v3, %v740_v58  ;;  %v756_v6 = vrot.slane %v974_v4, %v740_v58 }
 0x163   : > { %v763_v7 = vrot.slane %v756_v6, %v740_v58  ;;  %v770_v8 = vrot.slane %v748_v5, %v769_v2 }
 0x165   : > { %v784_v9 = vrot.slane %v763_v7, %v769_v2  ;;  %v777_v10 = vrot.slane %v770_v8, %v769_v2 }
 0x167   : > { %v791_v11 = vrot.slane %v784_v9, %v769_v2  ;;  %v792_v14 = vunpack.c.l.b16 %v777_v10  ;;  %v793_v15 = vunpack.c.h.b16 %v777_v10 }
 0x169   : > { %v794_v12 = vunpack.c.l.b16 %v791_v11  ;;  %v795_v13 = vunpack.c.h.b16 %v791_v11 }
 0x16b   : > { %v796_v16 = vrot.slane %v794_v12, 7  ;;  %v799_v17 = vrot.slane %v795_v13, 7 }
 0x16d   : > { %v798_v18 = vsel %vm797_vm1, %v796_v16, %v792_v14  ;;  %v800_v61 = vsel %vm797_vm1, %v799_v17, %v793_v15 }
 0x16e   : > { %v801_v19 = vpack.c.b16 %v800_v61, %v798_v18 }
 0x170   : > { %v808_v20 = vrot.slane %v801_v19, %v740_v58 }
 0x172   : > { %975 = vst.sshfl [vmem:[%s205_s14] sm:$0x5 pattern:$0x73625140] %v808_v20 }
 0x173 PF: > { %s15_s15 = sadd.s32 1, %s1118_s15  }
 0x174   : > { %p12_p3 = scmp.ge.s32.totalorder %s15_s15, 4  }
 0x176   :  { %14 = sbr.rel (!%p12_p3) target bundleno = 1 (0x1), region = 73 }
 0x17d   :  { %837 = vsyncpa [#allocation3], 1 }
 0x17e   :  { %839 = vsyncpa [#allocation3 + $0x1], 1 }

// kernel: cnn_lstm_forward.11
= control target key start
LH: loop header
LB: loop body
LE: loop exit
PB: predicated region body
PF: predicated region fallthrough
CT: control target
= control target key end

     0   :  { %v57_v9 = vlaneseq  ;;  %v650_v10 = vmov 1966171168   ;;  %s861_s0 = inlined_call_operand.vmem [shape: bf16[2,256], index: 0, kind: input, shape index: {}]   ;;  %s862_s1 = inlined_call_operand.vmem [shape: bf16[256,256], index: 1, kind: input, shape index: {}]   ;;  %s863_s2 = inlined_call_operand.vmem [shape: f32[1,256], index: 2, kind: input, shape index: {}]   ;;  %s864_s3 = inlined_call_operand.vmem [shape: bf16[256,8], index: 3, kind: input, shape index: {}]   ;;  %s865_s4 = inlined_call_operand.vmem [shape: f32[1,8], index: 4, kind: input, shape index: {}]   ;;  %s866_s5 = inlined_call_operand.hbm [shape: f32[2,8], index: 5, kind: output, shape index: {}]  }
   0x1   :  { %v562_v0 = vld [vmem:[%s862_s1 + $0x4] ss:$8 sps:$4 sm:$0xff]   ;;  %v564_v1 = vld [vmem:[%s862_s1] ss:$8 sps:$4 sm:$0xff]   ;;  %v565_v2 = vld [vmem:[%s862_s1 + $0x14] ss:$8 sps:$4 sm:$0xff]   ;;  %v77_v11 = vunpack.c.l.s4 %v650_v10 }
   0x2   :  { %252 = vmatprep.subr.bf16.mxu0 %v562_v0  ;;  %v567_v3 = vld [vmem:[%s862_s1 + $0x10] ss:$8 sps:$4 sm:$0xff]   ;;  %v568_v4 = vld [vmem:[%s862_s1 + $0x24] ss:$8 sps:$4 sm:$0xff]   ;;  %v570_v5 = vld [vmem:[%s862_s1 + $0x20] ss:$8 sps:$4 sm:$0xff]  }
   0x3   :  { %253 = vmatpush1.bf16.msra.mxu0 %v564_v1  ;;  %v571_v6 = vld [vmem:[%s862_s1 + $0x34] ss:$8 sps:$4 sm:$0xff]   ;;  %v573_v7 = vld [vmem:[%s862_s1 + $0x30] ss:$8 sps:$4 sm:$0xff]   ;;  %v574_v8 = vld [vmem:[%s862_s1 + $0x44] ss:$8 sps:$4 sm:$0xff]   ;;  %v78_v15 = vunpack.c.0.s8 %v77_v11 }
   0x4   :  { %254 = vmatprep.subr.bf16.mxu0 %v565_v2  ;;  %v576_v12 = vld [vmem:[%s862_s1 + $0x40] ss:$8 sps:$4 sm:$0xff]   ;;  %v577_v13 = vld [vmem:[%s862_s1 + $0x54] ss:$8 sps:$4 sm:$0xff]   ;;  %v715_v14 = vshrl.u32 %v57_v9, 7 }
   0x5   :  { %v579_v16 = vld [vmem:[%s862_s1 + $0x50] ss:$8 sps:$4 sm:$0xff]   ;;  %v580_v17 = vld [vmem:[%s862_s1 + $0x64] ss:$8 sps:$4 sm:$0xff]   ;;  %v582_v19 = vld [vmem:[%s862_s1 + $0x60] ss:$8 sps:$4 sm:$0xff]  }
   0x6   :  { %v724_v18 = vsub.s32 %v78_v15, %v715_v14  ;;  %v732_v20 = vld.sshfl [vmem:[%s861_s0] sm:$0x11 pattern:$0x75316420]  ;;  %v583_v21 = vld [vmem:[%s862_s1 + $0x74] ss:$8 sps:$4 sm:$0xff]  }
   0x7   :  { %255 = vmatpush1.bf16.msra.mxu0 %v567_v3  ;;  %v75_v22 = vcombine.high %v732_v20, %v732_v20  ;;  %v610_v23 = vld [vmem:[%s864_s3 + $0x40] sm:$0xff]   ;;  %v612_v26 = vld [vmem:[%s864_s3 + $0x48] sm:$0xff]   ;;  %v614_v28 = vld [vmem:[%s864_s3 + $0x50] sm:$0xff]  }
   0x8   :  { %256 = vmatprep.subr.bf16.mxu0 %v568_v4  ;;  %v611_v24 = vld [vmem:[%s864_s3] sm:$0xff]   ;;  %538 = vmatprep.subr.bf16.mxu1 %v610_v23  ;;  %v613_v27 = vld [vmem:[%s864_s3 + $0x8] sm:$0xff]   ;;  %v585_v29 = vld [vmem:[%s862_s1 + $0x70] ss:$8 sps:$4 sm:$0xff]  }
   0x9   :  { %v89_v25 = vrot.slane %v75_v22, %v724_v18  ;;  %539 = vmatpush3.bf16.msra.mxu1 %v611_v24  ;;  %v586_v30 = vld [vmem:[%s862_s1 + $0x84] ss:$8 sps:$4 sm:$0xff]   ;;  %v615_v31 = vld [vmem:[%s864_s3 + $0x10] sm:$0xff]   ;;  %v616_v32 = vld [vmem:[%s864_s3 + $0x58] sm:$0xff]  }
   0xa   :  { %540 = vmatprep.subr.bf16.mxu1 %v612_v26  ;;  %v588_v33 = vld [vmem:[%s862_s1 + $0x80] ss:$8 sps:$4 sm:$0xff]   ;;  %v589_v34 = vld [vmem:[%s862_s1 + $0x94] ss:$8 sps:$4 sm:$0xff]   ;;  %v591_v35 = vld [vmem:[%s862_s1 + $0x90] ss:$8 sps:$4 sm:$0xff]  }
   0xb   :  { %257 = vmatpush1.bf16.msra.mxu0 %v570_v5  ;;  %284 = vmatprep.mubr.bf16.mxu0 %v89_v25  ;;  %v617_v36 = vld [vmem:[%s864_s3 + $0x18] sm:$0xff]   ;;  %v592_v37 = vld [vmem:[%s862_s1 + $0xa4] ss:$8 sps:$4 sm:$0xff]  }
   0xc   :  { %258 = vmatprep.subr.bf16.mxu0 %v571_v6  ;;  %v618_v38 = vld [vmem:[%s864_s3 + $0x60] sm:$0xff]  }
   0xd   :  { %541 = vmatpush3.bf16.msra.mxu1 %v613_v27  ;;  %v619_v39 = vld [vmem:[%s864_s3 + $0x20] sm:$0xff]  }
   0xe   :  { %542 = vmatprep.subr.bf16.mxu1 %v614_v28 }
   0xf   :  { %259 = vmatpush1.bf16.msra.mxu0 %v573_v7 }
  0x10   :  { %260 = vmatprep.subr.bf16.mxu0 %v574_v8 }
  0x11   :  { %543 = vmatpush3.bf16.msra.mxu1 %v615_v31 }
  0x12   :  { %544 = vmatprep.subr.bf16.mxu1 %v616_v32 }
  0x13   :  { %261 = vmatpush1.bf16.msra.mxu0 %v576_v12 }
  0x14   :  { %262 = vmatprep.subr.bf16.mxu0 %v577_v13 }
  0x15   :  { %545 = vmatpush3.bf16.msra.mxu1 %v617_v36 }
  0x17   :  { %263 = vmatpush1.bf16.msra.mxu0 %v579_v16 }
  0x18   :  { %264 = vmatprep.subr.bf16.mxu0 %v580_v17 }
  0x1b   :  { %265 = vmatpush1.bf16.msra.mxu0 %v582_v19 }
  0x1c   :  { %266 = vmatprep.subr.bf16.mxu0 %v583_v21 }
  0x1f   :  { %267 = vmatpush1.bf16.msra.mxu0 %v585_v29 }
  0x20   :  { %268 = vmatprep.subr.bf16.mxu0 %v586_v30 }
  0x23   :  { %269 = vmatpush1.bf16.msra.mxu0 %v588_v33 }
  0x24   :  { %270 = vmatprep.subr.bf16.mxu0 %v589_v34 }
  0x25   :  { %10 = vsyncpa [#allocation3], 0  ;;  %546 = vmatprep.subr.bf16.mxu1 %v618_v38  ;;  %v620_v40 = vld [vmem:[%s864_s3 + $0x68] sm:$0xff]   ;;  %v595_v42 = vld [vmem:[%s862_s1 + $0xb4] ss:$8 sps:$4 sm:$0xff]   ;;  %v82_v53 = vrot.slane %v732_v20, %v724_v18  ;;  %v59_v58 = vsub.s32 0, %v715_v14 }
  0x26   :  { %v594_v41 = vld [vmem:[%s862_s1 + $0xa0] ss:$8 sps:$4 sm:$0xff]   ;;  %547 = vmatpush3.bf16.msra.mxu1 %v619_v39  ;;  %v597_v44 = vld [vmem:[%s862_s1 + $0xb0] ss:$8 sps:$4 sm:$0xff]   ;;  %v598_v45 = vld [vmem:[%s862_s1 + $0xc4] ss:$8 sps:$4 sm:$0xff]  }
  0x27   :  { %271 = vmatpush1.bf16.msra.mxu0 %v591_v35  ;;  %v621_v43 = vld [vmem:[%s864_s3 + $0x28] sm:$0xff]   ;;  %548 = vmatprep.subr.bf16.mxu1 %v620_v40  ;;  %v601_v47 = vld [vmem:[%s862_s1 + $0xd4] ss:$8 sps:$4 sm:$0xff]   ;;  %v603_v48 = vld [vmem:[%s862_s1 + $0xd0] ss:$8 sps:$4 sm:$0xff]   ;;  %v63_v60 = vsub.s32 1, %v715_v14 }
  0x28   :  { %272 = vmatprep.subr.bf16.mxu0 %v592_v37  ;;  %v600_v46 = vld [vmem:[%s862_s1 + $0xc0] ss:$8 sps:$4 sm:$0xff]   ;;  %v604_v49 = vld [vmem:[%s862_s1 + $0xe4] ss:$8 sps:$4 sm:$0xff]   ;;  %v607_v51 = vld [vmem:[%s862_s1 + $0xf4] ss:$8 sps:$4 sm:$0xff]  }
  0x29   :  { %v606_v50 = vld [vmem:[%s862_s1 + $0xe0] ss:$8 sps:$4 sm:$0xff]   ;;  %v609_v52 = vld [vmem:[%s862_s1 + $0xf0] ss:$8 sps:$4 sm:$0xff]   ;;  %vm472_vm0 = vcmask 58368  }
  0x2a   :  { %549 = vmatpush3.bf16.msra.mxu1 %v621_v43  ;;  %v622_v54 = vld [vmem:[%s864_s3 + $0x70] sm:$0xff]   ;;  %v624_v56 = vld [vmem:[%s864_s3 + $0x78] sm:$0xff]   ;;  %v55_v59 = vld [vmem:[%s863_s2] sm:$0x3]  ;;  %s651_s2 = smov [#allocation2]  }
  0x2b   :  { %273 = vmatpush1.bf16.msra.mxu0 %v594_v41  ;;  %v623_v55 = vld [vmem:[%s864_s3 + $0x30] sm:$0xff]   ;;  %550 = vmatprep.subr.bf16.mxu1 %v622_v54  ;;  %v625_v57 = vld [vmem:[%s864_s3 + $0x38] sm:$0xff]   ;;  %v60_v61 = vrot.slane %v55_v59, %v59_v58  ;;  %v64_v62 = vrot.slane %v55_v59, %v63_v60  ;;  %v521_v10 = vld [vmem:[%s865_s4] ss:$0 sm:$0xff]  ;;  %s480_s15 = sshll.u32 %s651_s2, 4  ;;  %s481_s15 = int_to_ptr.vmem [resolvable:$true] %s480_s15 }
  0x2c   :  { %274 = vmatprep.subr.bf16.mxu0 %v595_v42  ;;  %s626_s16 = scalar_lea.vmem %s481_s15, 32  ;;  %p631_p1 = scmp.lt.s32.totalorder %s481_s15, %s481_s15 }
  0x2d   :  { %p627_p0 = scmp.ne.s32.totalorder %s481_s15, %s626_s16  ;;  %p632_p2 = scmp.lt.s32.totalorder %s626_s16, %s626_s16 }
  0x2e   :  { %551 = vmatpush3.bf16.msra.mxu1 %v623_v55 }
  0x2f   :  { %275 = vmatpush1.bf16.msra.mxu0 %v597_v44  ;;  %552 = vmatprep.subr.bf16.mxu1 %v624_v56  ;;  %p633_p3 = por %p632_p2, %p631_p1 }
  0x30   :  { %276 = vmatprep.subr.bf16.mxu0 %v598_v45 }
  0x31   :  { %p634_p4 = pnand %p633_p3, %p627_p0 }
  0x32   :  { %553 = vmatpush3.bf16.msra.mxu1 %v625_v57 }
  0x33   :  { %277 = vmatpush1.bf16.msra.mxu0 %v600_v46 }
  0x34   :  { %278 = vmatprep.subr.bf16.mxu0 %v601_v47 }
  0x37   :  { %279 = vmatpush1.bf16.msra.mxu0 %v603_v48 }
  0x38   :  { %280 = vmatprep.subr.bf16.mxu0 %v604_v49 }
  0x3b   :  { %281 = vmatpush1.bf16.msra.mxu0 %v606_v50 }
  0x3c   :  { %282 = vmatprep.subr.bf16.mxu0 %v607_v51 }
  0x3f   :  { %283 = vmatpush1.bf16.msra.mxu0 %v609_v52 }
  0x42   :  { %285 = vmatmul.mubr.bf16.vlgmr.msra.gmra.mrb[0].mxu0 %v82_v53 }
 0x115   :  { %v286_v63 = vpop.f32.mrb[0].mxu0 }
 0x116   :  { %v287_v0 = vadd.f32 %v286_v63, %v60_v61  ;;  %v288_v1 = vpop.f32.mrb[1].mxu0 }
 0x117   :  { %v289_v2 = vadd.f32 %v288_v1, %v64_v62  ;;  %v290_v3 = vpop.f32.mrb[2].mxu0 }
 0x118   :  { %v293_v4 = vmax.f32 %v287_v0, 0.0  ;;  %v291_v5 = vpop.f32.mrb[3].mxu0 }
 0x119   :  { %v294_v6 = vmax.f32 %v289_v2, 0.0 }
 0x11a   :  { %v295_v8 = vpack.c.bf16 %v293_v4, %v293_v4 }
 0x11b   :  { %v296_v7 = vpack.c.bf16 %v294_v6, %v294_v6 }
 0x11d   :  { %464 = vmatprep.mubr.bf16.mxu1 %v296_v7 }
 0x11e   :  { %465 = vmatmul.mubr.bf16.vlgmr.msra.gmra.mrb[0].mxu1 %v295_v8 }
 0x1f1   :  { %v554_v9 = vpop.f32.mrb[0].mxu1 }
 0x1f2   :  { %v555_v11 = vpop.f32.mrb[1].mxu1 }
 0x1f3   :  { %v556_v12 = vadd.f32 %v555_v11, %v554_v9  ;;  %v557_v13 = vpop.f32.mrb[2].mxu1 }
 0x1f4   :  { %v558_v14 = vpop.f32.mrb[3].mxu1 }
 0x1f5   :  { %v467_v15 = vadd.f32 %v556_v12, %v521_v10 }
 0x1f7   :  { %473 = vst.msk [vmem:[#allocation2] sm:$0x3] %vm472_vm0, %v467_v15 }
 0x1f8   :  { %637 = shalt.err (!%p634_p4)
}
 0x1f9   :  { %s638_s4 = scalar_lea.hbm %s866_s5, 32 }
 0x1fa   :  { %p639_p5 = scmp.ne.s32.totalorder %s866_s5, %s638_s4  ;;  %p642_p6 = scmp.lt.u32.totalorder %s638_s4, %s866_s5 }
 0x1fc   :  { %p644_p7 = pnand %p642_p6, %p639_p5 }
 0x1fe   :  { %647 = shalt.err (!%p644_p7)
}
 0x1ff   :  { %483 = dma.vmem_to_hbm [thread:$0]  %s481_s15, 32, %s866_s5, [#allocation3]  }
 0x200   :  { %648 = dma.done.wait [#allocation3], 32  }
 0x201   :  { %649 = vsyncadd [#allocation3], 4294967264 }
 0x202   :  { %487 = vsyncpa [#allocation3], 1 }

// kernel: cnn_lstm_forward.10
= control target key start
LH: loop header
LB: loop body
LE: loop exit
PB: predicated region body
PF: predicated region fallthrough
CT: control target
= control target key end

     0   :  { %s1891_s19 = smov 0   ;;  %s2214_s1 = inlined_call_operand.vmem [shape: bf16[256,1024], index: 1, kind: input, shape index: {}]   ;;  %s2215_s2 = inlined_call_operand.vmem [shape: bf16[256,1024], index: 2, kind: input, shape index: {}]   ;;  %s2216_s4 = inlined_call_operand.vmem [shape: bf16[8,256], index: 4, kind: output, shape index: {}]   ;;  %s2217_s0 = inlined_call_operand.vmem [shape: bf16[2,8,256], index: 0, kind: input, shape index: {}]   ;;  %s2218_s3 = inlined_call_operand.vmem [shape: f32[1,1024], index: 3, kind: input, shape index: {}]  }
   0x1   :  { %v20_v0 = vld [vmem:[%s2214_s1] sm:$0xff]  ;;  %v21_v2 = vld [vmem:[%s2214_s1 + $0x8] sm:$0xff] }
   0x2   :  { %v22_v1 = vld [vmem:[%s2214_s1 + $0x20] sm:$0xff]  ;;  %v23_v4 = vld [vmem:[%s2214_s1 + $0x28] sm:$0xff] }
   0x3   :  { %v1413_v3 = vcombine.high %v20_v0, %v22_v1  ;;  %v1412_v5 = vcombine.low %v20_v0, %v22_v1  ;;  %v24_v6 = vld [vmem:[%s2214_s1 + $0x40] sm:$0xff]  ;;  %v1415_v8 = vcombine.high %v21_v2, %v23_v4  ;;  %v1414_v9 = vcombine.low %v21_v2, %v23_v4  ;;  %v25_v11 = vld [vmem:[%s2214_s1 + $0x48] sm:$0xff] }
   0x4   :  { %v26_v7 = vld [vmem:[%s2214_s1 + $0x60] sm:$0xff]  ;;  %v27_v12 = vld [vmem:[%s2214_s1 + $0x68] sm:$0xff] }
   0x5   :  { %v1417_v10 = vcombine.high %v24_v6, %v26_v7  ;;  %v28_v13 = vld [vmem:[%s2214_s1 + $0x80] sm:$0xff]  ;;  %436 = vmatprep.subr.bf16.mxu0 %v1413_v3  ;;  %v1419_v14 = vcombine.high %v25_v11, %v27_v12  ;;  %v29_v16 = vld [vmem:[%s2214_s1 + $0x88] sm:$0xff]  ;;  %479 = vmatprep.subr.bf16.mxu1 %v1415_v8  ;;  %v1416_v18 = vcombine.low %v24_v6, %v26_v7 }
   0x6   :  { %v30_v15 = vld [vmem:[%s2214_s1 + $0xa0] sm:$0xff]  ;;  %v31_v17 = vld [vmem:[%s2214_s1 + $0xa8] sm:$0xff]  ;;  %437 = vmatpush1.bf16.msra.mxu0 %v1412_v5  ;;  %480 = vmatpush1.bf16.msra.mxu1 %v1414_v9  ;;  %v1418_v19 = vcombine.low %v25_v11, %v27_v12 }
   0x7   :  { %438 = vmatprep.subr.bf16.mxu0 %v1417_v10  ;;  %v1421_v20 = vcombine.high %v28_v13, %v30_v15  ;;  %481 = vmatprep.subr.bf16.mxu1 %v1419_v14  ;;  %v1423_v21 = vcombine.high %v29_v16, %v31_v17  ;;  %v32_v22 = vld [vmem:[%s2214_s1 + $0xc0] sm:$0xff]  ;;  %v33_v24 = vld [vmem:[%s2214_s1 + $0xc8] sm:$0xff]  ;;  %v1420_v26 = vcombine.low %v28_v13, %v30_v15 }
   0x8   :  { %v34_v23 = vld [vmem:[%s2214_s1 + $0xe0] sm:$0xff]  ;;  %v35_v25 = vld [vmem:[%s2214_s1 + $0xe8] sm:$0xff]  ;;  %v1422_v27 = vcombine.low %v29_v16, %v31_v17 }
   0x9   :  { %v1425_v28 = vcombine.high %v32_v22, %v34_v23  ;;  %v1427_v29 = vcombine.high %v33_v24, %v35_v25  ;;  %v36_v30 = vld [vmem:[%s2214_s1 + $0x100] sm:$0xff]  ;;  %v37_v32 = vld [vmem:[%s2214_s1 + $0x108] sm:$0xff]  ;;  %v1424_v34 = vcombine.low %v32_v22, %v34_v23  ;;  %v1426_v35 = vcombine.low %v33_v24, %v35_v25 }
   0xa   :  { %439 = vmatpush1.bf16.msra.mxu0 %v1416_v18  ;;  %482 = vmatpush1.bf16.msra.mxu1 %v1418_v19  ;;  %v38_v31 = vld [vmem:[%s2214_s1 + $0x120] sm:$0xff]  ;;  %v39_v33 = vld [vmem:[%s2214_s1 + $0x128] sm:$0xff] }
   0xb   :  { %440 = vmatprep.subr.bf16.mxu0 %v1421_v20  ;;  %483 = vmatprep.subr.bf16.mxu1 %v1423_v21  ;;  %v1429_v36 = vcombine.high %v36_v30, %v38_v31  ;;  %v1431_v37 = vcombine.high %v37_v32, %v39_v33  ;;  %v40_v38 = vld [vmem:[%s2214_s1 + $0x140] sm:$0xff]  ;;  %v41_v40 = vld [vmem:[%s2214_s1 + $0x148] sm:$0xff]  ;;  %v1428_v42 = vcombine.low %v36_v30, %v38_v31 }
   0xc   :  { %v42_v39 = vld [vmem:[%s2214_s1 + $0x160] sm:$0xff]  ;;  %v43_v41 = vld [vmem:[%s2214_s1 + $0x168] sm:$0xff]  ;;  %v1430_v43 = vcombine.low %v37_v32, %v39_v33 }
   0xd   :  { %v1433_v44 = vcombine.high %v40_v38, %v42_v39  ;;  %v1435_v45 = vcombine.high %v41_v40, %v43_v41  ;;  %v44_v46 = vld [vmem:[%s2214_s1 + $0x180] sm:$0xff]  ;;  %v45_v48 = vld [vmem:[%s2214_s1 + $0x188] sm:$0xff]  ;;  %v1432_v50 = vcombine.low %v40_v38, %v42_v39  ;;  %v1434_v51 = vcombine.low %v41_v40, %v43_v41 }
   0xe   :  { %441 = vmatpush1.bf16.msra.mxu0 %v1420_v26  ;;  %484 = vmatpush1.bf16.msra.mxu1 %v1422_v27  ;;  %v46_v47 = vld [vmem:[%s2214_s1 + $0x1a0] sm:$0xff]  ;;  %v47_v49 = vld [vmem:[%s2214_s1 + $0x1a8] sm:$0xff] }
   0xf   :  { %442 = vmatprep.subr.bf16.mxu0 %v1425_v28  ;;  %485 = vmatprep.subr.bf16.mxu1 %v1427_v29  ;;  %v1437_v52 = vcombine.high %v44_v46, %v46_v47  ;;  %v1439_v53 = vcombine.high %v45_v48, %v47_v49  ;;  %v48_v54 = vld [vmem:[%s2214_s1 + $0x1c0] sm:$0xff]  ;;  %v49_v57 = vld [vmem:[%s2214_s1 + $0x1c8] sm:$0xff]  ;;  %v1436_v59 = vcombine.low %v44_v46, %v46_v47 }
  0x10   :  { %v50_v55 = vld [vmem:[%s2214_s1 + $0x1e0] sm:$0xff]  ;;  %v51_v58 = vld [vmem:[%s2214_s1 + $0x1e8] sm:$0xff]  ;;  %v1438_v60 = vcombine.low %v45_v48, %v47_v49 }
  0x11   :  { %v1605_v56 = vld [vmem:[%s2217_s0 + $0x4] ss:$8 sps:$4 sm:$0xff]   ;;  %v1441_v61 = vcombine.high %v48_v54, %v50_v55  ;;  %v1443_v62 = vcombine.high %v49_v57, %v51_v58  ;;  %v1440_v3 = vcombine.low %v48_v54, %v50_v55  ;;  %v1442_v4 = vcombine.low %v49_v57, %v51_v58 }
  0x12   :  { %443 = vmatpush1.bf16.msra.mxu0 %v1424_v34  ;;  %486 = vmatpush1.bf16.msra.mxu1 %v1426_v35  ;;  %v52_v63 = vld [vmem:[%s2214_s1 + $0x200] sm:$0xff]  ;;  %v53_v1 = vld [vmem:[%s2214_s1 + $0x208] sm:$0xff] }
  0x13   :  { %444 = vmatprep.subr.bf16.mxu0 %v1429_v36  ;;  %487 = vmatprep.subr.bf16.mxu1 %v1431_v37  ;;  %v54_v0 = vld [vmem:[%s2214_s1 + $0x220] sm:$0xff]  ;;  %v55_v2 = vld [vmem:[%s2214_s1 + $0x228] sm:$0xff] }
  0x14   :  { %468 = vmatprep.mubr.bf16.mxu0 %v1605_v56  ;;  %511 = vmatprep.mubr.bf16.mxu1 %v1605_v56  ;;  %v1445_v5 = vcombine.high %v52_v63, %v54_v0  ;;  %v1447_v6 = vcombine.high %v53_v1, %v55_v2  ;;  %v56_v7 = vld [vmem:[%s2214_s1 + $0x240] sm:$0xff]  ;;  %v57_v9 = vld [vmem:[%s2214_s1 + $0x248] sm:$0xff]  ;;  %v1444_v11 = vcombine.low %v52_v63, %v54_v0 }
  0x15   :  { %v58_v8 = vld [vmem:[%s2214_s1 + $0x260] sm:$0xff]  ;;  %v59_v10 = vld [vmem:[%s2214_s1 + $0x268] sm:$0xff]  ;;  %v1446_v12 = vcombine.low %v53_v1, %v55_v2  ;;  %v1648_v2 = vmov 0  }
  0x16   :  { %445 = vmatpush1.bf16.msra.mxu0 %v1428_v42  ;;  %488 = vmatpush1.bf16.msra.mxu1 %v1430_v43  ;;  %v1449_v13 = vcombine.high %v56_v7, %v58_v8  ;;  %v1451_v14 = vcombine.high %v57_v9, %v59_v10  ;;  %v60_v15 = vld [vmem:[%s2214_s1 + $0x280] sm:$0xff]  ;;  %v61_v17 = vld [vmem:[%s2214_s1 + $0x288] sm:$0xff]  ;;  %v1448_v19 = vcombine.low %v56_v7, %v58_v8 }
  0x17   :  { %446 = vmatprep.subr.bf16.mxu0 %v1433_v44  ;;  %489 = vmatprep.subr.bf16.mxu1 %v1435_v45  ;;  %v62_v16 = vld [vmem:[%s2214_s1 + $0x2a0] sm:$0xff]  ;;  %v63_v18 = vld [vmem:[%s2214_s1 + $0x2a8] sm:$0xff]  ;;  %v1450_v20 = vcombine.low %v57_v9, %v59_v10  ;;  %550 = vst [vmem:[#allocation3] sm:$0xf] %v1648_v2 }
  0x18   :  { %v1453_v21 = vcombine.high %v60_v15, %v62_v16  ;;  %v1455_v22 = vcombine.high %v61_v17, %v63_v18  ;;  %v64_v23 = vld [vmem:[%s2214_s1 + $0x2c0] sm:$0xff]  ;;  %v65_v25 = vld [vmem:[%s2214_s1 + $0x2c8] sm:$0xff]  ;;  %v1452_v27 = vcombine.low %v60_v15, %v62_v16  ;;  %v1454_v28 = vcombine.low %v61_v17, %v63_v18 }
  0x19   :  { %v66_v24 = vld [vmem:[%s2214_s1 + $0x2e0] sm:$0xff]  ;;  %v67_v26 = vld [vmem:[%s2214_s1 + $0x2e8] sm:$0xff] }
  0x1a   :  { %447 = vmatpush1.bf16.msra.mxu0 %v1432_v50  ;;  %490 = vmatpush1.bf16.msra.mxu1 %v1434_v51  ;;  %v1457_v29 = vcombine.high %v64_v23, %v66_v24  ;;  %v1459_v30 = vcombine.high %v65_v25, %v67_v26  ;;  %v68_v31 = vld [vmem:[%s2214_s1 + $0x300] sm:$0xff]  ;;  %v69_v33 = vld [vmem:[%s2214_s1 + $0x308] sm:$0xff]  ;;  %v1456_v35 = vcombine.low %v64_v23, %v66_v24 }
  0x1b   :  { %448 = vmatprep.subr.bf16.mxu0 %v1437_v52  ;;  %491 = vmatprep.subr.bf16.mxu1 %v1439_v53  ;;  %v70_v32 = vld [vmem:[%s2214_s1 + $0x320] sm:$0xff]  ;;  %v71_v34 = vld [vmem:[%s2214_s1 + $0x328] sm:$0xff]  ;;  %v1458_v36 = vcombine.low %v65_v25, %v67_v26 }
  0x1c   :  { %v1461_v37 = vcombine.high %v68_v31, %v70_v32  ;;  %v1463_v38 = vcombine.high %v69_v33, %v71_v34  ;;  %v72_v39 = vld [vmem:[%s2214_s1 + $0x340] sm:$0xff]  ;;  %v73_v41 = vld [vmem:[%s2214_s1 + $0x348] sm:$0xff]  ;;  %v1460_v43 = vcombine.low %v68_v31, %v70_v32  ;;  %v1462_v44 = vcombine.low %v69_v33, %v71_v34 }
  0x1d   :  { %v74_v40 = vld [vmem:[%s2214_s1 + $0x360] sm:$0xff]  ;;  %v75_v42 = vld [vmem:[%s2214_s1 + $0x368] sm:$0xff] }
  0x1e   :  { %449 = vmatpush1.bf16.msra.mxu0 %v1436_v59  ;;  %492 = vmatpush1.bf16.msra.mxu1 %v1438_v60  ;;  %v1465_v45 = vcombine.high %v72_v39, %v74_v40  ;;  %v1467_v46 = vcombine.high %v73_v41, %v75_v42  ;;  %v76_v47 = vld [vmem:[%s2214_s1 + $0x380] sm:$0xff]  ;;  %v77_v49 = vld [vmem:[%s2214_s1 + $0x388] sm:$0xff]  ;;  %v1464_v51 = vcombine.low %v72_v39, %v74_v40 }
  0x1f   :  { %450 = vmatprep.subr.bf16.mxu0 %v1441_v61  ;;  %493 = vmatprep.subr.bf16.mxu1 %v1443_v62  ;;  %v78_v48 = vld [vmem:[%s2214_s1 + $0x3a0] sm:$0xff]  ;;  %v79_v50 = vld [vmem:[%s2214_s1 + $0x3a8] sm:$0xff]  ;;  %v1466_v52 = vcombine.low %v73_v41, %v75_v42 }
  0x20   :  { %v1469_v53 = vcombine.high %v76_v47, %v78_v48  ;;  %v1471_v54 = vcombine.high %v77_v49, %v79_v50  ;;  %v80_v55 = vld [vmem:[%s2214_s1 + $0x3c0] sm:$0xff]  ;;  %v81_v57 = vld [vmem:[%s2214_s1 + $0x3c8] sm:$0xff]  ;;  %v1468_v59 = vcombine.low %v76_v47, %v78_v48  ;;  %v1470_v60 = vcombine.low %v77_v49, %v79_v50 }
  0x21   :  { %v82_v56 = vld [vmem:[%s2214_s1 + $0x3e0] sm:$0xff]  ;;  %v83_v58 = vld [vmem:[%s2214_s1 + $0x3e8] sm:$0xff] }
  0x22   :  { %451 = vmatpush1.bf16.msra.mxu0 %v1440_v3  ;;  %494 = vmatpush1.bf16.msra.mxu1 %v1442_v4  ;;  %v1473_v61 = vcombine.high %v80_v55, %v82_v56  ;;  %v1475_v62 = vcombine.high %v81_v57, %v83_v58  ;;  %v1472_v63 = vcombine.low %v80_v55, %v82_v56  ;;  %v1603_v1 = vld [vmem:[%s2217_s0] ss:$8 sps:$4 sm:$0xff]   ;;  %v1649_v3 = vmov 0.0  }
  0x23   :  { %452 = vmatprep.subr.bf16.mxu0 %v1445_v5  ;;  %495 = vmatprep.subr.bf16.mxu1 %v1447_v6  ;;  %v1474_v0 = vcombine.low %v81_v57, %v83_v58  ;;  %551 = vst [vmem:[#allocation4] sm:$0xff] %v1649_v3  ;;  %v86_v4 = vlaneseq  ;;  %v84_v7 = vld [vmem:[%s2218_s3] sm:$0xf] }
  0x25   :  { %v1874_v5 = vshrl.u32 %v86_v4, 7 }
  0x26   :  { %453 = vmatpush1.bf16.msra.mxu0 %v1444_v11  ;;  %496 = vmatpush1.bf16.msra.mxu1 %v1446_v12 }
  0x27   :  { %454 = vmatprep.subr.bf16.mxu0 %v1449_v13  ;;  %497 = vmatprep.subr.bf16.mxu1 %v1451_v14  ;;  %v88_v6 = vsub.s32 0, %v1874_v5  ;;  %v96_v8 = vsub.s32 2, %v1874_v5  ;;  %v92_v9 = vsub.s32 1, %v1874_v5  ;;  %v100_v10 = vsub.s32 3, %v1874_v5 }
  0x29   :  { %v89_v11 = vrot.slane %v84_v7, %v88_v6  ;;  %v97_v12 = vrot.slane %v84_v7, %v96_v8  ;;  %v93_v13 = vrot.slane %v84_v7, %v92_v9  ;;  %v101_v14 = vrot.slane %v84_v7, %v100_v10 }
  0x2a   :  { %455 = vmatpush1.bf16.msra.mxu0 %v1448_v19  ;;  %498 = vmatpush1.bf16.msra.mxu1 %v1450_v20 }
  0x2b   :  { %456 = vmatprep.subr.bf16.mxu0 %v1453_v21  ;;  %499 = vmatprep.subr.bf16.mxu1 %v1455_v22 }
  0x2e   :  { %457 = vmatpush1.bf16.msra.mxu0 %v1452_v27  ;;  %500 = vmatpush1.bf16.msra.mxu1 %v1454_v28 }
  0x2f   :  { %458 = vmatprep.subr.bf16.mxu0 %v1457_v29  ;;  %501 = vmatprep.subr.bf16.mxu1 %v1459_v30 }
  0x32   :  { %459 = vmatpush1.bf16.msra.mxu0 %v1456_v35  ;;  %502 = vmatpush1.bf16.msra.mxu1 %v1458_v36 }
  0x33   :  { %460 = vmatprep.subr.bf16.mxu0 %v1461_v37  ;;  %503 = vmatprep.subr.bf16.mxu1 %v1463_v38 }
  0x36   :  { %461 = vmatpush1.bf16.msra.mxu0 %v1460_v43  ;;  %504 = vmatpush1.bf16.msra.mxu1 %v1462_v44 }
  0x37   :  { %462 = vmatprep.subr.bf16.mxu0 %v1465_v45  ;;  %505 = vmatprep.subr.bf16.mxu1 %v1467_v46 }
  0x3a   :  { %463 = vmatpush1.bf16.msra.mxu0 %v1464_v51  ;;  %506 = vmatpush1.bf16.msra.mxu1 %v1466_v52 }
  0x3b   :  { %464 = vmatprep.subr.bf16.mxu0 %v1469_v53  ;;  %507 = vmatprep.subr.bf16.mxu1 %v1471_v54 }
  0x3e   :  { %465 = vmatpush1.bf16.msra.mxu0 %v1468_v59  ;;  %508 = vmatpush1.bf16.msra.mxu1 %v1470_v60 }
  0x3f   :  { %466 = vmatprep.subr.bf16.mxu0 %v1473_v61  ;;  %509 = vmatprep.subr.bf16.mxu1 %v1475_v62 }
  0x42   :  { %467 = vmatpush1.bf16.msra.mxu0 %v1472_v63  ;;  %510 = vmatpush1.bf16.msra.mxu1 %v1474_v0 }
  0x45   :  { %469 = vmatmul.mubr.bf16.vlgmr.msra.gmra.mrb[0].mxu0 %v1603_v1  ;;  %512 = vmatmul.mubr.bf16.vlgmr.msra.gmra.mrb[0].mxu1 %v1603_v1 }
 0x118   :  { %v470_v15 = vpop.f32.mrb[0].mxu0  ;;  %v513_v17 = vpop.f32.mrb[0].mxu1 }
 0x119   :  { %v471_v16 = vadd.f32 %v470_v15, %v89_v11  ;;  %v472_v18 = vpop.f32.mrb[1].mxu0  ;;  %v514_v19 = vadd.f32 %v513_v17, %v97_v12  ;;  %v515_v21 = vpop.f32.mrb[1].mxu1 }
 0x11a   :  { %v473_v20 = vadd.f32 %v472_v18, %v93_v13  ;;  %v474_v22 = vpop.f32.mrb[2].mxu0  ;;  %v516_v23 = vadd.f32 %v515_v21, %v101_v14  ;;  %v517_v25 = vpop.f32.mrb[2].mxu1 }
 0x11b   :  { %v475_v24 = vadd.f32 %v474_v22, %v89_v11  ;;  %v476_v26 = vpop.f32.mrb[3].mxu0  ;;  %v518_v28 = vadd.f32 %v517_v25, %v97_v12  ;;  %v519_v30 = vpop.f32.mrb[3].mxu1 }
 0x11c   :  { %v1587_v27 = vpack.c.bf16 %v473_v20, %v471_v16  ;;  %v477_v29 = vadd.f32 %v476_v26, %v93_v13  ;;  %v1588_v31 = vpack.c.bf16 %v516_v23, %v514_v19  ;;  %v520_v32 = vadd.f32 %v519_v30, %v101_v14 }
 0x11e   :  { %546 = vst [vmem:[#allocation2] sm:$0xff] %v1587_v27  ;;  %v1589_v33 = vpack.c.bf16 %v477_v29, %v475_v24  ;;  %547 = vst [vmem:[#allocation2 + $0x8] sm:$0xff] %v1588_v31  ;;  %v1590_v34 = vpack.c.bf16 %v520_v32, %v518_v28 }
 0x120   :  { %548 = vst [vmem:[#allocation2 + $0x10] sm:$0xff] %v1589_v33  ;;  %549 = vst [vmem:[#allocation2 + $0x18] sm:$0xff] %v1590_v34 }
 0x121 LB: > { %v568_v35 = vld [vmem:[%s2215_s2] sm:$0xff]  ;;  %v1650_v41 = vmov 0   ;;  %v569_v45 = vld [vmem:[%s2215_s2 + $0x8] sm:$0xff]  ;;  %s1591_s8 = sshll.u32 %s1646_s19, 4  ;;  %s557_s19 = sadd.s32 1, %s1646_s19   ;;  %s1646_s19 = sphi %s1891_s19, %s557_s19  }
 0x122   : > { %v570_v36 = vld [vmem:[%s2215_s2 + $0x20] sm:$0xff]  ;;  %792 = vmatprep.mubr.bf16.mxu0 %v1650_v41  ;;  %833 = vmatprep.mubr.bf16.mxu1 %v1650_v41  ;;  %v571_v46 = vld [vmem:[%s2215_s2 + $0x28] sm:$0xff]  ;;  %s560_s9 = scalar_lea.vmem [#allocation2], %s1591_s8  ;;  %p554_p0 = scmp.ge.s32.totalorder %s557_s19, 2  }
 0x123   : > { %v572_v37 = vld [vmem:[%s2215_s2 + $0x40] sm:$0xff]  ;;  %v1483_v38 = vcombine.high %v568_v35, %v570_v36  ;;  %v1482_v39 = vcombine.low %v568_v35, %v570_v36  ;;  %v1485_v48 = vcombine.high %v569_v45, %v571_v46  ;;  %v1484_v49 = vcombine.low %v569_v45, %v571_v46  ;;  %v573_v50 = vld [vmem:[%s2215_s2 + $0x48] sm:$0xff] }
 0x124   : > { %v574_v40 = vld [vmem:[%s2215_s2 + $0x60] sm:$0xff]  ;;  %v575_v51 = vld [vmem:[%s2215_s2 + $0x68] sm:$0xff] }
 0x125   : > { %v1487_v42 = vcombine.high %v572_v37, %v574_v40  ;;  %v576_v43 = vld [vmem:[%s2215_s2 + $0x80] sm:$0xff]  ;;  %760 = vmatprep.subr.bf16.mxu0 %v1483_v38  ;;  %v1486_v47 = vcombine.low %v572_v37, %v574_v40  ;;  %v1489_v53 = vcombine.high %v573_v50, %v575_v51  ;;  %v577_v54 = vld [vmem:[%s2215_s2 + $0x88] sm:$0xff]  ;;  %801 = vmatprep.subr.bf16.mxu1 %v1485_v48 }
 0x126   : > { %v578_v44 = vld [vmem:[%s2215_s2 + $0xa0] sm:$0xff]  ;;  %761 = vmatpush1.bf16.msra.mxu0 %v1482_v39  ;;  %v579_v55 = vld [vmem:[%s2215_s2 + $0xa8] sm:$0xff]  ;;  %802 = vmatpush1.bf16.msra.mxu1 %v1484_v49  ;;  %v1488_v58 = vcombine.low %v573_v50, %v575_v51 }
 0x127   : > { %762 = vmatprep.subr.bf16.mxu0 %v1487_v42  ;;  %v1491_v52 = vcombine.high %v576_v43, %v578_v44  ;;  %v580_v56 = vld [vmem:[%s2215_s2 + $0xc0] sm:$0xff]  ;;  %v1490_v59 = vcombine.low %v576_v43, %v578_v44  ;;  %803 = vmatprep.subr.bf16.mxu1 %v1489_v53  ;;  %v1493_v60 = vcombine.high %v577_v54, %v579_v55  ;;  %v581_v62 = vld [vmem:[%s2215_s2 + $0xc8] sm:$0xff] }
 0x128   : > { %v582_v57 = vld [vmem:[%s2215_s2 + $0xe0] sm:$0xff]  ;;  %v583_v63 = vld [vmem:[%s2215_s2 + $0xe8] sm:$0xff]  ;;  %v1492_v2 = vcombine.low %v577_v54, %v579_v55 }
 0x129   : > { %v1495_v61 = vcombine.high %v580_v56, %v582_v57  ;;  %v584_v0 = vld [vmem:[%s2215_s2 + $0x100] sm:$0xff]  ;;  %v1494_v3 = vcombine.low %v580_v56, %v582_v57  ;;  %v1497_v4 = vcombine.high %v581_v62, %v583_v63  ;;  %v585_v11 = vld [vmem:[%s2215_s2 + $0x108] sm:$0xff]  ;;  %v1496_v15 = vcombine.low %v581_v62, %v583_v63 }
 0x12a   : > { %763 = vmatpush1.bf16.msra.mxu0 %v1486_v47  ;;  %v586_v1 = vld [vmem:[%s2215_s2 + $0x120] sm:$0xff]  ;;  %804 = vmatpush1.bf16.msra.mxu1 %v1488_v58  ;;  %v587_v12 = vld [vmem:[%s2215_s2 + $0x128] sm:$0xff] }
 0x12b   : > { %764 = vmatprep.subr.bf16.mxu0 %v1491_v52  ;;  %805 = vmatprep.subr.bf16.mxu1 %v1493_v60  ;;  %v1499_v7 = vcombine.high %v584_v0, %v586_v1  ;;  %v588_v13 = vld [vmem:[%s2215_s2 + $0x140] sm:$0xff]  ;;  %v1498_v16 = vcombine.low %v584_v0, %v586_v1  ;;  %v1501_v17 = vcombine.high %v585_v11, %v587_v12  ;;  %v589_v19 = vld [vmem:[%s2215_s2 + $0x148] sm:$0xff] }
 0x12c   : > { %v590_v14 = vld [vmem:[%s2215_s2 + $0x160] sm:$0xff]  ;;  %v591_v20 = vld [vmem:[%s2215_s2 + $0x168] sm:$0xff]  ;;  %v1500_v23 = vcombine.low %v585_v11, %v587_v12 }
 0x12d   : > { %v1503_v18 = vcombine.high %v588_v13, %v590_v14  ;;  %v592_v21 = vld [vmem:[%s2215_s2 + $0x180] sm:$0xff]  ;;  %v1502_v24 = vcombine.low %v588_v13, %v590_v14  ;;  %v1505_v25 = vcombine.high %v589_v19, %v591_v20  ;;  %v593_v27 = vld [vmem:[%s2215_s2 + $0x188] sm:$0xff]  ;;  %v1504_v31 = vcombine.low %v589_v19, %v591_v20 }
 0x12e   : > { %765 = vmatpush1.bf16.msra.mxu0 %v1490_v59  ;;  %806 = vmatpush1.bf16.msra.mxu1 %v1492_v2  ;;  %v594_v22 = vld [vmem:[%s2215_s2 + $0x1a0] sm:$0xff]  ;;  %v595_v28 = vld [vmem:[%s2215_s2 + $0x1a8] sm:$0xff] }
 0x12f   : > { %766 = vmatprep.subr.bf16.mxu0 %v1495_v61  ;;  %807 = vmatprep.subr.bf16.mxu1 %v1497_v4  ;;  %v1507_v26 = vcombine.high %v592_v21, %v594_v22  ;;  %v596_v29 = vld [vmem:[%s2215_s2 + $0x1c0] sm:$0xff]  ;;  %v1506_v32 = vcombine.low %v592_v21, %v594_v22  ;;  %v1509_v33 = vcombine.high %v593_v27, %v595_v28  ;;  %v597_v35 = vld [vmem:[%s2215_s2 + $0x1c8] sm:$0xff]  ;;  %v876_v21 = vld [vmem:[%s2214_s1 + $0x10] sm:$0xff] (%p554_p0) }
 0x130   : > { %v598_v30 = vld [vmem:[%s2215_s2 + $0x1e0] sm:$0xff]  ;;  %v599_v36 = vld [vmem:[%s2215_s2 + $0x1e8] sm:$0xff]  ;;  %v1508_v37 = vcombine.low %v593_v27, %v595_v28  ;;  %v878_v22 = vld [vmem:[%s2214_s1 + $0x30] sm:$0xff] (%p554_p0) }
 0x131   : > { %v1511_v34 = vcombine.high %v596_v29, %v598_v30  ;;  %v1510_v38 = vcombine.low %v596_v29, %v598_v30  ;;  %v1513_v39 = vcombine.high %v597_v35, %v599_v36  ;;  %v1512_v40 = vcombine.low %v597_v35, %v599_v36  ;;  %v567_v41 = vld [vmem:[#allocation3] sm:$0xf]  ;;  %v562_v46 = vld [vmem:[%s560_s9 + $0x8] sm:$0xff]  ;;  %v884_v28 = vld [vmem:[%s2214_s1 + $0x90] sm:$0xff] (%p554_p0) }
 0x132   : > { %767 = vmatpush1.bf16.msra.mxu0 %v1494_v3  ;;  %808 = vmatpush1.bf16.msra.mxu1 %v1496_v15  ;;  %v561_v42 = vld [vmem:[%s560_s9] sm:$0xff]  ;;  %v566_v54 = vunpack.c.h.bf16 %v562_v46  ;;  %v565_v60 = vunpack.c.l.bf16 %v562_v46  ;;  %v886_v29 = vld [vmem:[%s2214_s1 + $0xb0] sm:$0xff] (%p554_p0)  ;;  %v877_v30 = vld [vmem:[%s2214_s1 + $0x18] sm:$0xff] (%p554_p0) }
 0x133   : > { %768 = vmatprep.subr.bf16.mxu0 %v1499_v7  ;;  %809 = vmatprep.subr.bf16.mxu1 %v1501_v17  ;;  %v563_v43 = vunpack.c.l.bf16 %v561_v42  ;;  %v564_v44 = vunpack.c.h.bf16 %v561_v42  ;;  %v846_v7 = vld [vmem:[#allocation4] sm:$0xff]  ;;  %v881_v35 = vld [vmem:[%s2214_s1 + $0x58] sm:$0xff] (%p554_p0)  ;;  %v890_v42 = vld [vmem:[%s2214_s1 + $0xf0] sm:$0xff] (%p554_p0) }
 0x134   :  { %v883_v36 = vld [vmem:[%s2214_s1 + $0x78] sm:$0xff] (%p554_p0) }
 0x136   : > { %769 = vmatpush1.bf16.msra.mxu0 %v1498_v16  ;;  %810 = vmatpush1.bf16.msra.mxu1 %v1500_v23  ;;  %v880_v23 = vld [vmem:[%s2214_s1 + $0x50] sm:$0xff] (%p554_p0) }
 0x137   : > { %770 = vmatprep.subr.bf16.mxu0 %v1503_v18  ;;  %811 = vmatprep.subr.bf16.mxu1 %v1505_v25  ;;  %v1520_v25 = vcombine.low (%p554_p0), %v876_v21, %v878_v22 }
 0x13a   : > { %771 = vmatpush1.bf16.msra.mxu0 %v1502_v24  ;;  %812 = vmatpush1.bf16.msra.mxu1 %v1504_v31  ;;  %v1521_v24 = vcombine.high (%p554_p0), %v876_v21, %v878_v22  ;;  %v879_v31 = vld [vmem:[%s2214_s1 + $0x38] sm:$0xff] (%p554_p0) }
 0x13b   : > { %772 = vmatprep.subr.bf16.mxu0 %v1507_v26  ;;  %813 = vmatprep.subr.bf16.mxu1 %v1509_v33  ;;  %v882_v26 = vld [vmem:[%s2214_s1 + $0x70] sm:$0xff] (%p554_p0)  ;;  %v1523_v33 = vcombine.high (%p554_p0), %v877_v30, %v879_v31  ;;  %v905_v22 = vld [vmem:[%s2214_s1 + $0x1d8] sm:$0xff] (%p554_p0) }
 0x13c   :  { %v1525_v27 = vcombine.high (%p554_p0), %v880_v23, %v882_v26 }
 0x13e   : > { %773 = vmatpush1.bf16.msra.mxu0 %v1506_v32  ;;  %814 = vmatpush1.bf16.msra.mxu1 %v1508_v37  ;;  %v1524_v32 = vcombine.low (%p554_p0), %v880_v23, %v882_v26  ;;  %v1529_v37 = vcombine.high (%p554_p0), %v884_v28, %v886_v29  ;;  %v907_v23 = vld [vmem:[%s2214_s1 + $0x1f8] sm:$0xff] (%p554_p0) }
 0x13f   : > { %774 = vmatprep.subr.bf16.mxu0 %v1511_v34  ;;  %815 = vmatprep.subr.bf16.mxu1 %v1513_v39  ;;  %v1522_v34 = vcombine.low (%p554_p0), %v877_v30, %v879_v31  ;;  %v885_v39 = vld [vmem:[%s2214_s1 + $0x98] sm:$0xff] (%p554_p0) }
 0x140   :  { %v909_v30 = vld [vmem:[%s2214_s1 + $0x218] sm:$0xff] (%p554_p0) }
 0x141   :  { %v911_v31 = vld [vmem:[%s2214_s1 + $0x238] sm:$0xff] (%p554_p0) }
 0x142   : > { %775 = vmatpush1.bf16.msra.mxu0 %v1510_v38  ;;  %816 = vmatpush1.bf16.msra.mxu1 %v1512_v40  ;;  %v1527_v38 = vcombine.high (%p554_p0), %v881_v35, %v883_v36  ;;  %v887_v40 = vld [vmem:[%s2214_s1 + $0xb8] sm:$0xff] (%p554_p0) }
 0x143   :  { %1289 = vmatprep.subr.bf16.mxu0 (%p554_p0), %v1521_v24  ;;  %1330 = vmatprep.subr.bf16.mxu1 (%p554_p0), %v1523_v33  ;;  %v908_v24 = vld [vmem:[%s2214_s1 + $0x210] sm:$0xff] (%p554_p0) }
 0x144   :  { %v914_v33 = vld [vmem:[%s2214_s1 + $0x270] sm:$0xff] (%p554_p0) }
 0x145   : > { %793 = vmatmul.mubr.bf16.vlgmr.msra.gmra.mrb[0].mxu0 %v567_v41  ;;  %834 = vmatmul.mubr.bf16.vlgmr.msra.gmra.mrb[0].mxu1 %v567_v41  ;;  %v888_v41 = vld [vmem:[%s2214_s1 + $0xd0] sm:$0xff] (%p554_p0) }
 0x146   :  { %1290 = vmatpush1.bf16.msra.mxu0 (%p554_p0), %v1520_v25  ;;  %1331 = vmatpush1.bf16.msra.mxu1 (%p554_p0), %v1522_v34  ;;  %v1533_v46 = vcombine.high (%p554_p0), %v888_v41, %v890_v42  ;;  %v910_v25 = vld [vmem:[%s2214_s1 + $0x230] sm:$0xff] (%p554_p0)  ;;  %v1550_v34 = vcombine.low (%p554_p0), %v905_v22, %v907_v23 }
 0x147   :  { %1291 = vmatprep.subr.bf16.mxu0 (%p554_p0), %v1525_v27  ;;  %1332 = vmatprep.subr.bf16.mxu1 (%p554_p0), %v1527_v38  ;;  %v913_v38 = vld [vmem:[%s2214_s1 + $0x258] sm:$0xff] (%p554_p0) }
 0x14a   :  { %1292 = vmatpush1.bf16.msra.mxu0 (%p554_p0), %v1524_v32  ;;  %v912_v32 = vld [vmem:[%s2214_s1 + $0x250] sm:$0xff] (%p554_p0) }
 0x14b   :  { %1293 = vmatprep.subr.bf16.mxu0 (%p554_p0), %v1529_v37  ;;  %v1557_v37 = vcombine.high (%p554_p0), %v912_v32, %v914_v33 }
 0x218   : > { %v794_v45 = vpop.f32.mrb[0].mxu0  ;;  %v835_v53 = vpop.f32.mrb[0].mxu1 }
 0x219   : > { %v842_v47 = vadd.f32 %v794_v45, %v563_v43  ;;  %v796_v48 = vpop.f32.mrb[1].mxu0  ;;  %v837_v56 = vpop.f32.mrb[1].mxu1  ;;  %v844_v62 = vadd.f32 %v835_v53, %v565_v60  ;;  %v1526_v43 = vcombine.low (%p554_p0), %v881_v35, %v883_v36  ;;  %v1531_v45 = vcombine.high (%p554_p0), %v885_v39, %v887_v40 }
 0x21a   : > { %v843_v49 = vadd.f32 %v796_v48, %v564_v44  ;;  %v798_v50 = vpop.f32.mrb[2].mxu0  ;;  %v839_v57 = vpop.f32.mrb[2].mxu1  ;;  %v845_v59 = vadd.f32 %v837_v56, %v566_v54  ;;  %v1528_v44 = vcombine.low (%p554_p0), %v884_v28, %v886_v29  ;;  %v891_v48 = vld [vmem:[%s2214_s1 + $0xf8] sm:$0xff] (%p554_p0)  ;;  %v1551_v28 = vcombine.high (%p554_p0), %v905_v22, %v907_v23  ;;  %v936_v22 = vld [vmem:[%s2214_s1 + $0x3d0] sm:$0xff] (%p554_p0) }
 0x21b   : > { %v1514_v51 = vmul.f32 -1.442695, %v842_v47  ;;  %v799_v52 = vpop.f32.mrb[3].mxu0  ;;  %v840_v58 = vpop.f32.mrb[3].mxu1  ;;  %v889_v47 = vld [vmem:[%s2214_s1 + $0xd8] sm:$0xff] (%p554_p0)  ;;  %v894_v50 = vld [vmem:[%s2214_s1 + $0x130] sm:$0xff] (%p554_p0)  ;;  %1333 = vmatpush1.bf16.msra.mxu1 (%p554_p0), %v1526_v43  ;;  %v1553_v29 = vcombine.high (%p554_p0), %v908_v24, %v910_v25  ;;  %v1552_v35 = vcombine.low (%p554_p0), %v908_v24, %v910_v25  ;;  %v1555_v36 = vcombine.high (%p554_p0), %v909_v30, %v911_v31 }
 0x21c   : > { %v1515_v55 = vmul.f32 -1.442695, %v843_v49  ;;  %v1516_v61 = vmul.f32 -1.442695, %v845_v59  ;;  %v892_v49 = vld [vmem:[%s2214_s1 + $0x110] sm:$0xff] (%p554_p0)  ;;  %1294 = vmatpush1.bf16.msra.mxu0 (%p554_p0), %v1528_v44  ;;  %v1532_v52 = vcombine.low (%p554_p0), %v888_v41, %v890_v42  ;;  %1334 = vmatprep.subr.bf16.mxu1 (%p554_p0), %v1531_v45  ;;  %v1535_v53 = vcombine.high (%p554_p0), %v889_v47, %v891_v48  ;;  %v895_v56 = vld [vmem:[%s2214_s1 + $0x138] sm:$0xff] (%p554_p0) }
 0x21d   : > { %1606 = vpow2.f32 %v1514_v51  ;;  %v1530_v51 = vcombine.low (%p554_p0), %v885_v39, %v887_v40  ;;  %1295 = vmatprep.subr.bf16.mxu0 (%p554_p0), %v1533_v46  ;;  %v1537_v54 = vcombine.high (%p554_p0), %v892_v49, %v894_v50  ;;  %v896_v57 = vld [vmem:[%s2214_s1 + $0x150] sm:$0xff] (%p554_p0)  ;;  %v1534_v59 = vcombine.low (%p554_p0), %v889_v47, %v891_v48  ;;  %v915_v39 = vld [vmem:[%s2214_s1 + $0x278] sm:$0xff] (%p554_p0) }
 0x21e   : > { %1608 = vpow2.f32 %v1515_v55  ;;  %v893_v55 = vld [vmem:[%s2214_s1 + $0x118] sm:$0xff] (%p554_p0)  ;;  %v898_v58 = vld [vmem:[%s2214_s1 + $0x170] sm:$0xff] (%p554_p0)  ;;  %v1536_v60 = vcombine.low (%p554_p0), %v892_v49, %v894_v50  ;;  %v1554_v42 = vcombine.low (%p554_p0), %v909_v30, %v911_v31  ;;  %v1556_v43 = vcombine.low (%p554_p0), %v912_v32, %v914_v33 }
 0x21f   : > { %1610 = vpow2.f32 %v1516_v61  ;;  %1335 = vmatpush1.bf16.msra.mxu1 (%p554_p0), %v1530_v51  ;;  %v1539_v61 = vcombine.high (%p554_p0), %v893_v55, %v895_v56  ;;  %v916_v40 = vld [vmem:[%s2214_s1 + $0x290] sm:$0xff] (%p554_p0)  ;;  %v1559_v44 = vcombine.high (%p554_p0), %v913_v38, %v915_v39  ;;  %v917_v46 = vld [vmem:[%s2214_s1 + $0x298] sm:$0xff] (%p554_p0)  ;;  %v1558_v50 = vcombine.low (%p554_p0), %v913_v38, %v915_v39 }
 0x220   : > { %1612 = vtanh.f32 %v844_v62  ;;  %1296 = vmatpush1.bf16.msra.mxu0 (%p554_p0), %v1532_v52  ;;  %1336 = vmatprep.subr.bf16.mxu1 (%p554_p0), %v1535_v53  ;;  %v1541_v62 = vcombine.high (%p554_p0), %v896_v57, %v898_v58  ;;  %v918_v41 = vld [vmem:[%s2214_s1 + $0x2b0] sm:$0xff] (%p554_p0)  ;;  %v919_v47 = vld [vmem:[%s2214_s1 + $0x2b8] sm:$0xff] (%p554_p0) }
 0x221   :  { %1297 = vmatprep.subr.bf16.mxu0 (%p554_p0), %v1537_v54  ;;  %v1561_v45 = vcombine.high (%p554_p0), %v916_v40, %v918_v41  ;;  %v920_v48 = vld [vmem:[%s2214_s1 + $0x2d0] sm:$0xff] (%p554_p0)  ;;  %v1560_v51 = vcombine.low (%p554_p0), %v916_v40, %v918_v41  ;;  %v1563_v52 = vcombine.high (%p554_p0), %v917_v46, %v919_v47  ;;  %v921_v54 = vld [vmem:[%s2214_s1 + $0x2d8] sm:$0xff] (%p554_p0) }
 0x222   :  { %v922_v49 = vld [vmem:[%s2214_s1 + $0x2f0] sm:$0xff] (%p554_p0) }
 0x223   :  { %1337 = vmatpush1.bf16.msra.mxu1 (%p554_p0), %v1534_v59  ;;  %v1565_v53 = vcombine.high (%p554_p0), %v920_v48, %v922_v49  ;;  %v1564_v59 = vcombine.low (%p554_p0), %v920_v48, %v922_v49  ;;  %v938_v23 = vld [vmem:[%s2214_s1 + $0x3f0] sm:$0xff] (%p554_p0) }
 0x224   :  { %1298 = vmatpush1.bf16.msra.mxu0 (%p554_p0), %v1536_v60  ;;  %1338 = vmatprep.subr.bf16.mxu1 (%p554_p0), %v1539_v61  ;;  %v1580_v31 = vcombine.low (%p554_p0), %v936_v22, %v938_v23 }
 0x225   :  { %1299 = vmatprep.subr.bf16.mxu0 (%p554_p0), %v1541_v62  ;;  %v925_v62 = vld [vmem:[%s2214_s1 + $0x318] sm:$0xff] (%p554_p0) }
 0x227   : > { %v1607_v63 = vpop.eup %1606 }
 0x228   : > { %v1609_v0 = vpop.eup %1608  ;;  %v850_v1 = vadd.f32 1.0, %v1607_v63  ;;  %v897_v63 = vld [vmem:[%s2214_s1 + $0x158] sm:$0xff] (%p554_p0) }
 0x229   : > { %v856_v2 = vadd.f32 1.0, %v1609_v0  ;;  %v1611_v3 = vpop.eup %1610  ;;  %v899_v0 = vld [vmem:[%s2214_s1 + $0x178] sm:$0xff] (%p554_p0) }
 0x22a   : > { %1614 = vrcp.f32 %v850_v1  ;;  %v1613_v4 = vpop.eup %1612  ;;  %v863_v12 = vadd.f32 1.0, %v1611_v3  ;;  %v900_v1 = vld [vmem:[%s2214_s1 + $0x190] sm:$0xff] (%p554_p0)  ;;  %v1538_v3 = vcombine.low (%p554_p0), %v893_v55, %v895_v56  ;;  %v923_v55 = vld [vmem:[%s2214_s1 + $0x2f8] sm:$0xff] (%p554_p0) }
 0x22b   : > { %1616 = vrcp.f32 %v856_v2  ;;  %v902_v2 = vld [vmem:[%s2214_s1 + $0x1b0] sm:$0xff] (%p554_p0)  ;;  %v1567_v60 = vcombine.high (%p554_p0), %v921_v54, %v923_v55 }
 0x22c   : > { %1618 = vrcp.f32 %v863_v12  ;;  %v1545_v12 = vcombine.high (%p554_p0), %v900_v1, %v902_v2  ;;  %1339 = vmatpush1.bf16.msra.mxu1 (%p554_p0), %v1538_v3  ;;  %v924_v56 = vld [vmem:[%s2214_s1 + $0x310] sm:$0xff] (%p554_p0) }
 0x234   : > { %v1615_v11 = vpop.eup %1614 }
 0x235   : > { %v1617_v13 = vpop.eup %1616  ;;  %v867_v14 = vmul.f32 %v1615_v11, %v1613_v4  ;;  %v2077_v4 = vld [vmem:[%s2217_s0 + $0x8] sm:$0xff] (%p554_p0)  ;;  %v1543_v11 = vcombine.high (%p554_p0), %v897_v63, %v899_v0 }
 0x236   : > { %v866_v15 = vmul.f32 %v1617_v13, %v846_v7  ;;  %v1619_v17 = vpop.eup %1618  ;;  %v1540_v7 = vcombine.low (%p554_p0), %v896_v57, %v898_v58  ;;  %v901_v13 = vld [vmem:[%s2214_s1 + $0x198] sm:$0xff] (%p554_p0)  ;;  %v926_v57 = vld [vmem:[%s2214_s1 + $0x330] sm:$0xff] (%p554_p0)  ;;  %v1562_v58 = vcombine.low (%p554_p0), %v917_v46, %v919_v47  ;;  %v1518_v33 = vcombine.low (%p554_p0), %v2077_v4, %v2077_v4 }
 0x237   :  { %1340 = vmatprep.subr.bf16.mxu1 (%p554_p0), %v1543_v11  ;;  %v1569_v61 = vcombine.high (%p554_p0), %v924_v56, %v926_v57  ;;  %v1568_v3 = vcombine.low (%p554_p0), %v924_v56, %v926_v57 }
 0x238   : > { %v868_v16 = vadd.f32 %v867_v14, %v866_v15  ;;  %v903_v14 = vld [vmem:[%s2214_s1 + $0x1b8] sm:$0xff] (%p554_p0)  ;;  %v1519_v15 = vcombine.high (%p554_p0), %v2077_v4, %v2077_v4  ;;  %1300 = vmatpush1.bf16.msra.mxu0 (%p554_p0), %v1540_v7 }
 0x239   :  { %1301 = vmatprep.subr.bf16.mxu0 (%p554_p0), %v1545_v12  ;;  %v1546_v26 = vcombine.low (%p554_p0), %v901_v13, %v903_v14  ;;  %v929_v12 = vld [vmem:[%s2214_s1 + $0x358] sm:$0xff] (%p554_p0) }
 0x23a   : > { %1620 = vtanh.f32 %v868_v16  ;;  %873 = vst [vmem:[#allocation4] sm:$0xff] %v868_v16  ;;  %v904_v16 = vld [vmem:[%s2214_s1 + $0x1d0] sm:$0xff] (%p554_p0)  ;;  %1321 = vmatprep.mubr.bf16.mxu0 (%p554_p0), %v1519_v15  ;;  %1362 = vmatprep.mubr.bf16.mxu1 (%p554_p0), %v1519_v15 }
 0x23b   :  { %v934_v15 = vld [vmem:[%s2214_s1 + $0x3b0] sm:$0xff] (%p554_p0) }
 0x243   :  { %556 = sbr.rel (!%p554_p0) target bundleno = 289 (0x121), region = 45 }
 0x244   : > { %v1621_v18 = vpop.eup %1620 }
 0x245   : > { %v870_v19 = vmul.f32 %v1621_v18, %v1619_v17  ;;  %v906_v17 = vld [vmem:[%s2214_s1 + $0x1f0] sm:$0xff] (%p554_p0)  ;;  %v1542_v18 = vcombine.low (%p554_p0), %v897_v63, %v899_v0  ;;  %v927_v63 = vld [vmem:[%s2214_s1 + $0x338] sm:$0xff] (%p554_p0) }
 0x246   :  { %v1549_v21 = vcombine.high (%p554_p0), %v904_v16, %v906_v17  ;;  %v1548_v27 = vcombine.low (%p554_p0), %v904_v16, %v906_v17  ;;  %v928_v0 = vld [vmem:[%s2214_s1 + $0x350] sm:$0xff] (%p554_p0)  ;;  %v1571_v7 = vcombine.high (%p554_p0), %v925_v62, %v927_v63  ;;  %v1570_v16 = vcombine.low (%p554_p0), %v925_v62, %v927_v63 }
 0x247   : > { %v871_v20 = vpack.c.bf16 %v870_v19, %v870_v19  ;;  %v1544_v19 = vcombine.low (%p554_p0), %v900_v1, %v902_v2  ;;  %1341 = vmatpush1.bf16.msra.mxu1 (%p554_p0), %v1542_v18  ;;  %v930_v1 = vld [vmem:[%s2214_s1 + $0x370] sm:$0xff] (%p554_p0)  ;;  %v1566_v2 = vcombine.low (%p554_p0), %v921_v54, %v923_v55 }
 0x248   :  { %v1573_v11 = vcombine.high (%p554_p0), %v928_v0, %v930_v1  ;;  %v1572_v17 = vcombine.low (%p554_p0), %v928_v0, %v930_v1 }
 0x249   : > { %872 = vst [vmem:[#allocation3] sm:$0xf] %v871_v20  ;;  %v1547_v20 = vcombine.high (%p554_p0), %v901_v13, %v903_v14  ;;  %1302 = vmatpush1.bf16.msra.mxu0 (%p554_p0), %v1544_v19  ;;  %v931_v13 = vld [vmem:[%s2214_s1 + $0x378] sm:$0xff] (%p554_p0)  ;;  %v932_v14 = vld [vmem:[%s2214_s1 + $0x390] sm:$0xff] (%p554_p0) }
 0x24a   :  { %1303 = vmatprep.subr.bf16.mxu0 %v1549_v21  ;;  %v1575_v18 = vcombine.high %v929_v12, %v931_v13  ;;  %v1577_v19 = vcombine.high %v932_v14, %v934_v15  ;;  %v935_v21 = vld [vmem:[%s2214_s1 + $0x3b8] sm:$0xff]  ;;  %v1574_v24 = vcombine.low %v929_v12, %v931_v13  ;;  %v1576_v25 = vcombine.low %v932_v14, %v934_v15 }
 0x24b   :  { %1342 = vmatprep.subr.bf16.mxu1 %v1547_v20  ;;  %v933_v20 = vld [vmem:[%s2214_s1 + $0x398] sm:$0xff] }
 0x24c   :  { %1343 = vmatpush1.bf16.msra.mxu1 %v1546_v26  ;;  %v1579_v26 = vcombine.high %v933_v20, %v935_v21  ;;  %v1578_v30 = vcombine.low %v933_v20, %v935_v21 }
 0x24d   :  { %1304 = vmatpush1.bf16.msra.mxu0 %v1548_v27  ;;  %1344 = vmatprep.subr.bf16.mxu1 %v1551_v28  ;;  %v1581_v27 = vcombine.high %v936_v22, %v938_v23  ;;  %v937_v28 = vld [vmem:[%s2214_s1 + $0x3d8] sm:$0xff] }
 0x24e   :  { %1305 = vmatprep.subr.bf16.mxu0 %v1553_v29  ;;  %v939_v29 = vld [vmem:[%s2214_s1 + $0x3f8] sm:$0xff] }
 0x24f   :  { %v1583_v32 = vcombine.high %v937_v28, %v939_v29 }
 0x250   :  { %1345 = vmatpush1.bf16.msra.mxu1 %v1550_v34  ;;  %v1582_v34 = vcombine.low %v937_v28, %v939_v29 }
 0x251   :  { %1306 = vmatpush1.bf16.msra.mxu0 %v1552_v35  ;;  %1346 = vmatprep.subr.bf16.mxu1 %v1555_v36  ;;  %v1395_v35 = vld [vmem:[#allocation3] sm:$0xf]  ;;  %v940_v36 = vld [vmem:[%s2218_s3 + $0x4] sm:$0xf] }
 0x252   :  { %1307 = vmatprep.subr.bf16.mxu0 %v1557_v37  ;;  %1396 = vst [vmem:[%s2216_s4] sm:$0xf] %v1395_v35  ;;  %v945_v37 = vrot.slane %v940_v36, %v88_v6  ;;  %v949_v4 = vrot.slane %v940_v36, %v92_v9  ;;  %v957_v46 = vrot.slane %v940_v36, %v100_v10 }
 0x253   :  { %v953_v9 = vrot.slane %v940_v36, %v96_v8 }
 0x254   :  { %1347 = vmatpush1.bf16.msra.mxu1 %v1554_v42 }
 0x255   :  { %1308 = vmatpush1.bf16.msra.mxu0 %v1556_v43  ;;  %1348 = vmatprep.subr.bf16.mxu1 %v1559_v44 }
 0x256   :  { %1309 = vmatprep.subr.bf16.mxu0 %v1561_v45 }
 0x258   :  { %1349 = vmatpush1.bf16.msra.mxu1 %v1558_v50 }
 0x259   :  { %1310 = vmatpush1.bf16.msra.mxu0 %v1560_v51  ;;  %1350 = vmatprep.subr.bf16.mxu1 %v1563_v52 }
 0x25a   :  { %1311 = vmatprep.subr.bf16.mxu0 %v1565_v53 }
 0x25c   :  { %1351 = vmatpush1.bf16.msra.mxu1 %v1562_v58 }
 0x25d   :  { %1312 = vmatpush1.bf16.msra.mxu0 %v1564_v59  ;;  %1352 = vmatprep.subr.bf16.mxu1 %v1567_v60 }
 0x25e   :  { %1313 = vmatprep.subr.bf16.mxu0 %v1569_v61 }
 0x260   :  { %1353 = vmatpush1.bf16.msra.mxu1 %v1566_v2 }
 0x261   :  { %1314 = vmatpush1.bf16.msra.mxu0 %v1568_v3  ;;  %1354 = vmatprep.subr.bf16.mxu1 %v1571_v7 }
 0x262   :  { %1315 = vmatprep.subr.bf16.mxu0 %v1573_v11 }
 0x264   :  { %1355 = vmatpush1.bf16.msra.mxu1 %v1570_v16 }
 0x265   :  { %1316 = vmatpush1.bf16.msra.mxu0 %v1572_v17  ;;  %1356 = vmatprep.subr.bf16.mxu1 %v1575_v18 }
 0x266   :  { %1317 = vmatprep.subr.bf16.mxu0 %v1577_v19 }
 0x268   :  { %1357 = vmatpush1.bf16.msra.mxu1 %v1574_v24 }
 0x269   :  { %1318 = vmatpush1.bf16.msra.mxu0 %v1576_v25  ;;  %1358 = vmatprep.subr.bf16.mxu1 %v1579_v26 }
 0x26a   :  { %1319 = vmatprep.subr.bf16.mxu0 %v1581_v27 }
 0x26c   :  { %1359 = vmatpush1.bf16.msra.mxu1 %v1578_v30 }
 0x26d   :  { %1320 = vmatpush1.bf16.msra.mxu0 %v1580_v31  ;;  %1360 = vmatprep.subr.bf16.mxu1 %v1583_v32 }
 0x270   :  { %1322 = vmatmul.mubr.bf16.vlgmr.msra.gmra.mrb[0].mxu0 %v1518_v33  ;;  %1361 = vmatpush1.bf16.msra.mxu1 %v1582_v34 }
 0x273   :  { %1363 = vmatmul.mubr.bf16.vlgmr.msra.gmra.mrb[0].mxu1 %v1518_v33 }
 0x343   :  { %v1323_v38 = vpop.f32.mrb[0].mxu0 }
 0x344   :  { %v1324_v39 = vadd.f32 %v1323_v38, %v945_v37  ;;  %v1325_v40 = vpop.f32.mrb[1].mxu0 }
 0x345   :  { %v1326_v41 = vadd.f32 %v1325_v40, %v949_v4  ;;  %v1327_v42 = vpop.f32.mrb[2].mxu0 }
 0x346   :  { %v1584_v43 = vmul.f32 -1.442695, %v1324_v39  ;;  %v1328_v44 = vpop.f32.mrb[3].mxu0  ;;  %v1364_v45 = vpop.f32.mrb[0].mxu1 }
 0x347   :  { %v1585_v47 = vmul.f32 -1.442695, %v1326_v41  ;;  %v1366_v48 = vpop.f32.mrb[1].mxu1  ;;  %v1365_v52 = vadd.f32 %v1364_v45, %v953_v9 }
 0x348   :  { %1624 = vpow2.f32 %v1584_v43  ;;  %v1368_v49 = vpop.f32.mrb[2].mxu1  ;;  %v1367_v50 = vadd.f32 %v1366_v48, %v957_v46 }
 0x349   :  { %1626 = vpow2.f32 %v1585_v47  ;;  %v1369_v6 = vpop.f32.mrb[3].mxu1 }
 0x34a   :  { %v1586_v51 = vmul.f32 -1.442695, %v1367_v50 }
 0x34c   :  { %1628 = vpow2.f32 %v1586_v51 }
 0x34d   :  { %1630 = vtanh.f32 %v1365_v52 }
 0x352   :  { %v1625_v53 = vpop.eup %1624 }
 0x353   :  { %v1627_v54 = vpop.eup %1626  ;;  %v1374_v55 = vadd.f32 1.0, %v1625_v53 }
 0x354   :  { %v1380_v56 = vadd.f32 1.0, %v1627_v54 }
 0x355   :  { %1632 = vrcp.f32 %v1374_v55 }
 0x356   :  { %1634 = vrcp.f32 %v1380_v56  ;;  %v1629_v10 = vpop.eup %1628 }
 0x357   :  { %v1631_v57 = vpop.eup %1630  ;;  %v1387_v59 = vadd.f32 1.0, %v1629_v10 }
 0x359   :  { %1636 = vrcp.f32 %v1387_v59 }
 0x35f   :  { %v1633_v58 = vpop.eup %1632 }
 0x360   :  { %v1635_v60 = vpop.eup %1634  ;;  %v1391_v61 = vmul.f32 %v1633_v58, %v1631_v57 }
 0x361   :  { %v1390_v62 = vmul.f32 0.0, %v1635_v60 }
 0x363   :  { %v1392_v63 = vadd.f32 %v1391_v61, %v1390_v62  ;;  %v1637_v5 = vpop.eup %1636 }
 0x365   :  { %1638 = vtanh.f32 %v1392_v63 }
 0x36f   :  { %v1639_v8 = vpop.eup %1638 }
 0x370   :  { %v1394_v0 = vmul.f32 %v1639_v8, %v1637_v5 }
 0x372   :  { %v1397_v1 = vpack.c.bf16 %v1394_v0, %v1394_v0 }
 0x374   :  { %1398 = vst [vmem:[%s2216_s4 + $0x4] sm:$0xf] %v1397_v1 }

// kernel: cnn_lstm_forward.9
= control target key start
LH: loop header
LB: loop body
LE: loop exit
PB: predicated region body
PF: predicated region fallthrough
CT: control target
= control target key end

     0   :  { %s3334_s1 = inlined_call_operand.vmem [shape: bf16[256,1024], index: 1, kind: input, shape index: {}]   ;;  %s3335_s2 = inlined_call_operand.vmem [shape: bf16[256,1024], index: 2, kind: input, shape index: {}]   ;;  %s3336_s4 = inlined_call_operand.vmem [shape: bf16[2,8,256], index: 4, kind: output, shape index: {}]   ;;  %s3337_s0 = inlined_call_operand.vmem [shape: bf16[2,8,256], index: 0, kind: input, shape index: {}]   ;;  %s3338_s3 = inlined_call_operand.vmem [shape: f32[1,1024], index: 3, kind: input, shape index: {}]  }
   0x1   :  { %v20_v0 = vld [vmem:[%s3334_s1] sm:$0xff]  ;;  %v21_v2 = vld [vmem:[%s3334_s1 + $0x8] sm:$0xff] }
   0x2   :  { %v24_v1 = vld [vmem:[%s3334_s1 + $0x20] sm:$0xff]  ;;  %v25_v4 = vld [vmem:[%s3334_s1 + $0x28] sm:$0xff] }
   0x3   :  { %v2128_v3 = vcombine.high %v20_v0, %v24_v1  ;;  %v2127_v5 = vcombine.low %v20_v0, %v24_v1  ;;  %v28_v6 = vld [vmem:[%s3334_s1 + $0x40] sm:$0xff]  ;;  %v2130_v8 = vcombine.high %v21_v2, %v25_v4  ;;  %v2129_v9 = vcombine.low %v21_v2, %v25_v4  ;;  %v29_v11 = vld [vmem:[%s3334_s1 + $0x48] sm:$0xff] }
   0x4   :  { %v32_v7 = vld [vmem:[%s3334_s1 + $0x60] sm:$0xff]  ;;  %v33_v12 = vld [vmem:[%s3334_s1 + $0x68] sm:$0xff] }
   0x5   :  { %v2136_v10 = vcombine.high %v28_v6, %v32_v7  ;;  %v36_v13 = vld [vmem:[%s3334_s1 + $0x80] sm:$0xff]  ;;  %840 = vmatprep.subr.bf16.mxu0 %v2128_v3  ;;  %v2138_v14 = vcombine.high %v29_v11, %v33_v12  ;;  %v37_v16 = vld [vmem:[%s3334_s1 + $0x88] sm:$0xff]  ;;  %883 = vmatprep.subr.bf16.mxu1 %v2130_v8  ;;  %v2135_v18 = vcombine.low %v28_v6, %v32_v7 }
   0x6   :  { %v40_v15 = vld [vmem:[%s3334_s1 + $0xa0] sm:$0xff]  ;;  %v41_v17 = vld [vmem:[%s3334_s1 + $0xa8] sm:$0xff]  ;;  %841 = vmatpush1.bf16.msra.mxu0 %v2127_v5  ;;  %884 = vmatpush1.bf16.msra.mxu1 %v2129_v9  ;;  %v2137_v19 = vcombine.low %v29_v11, %v33_v12 }
   0x7   :  { %842 = vmatprep.subr.bf16.mxu0 %v2136_v10  ;;  %v2144_v20 = vcombine.high %v36_v13, %v40_v15  ;;  %885 = vmatprep.subr.bf16.mxu1 %v2138_v14  ;;  %v2146_v21 = vcombine.high %v37_v16, %v41_v17  ;;  %v44_v22 = vld [vmem:[%s3334_s1 + $0xc0] sm:$0xff]  ;;  %v45_v24 = vld [vmem:[%s3334_s1 + $0xc8] sm:$0xff]  ;;  %v2143_v26 = vcombine.low %v36_v13, %v40_v15 }
   0x8   :  { %v48_v23 = vld [vmem:[%s3334_s1 + $0xe0] sm:$0xff]  ;;  %v49_v25 = vld [vmem:[%s3334_s1 + $0xe8] sm:$0xff]  ;;  %v2145_v27 = vcombine.low %v37_v16, %v41_v17 }
   0x9   :  { %v2152_v28 = vcombine.high %v44_v22, %v48_v23  ;;  %v2154_v29 = vcombine.high %v45_v24, %v49_v25  ;;  %v52_v30 = vld [vmem:[%s3334_s1 + $0x100] sm:$0xff]  ;;  %v53_v32 = vld [vmem:[%s3334_s1 + $0x108] sm:$0xff]  ;;  %v2151_v34 = vcombine.low %v44_v22, %v48_v23  ;;  %v2153_v35 = vcombine.low %v45_v24, %v49_v25 }
   0xa   :  { %843 = vmatpush1.bf16.msra.mxu0 %v2135_v18  ;;  %886 = vmatpush1.bf16.msra.mxu1 %v2137_v19  ;;  %v56_v31 = vld [vmem:[%s3334_s1 + $0x120] sm:$0xff]  ;;  %v57_v33 = vld [vmem:[%s3334_s1 + $0x128] sm:$0xff] }
   0xb   :  { %844 = vmatprep.subr.bf16.mxu0 %v2144_v20  ;;  %887 = vmatprep.subr.bf16.mxu1 %v2146_v21  ;;  %v2160_v36 = vcombine.high %v52_v30, %v56_v31  ;;  %v2162_v37 = vcombine.high %v53_v32, %v57_v33  ;;  %v60_v38 = vld [vmem:[%s3334_s1 + $0x140] sm:$0xff]  ;;  %v61_v40 = vld [vmem:[%s3334_s1 + $0x148] sm:$0xff]  ;;  %v2159_v42 = vcombine.low %v52_v30, %v56_v31 }
   0xc   :  { %v64_v39 = vld [vmem:[%s3334_s1 + $0x160] sm:$0xff]  ;;  %v65_v41 = vld [vmem:[%s3334_s1 + $0x168] sm:$0xff]  ;;  %v2161_v43 = vcombine.low %v53_v32, %v57_v33 }
   0xd   :  { %v2168_v44 = vcombine.high %v60_v38, %v64_v39  ;;  %v2170_v45 = vcombine.high %v61_v40, %v65_v41  ;;  %v68_v46 = vld [vmem:[%s3334_s1 + $0x180] sm:$0xff]  ;;  %v69_v48 = vld [vmem:[%s3334_s1 + $0x188] sm:$0xff]  ;;  %v2167_v50 = vcombine.low %v60_v38, %v64_v39  ;;  %v2169_v51 = vcombine.low %v61_v40, %v65_v41 }
   0xe   :  { %845 = vmatpush1.bf16.msra.mxu0 %v2143_v26  ;;  %888 = vmatpush1.bf16.msra.mxu1 %v2145_v27  ;;  %v72_v47 = vld [vmem:[%s3334_s1 + $0x1a0] sm:$0xff]  ;;  %v73_v49 = vld [vmem:[%s3334_s1 + $0x1a8] sm:$0xff] }
   0xf   :  { %846 = vmatprep.subr.bf16.mxu0 %v2152_v28  ;;  %889 = vmatprep.subr.bf16.mxu1 %v2154_v29  ;;  %v2176_v52 = vcombine.high %v68_v46, %v72_v47  ;;  %v2178_v53 = vcombine.high %v69_v48, %v73_v49  ;;  %v76_v54 = vld [vmem:[%s3334_s1 + $0x1c0] sm:$0xff]  ;;  %v77_v57 = vld [vmem:[%s3334_s1 + $0x1c8] sm:$0xff]  ;;  %v2175_v59 = vcombine.low %v68_v46, %v72_v47 }
  0x10   :  { %v80_v55 = vld [vmem:[%s3334_s1 + $0x1e0] sm:$0xff]  ;;  %v81_v58 = vld [vmem:[%s3334_s1 + $0x1e8] sm:$0xff]  ;;  %v2177_v60 = vcombine.low %v69_v48, %v73_v49 }
  0x11   :  { %v2599_v56 = vld [vmem:[%s3337_s0 + $0x4] ss:$8 sps:$4 sm:$0xff]   ;;  %v2184_v61 = vcombine.high %v76_v54, %v80_v55  ;;  %v2186_v62 = vcombine.high %v77_v57, %v81_v58  ;;  %v2183_v3 = vcombine.low %v76_v54, %v80_v55  ;;  %v2185_v4 = vcombine.low %v77_v57, %v81_v58 }
  0x12   :  { %847 = vmatpush1.bf16.msra.mxu0 %v2151_v34  ;;  %890 = vmatpush1.bf16.msra.mxu1 %v2153_v35  ;;  %v84_v63 = vld [vmem:[%s3334_s1 + $0x200] sm:$0xff]  ;;  %v85_v1 = vld [vmem:[%s3334_s1 + $0x208] sm:$0xff] }
  0x13   :  { %848 = vmatprep.subr.bf16.mxu0 %v2160_v36  ;;  %891 = vmatprep.subr.bf16.mxu1 %v2162_v37  ;;  %v88_v0 = vld [vmem:[%s3334_s1 + $0x220] sm:$0xff]  ;;  %v89_v2 = vld [vmem:[%s3334_s1 + $0x228] sm:$0xff] }
  0x14   :  { %872 = vmatprep.mubr.bf16.mxu0 %v2599_v56  ;;  %915 = vmatprep.mubr.bf16.mxu1 %v2599_v56  ;;  %v2192_v5 = vcombine.high %v84_v63, %v88_v0  ;;  %v2194_v6 = vcombine.high %v85_v1, %v89_v2  ;;  %v92_v7 = vld [vmem:[%s3334_s1 + $0x240] sm:$0xff]  ;;  %v93_v9 = vld [vmem:[%s3334_s1 + $0x248] sm:$0xff]  ;;  %v2191_v11 = vcombine.low %v84_v63, %v88_v0  ;;  %v22_v0 = vld [vmem:[%s3334_s1 + $0x10] sm:$0xff] }
  0x15   :  { %v96_v8 = vld [vmem:[%s3334_s1 + $0x260] sm:$0xff]  ;;  %v97_v10 = vld [vmem:[%s3334_s1 + $0x268] sm:$0xff]  ;;  %v2193_v12 = vcombine.low %v85_v1, %v89_v2  ;;  %v26_v1 = vld [vmem:[%s3334_s1 + $0x30] sm:$0xff] }
  0x16   :  { %849 = vmatpush1.bf16.msra.mxu0 %v2159_v42  ;;  %892 = vmatpush1.bf16.msra.mxu1 %v2161_v43  ;;  %v2200_v13 = vcombine.high %v92_v7, %v96_v8  ;;  %v2202_v14 = vcombine.high %v93_v9, %v97_v10  ;;  %v100_v15 = vld [vmem:[%s3334_s1 + $0x280] sm:$0xff]  ;;  %v101_v17 = vld [vmem:[%s3334_s1 + $0x288] sm:$0xff]  ;;  %v2199_v19 = vcombine.low %v92_v7, %v96_v8  ;;  %v23_v2 = vld [vmem:[%s3334_s1 + $0x18] sm:$0xff] }
  0x17   :  { %850 = vmatprep.subr.bf16.mxu0 %v2168_v44  ;;  %893 = vmatprep.subr.bf16.mxu1 %v2170_v45  ;;  %v104_v16 = vld [vmem:[%s3334_s1 + $0x2a0] sm:$0xff]  ;;  %v105_v18 = vld [vmem:[%s3334_s1 + $0x2a8] sm:$0xff]  ;;  %v2201_v20 = vcombine.low %v93_v9, %v97_v10  ;;  %v30_v8 = vld [vmem:[%s3334_s1 + $0x50] sm:$0xff] }
  0x18   :  { %v2208_v21 = vcombine.high %v100_v15, %v104_v16  ;;  %v2210_v22 = vcombine.high %v101_v17, %v105_v18  ;;  %v108_v23 = vld [vmem:[%s3334_s1 + $0x2c0] sm:$0xff]  ;;  %v109_v25 = vld [vmem:[%s3334_s1 + $0x2c8] sm:$0xff]  ;;  %v2207_v27 = vcombine.low %v100_v15, %v104_v16  ;;  %v2209_v28 = vcombine.low %v101_v17, %v105_v18  ;;  %v34_v9 = vld [vmem:[%s3334_s1 + $0x70] sm:$0xff] }
  0x19   :  { %v112_v24 = vld [vmem:[%s3334_s1 + $0x2e0] sm:$0xff]  ;;  %v113_v26 = vld [vmem:[%s3334_s1 + $0x2e8] sm:$0xff]  ;;  %v2140_v15 = vcombine.high %v30_v8, %v34_v9  ;;  %v38_v17 = vld [vmem:[%s3334_s1 + $0x90] sm:$0xff] }
  0x1a   :  { %851 = vmatpush1.bf16.msra.mxu0 %v2167_v50  ;;  %894 = vmatpush1.bf16.msra.mxu1 %v2169_v51  ;;  %v2216_v29 = vcombine.high %v108_v23, %v112_v24  ;;  %v2218_v30 = vcombine.high %v109_v25, %v113_v26  ;;  %v116_v31 = vld [vmem:[%s3334_s1 + $0x300] sm:$0xff]  ;;  %v117_v33 = vld [vmem:[%s3334_s1 + $0x308] sm:$0xff]  ;;  %v2215_v35 = vcombine.low %v108_v23, %v112_v24  ;;  %v42_v18 = vld [vmem:[%s3334_s1 + $0xb0] sm:$0xff] }
  0x1b   :  { %852 = vmatprep.subr.bf16.mxu0 %v2176_v52  ;;  %895 = vmatprep.subr.bf16.mxu1 %v2178_v53  ;;  %v120_v32 = vld [vmem:[%s3334_s1 + $0x320] sm:$0xff]  ;;  %v121_v34 = vld [vmem:[%s3334_s1 + $0x328] sm:$0xff]  ;;  %v2217_v36 = vcombine.low %v109_v25, %v113_v26  ;;  %v2148_v23 = vcombine.high %v38_v17, %v42_v18  ;;  %v46_v25 = vld [vmem:[%s3334_s1 + $0xd0] sm:$0xff] }
  0x1c   :  { %v2224_v37 = vcombine.high %v116_v31, %v120_v32  ;;  %v2226_v38 = vcombine.high %v117_v33, %v121_v34  ;;  %v124_v39 = vld [vmem:[%s3334_s1 + $0x340] sm:$0xff]  ;;  %v125_v41 = vld [vmem:[%s3334_s1 + $0x348] sm:$0xff]  ;;  %v2223_v43 = vcombine.low %v116_v31, %v120_v32  ;;  %v2225_v44 = vcombine.low %v117_v33, %v121_v34  ;;  %v50_v26 = vld [vmem:[%s3334_s1 + $0xf0] sm:$0xff] }
  0x1d   :  { %v128_v40 = vld [vmem:[%s3334_s1 + $0x360] sm:$0xff]  ;;  %v129_v42 = vld [vmem:[%s3334_s1 + $0x368] sm:$0xff]  ;;  %v2156_v31 = vcombine.high %v46_v25, %v50_v26  ;;  %v54_v33 = vld [vmem:[%s3334_s1 + $0x110] sm:$0xff] }
  0x1e   :  { %853 = vmatpush1.bf16.msra.mxu0 %v2175_v59  ;;  %896 = vmatpush1.bf16.msra.mxu1 %v2177_v60  ;;  %v2232_v45 = vcombine.high %v124_v39, %v128_v40  ;;  %v2234_v46 = vcombine.high %v125_v41, %v129_v42  ;;  %v132_v47 = vld [vmem:[%s3334_s1 + $0x380] sm:$0xff]  ;;  %v133_v49 = vld [vmem:[%s3334_s1 + $0x388] sm:$0xff]  ;;  %v2231_v51 = vcombine.low %v124_v39, %v128_v40  ;;  %v58_v34 = vld [vmem:[%s3334_s1 + $0x130] sm:$0xff] }
  0x1f   :  { %854 = vmatprep.subr.bf16.mxu0 %v2184_v61  ;;  %897 = vmatprep.subr.bf16.mxu1 %v2186_v62  ;;  %v136_v48 = vld [vmem:[%s3334_s1 + $0x3a0] sm:$0xff]  ;;  %v137_v50 = vld [vmem:[%s3334_s1 + $0x3a8] sm:$0xff]  ;;  %v2233_v52 = vcombine.low %v125_v41, %v129_v42  ;;  %v62_v40 = vld [vmem:[%s3334_s1 + $0x150] sm:$0xff] }
  0x20   :  { %v2240_v53 = vcombine.high %v132_v47, %v136_v48  ;;  %v2242_v54 = vcombine.high %v133_v49, %v137_v50  ;;  %v140_v55 = vld [vmem:[%s3334_s1 + $0x3c0] sm:$0xff]  ;;  %v141_v58 = vld [vmem:[%s3334_s1 + $0x3c8] sm:$0xff]  ;;  %v2239_v60 = vcombine.low %v132_v47, %v136_v48  ;;  %v2241_v61 = vcombine.low %v133_v49, %v137_v50  ;;  %v66_v41 = vld [vmem:[%s3334_s1 + $0x170] sm:$0xff] }
  0x21   :  { %v144_v57 = vld [vmem:[%s3334_s1 + $0x3e0] sm:$0xff]  ;;  %v145_v59 = vld [vmem:[%s3334_s1 + $0x3e8] sm:$0xff]  ;;  %v63_v42 = vld [vmem:[%s3334_s1 + $0x158] sm:$0xff] }
  0x22   :  { %855 = vmatpush1.bf16.msra.mxu0 %v2183_v3  ;;  %898 = vmatpush1.bf16.msra.mxu1 %v2185_v4  ;;  %v2248_v62 = vcombine.high %v140_v55, %v144_v57  ;;  %v2250_v63 = vcombine.high %v141_v58, %v145_v59  ;;  %v27_v3 = vld [vmem:[%s3334_s1 + $0x38] sm:$0xff]  ;;  %v2247_v4 = vcombine.low %v140_v55, %v144_v57  ;;  %v2726_v10 = vld [vmem:[%s3337_s0] ss:$8 sps:$4 sm:$0xff]   ;;  %v70_v48 = vld [vmem:[%s3334_s1 + $0x190] sm:$0xff] }
  0x23   :  { %856 = vmatprep.subr.bf16.mxu0 %v2192_v5  ;;  %899 = vmatprep.subr.bf16.mxu1 %v2194_v6  ;;  %v2249_v5 = vcombine.low %v141_v58, %v145_v59  ;;  %v2132_v6 = vcombine.high %v22_v0, %v26_v1  ;;  %v2134_v7 = vcombine.high %v23_v2, %v27_v3  ;;  %v74_v49 = vld [vmem:[%s3334_s1 + $0x1b0] sm:$0xff]  ;;  %v71_v50 = vld [vmem:[%s3334_s1 + $0x198] sm:$0xff] }
  0x24   :  { %v78_v57 = vld [vmem:[%s3334_s1 + $0x1d0] sm:$0xff]  ;;  %v79_v59 = vld [vmem:[%s3334_s1 + $0x1d8] sm:$0xff] }
  0x25   :  { %v82_v58 = vld [vmem:[%s3334_s1 + $0x1f0] sm:$0xff] }
  0x26   :  { %857 = vmatpush1.bf16.msra.mxu0 %v2191_v11  ;;  %900 = vmatpush1.bf16.msra.mxu1 %v2193_v12  ;;  %v31_v11 = vld [vmem:[%s3334_s1 + $0x58] sm:$0xff] }
  0x27   :  { %858 = vmatprep.subr.bf16.mxu0 %v2200_v13  ;;  %901 = vmatprep.subr.bf16.mxu1 %v2202_v14  ;;  %v35_v12 = vld [vmem:[%s3334_s1 + $0x78] sm:$0xff]  ;;  %v2131_v13 = vcombine.low %v22_v0, %v26_v1  ;;  %v2133_v14 = vcombine.low %v23_v2, %v27_v3  ;;  %v86_v1 = vld [vmem:[%s3334_s1 + $0x210] sm:$0xff] }
  0x28   :  { %v2142_v16 = vcombine.high %v31_v11, %v35_v12  ;;  %v90_v2 = vld [vmem:[%s3334_s1 + $0x230] sm:$0xff]  ;;  %v87_v3 = vld [vmem:[%s3334_s1 + $0x218] sm:$0xff] }
  0x2a   :  { %859 = vmatpush1.bf16.msra.mxu0 %v2199_v19  ;;  %902 = vmatpush1.bf16.msra.mxu1 %v2201_v20  ;;  %v39_v19 = vld [vmem:[%s3334_s1 + $0x98] sm:$0xff] }
  0x2b   :  { %860 = vmatprep.subr.bf16.mxu0 %v2208_v21  ;;  %903 = vmatprep.subr.bf16.mxu1 %v2210_v22  ;;  %v43_v20 = vld [vmem:[%s3334_s1 + $0xb8] sm:$0xff]  ;;  %v2139_v21 = vcombine.low %v30_v8, %v34_v9  ;;  %v2141_v22 = vcombine.low %v31_v11, %v35_v12  ;;  %v94_v9 = vld [vmem:[%s3334_s1 + $0x250] sm:$0xff] }
  0x2c   :  { %v2150_v24 = vcombine.high %v39_v19, %v43_v20  ;;  %v98_v11 = vld [vmem:[%s3334_s1 + $0x270] sm:$0xff]  ;;  %v95_v12 = vld [vmem:[%s3334_s1 + $0x258] sm:$0xff] }
  0x2e   :  { %861 = vmatpush1.bf16.msra.mxu0 %v2207_v27  ;;  %904 = vmatpush1.bf16.msra.mxu1 %v2209_v28  ;;  %v47_v27 = vld [vmem:[%s3334_s1 + $0xd8] sm:$0xff] }
  0x2f   :  { %862 = vmatprep.subr.bf16.mxu0 %v2216_v29  ;;  %905 = vmatprep.subr.bf16.mxu1 %v2218_v30  ;;  %v51_v28 = vld [vmem:[%s3334_s1 + $0xf8] sm:$0xff]  ;;  %v2147_v29 = vcombine.low %v38_v17, %v42_v18  ;;  %v2149_v30 = vcombine.low %v39_v19, %v43_v20  ;;  %v102_v18 = vld [vmem:[%s3334_s1 + $0x290] sm:$0xff] }
  0x30   :  { %v2158_v32 = vcombine.high %v47_v27, %v51_v28  ;;  %v106_v19 = vld [vmem:[%s3334_s1 + $0x2b0] sm:$0xff]  ;;  %v103_v20 = vld [vmem:[%s3334_s1 + $0x298] sm:$0xff] }
  0x32   :  { %863 = vmatpush1.bf16.msra.mxu0 %v2215_v35  ;;  %906 = vmatpush1.bf16.msra.mxu1 %v2217_v36  ;;  %v59_v35 = vld [vmem:[%s3334_s1 + $0x138] sm:$0xff]  ;;  %v2155_v36 = vcombine.low %v46_v25, %v50_v26  ;;  %v110_v26 = vld [vmem:[%s3334_s1 + $0x2d0] sm:$0xff] }
  0x33   :  { %864 = vmatprep.subr.bf16.mxu0 %v2224_v37  ;;  %907 = vmatprep.subr.bf16.mxu1 %v2226_v38  ;;  %v2157_v37 = vcombine.low %v47_v27, %v51_v28  ;;  %v2164_v38 = vcombine.high %v54_v33, %v58_v34  ;;  %v114_v27 = vld [vmem:[%s3334_s1 + $0x2f0] sm:$0xff]  ;;  %v111_v28 = vld [vmem:[%s3334_s1 + $0x2d8] sm:$0xff] }
  0x36   :  { %865 = vmatpush1.bf16.msra.mxu0 %v2223_v43  ;;  %908 = vmatpush1.bf16.msra.mxu1 %v2225_v44  ;;  %v67_v43 = vld [vmem:[%s3334_s1 + $0x178] sm:$0xff]  ;;  %v2163_v44 = vcombine.low %v54_v33, %v58_v34  ;;  %v118_v34 = vld [vmem:[%s3334_s1 + $0x310] sm:$0xff] }
  0x37   :  { %866 = vmatprep.subr.bf16.mxu0 %v2232_v45  ;;  %909 = vmatprep.subr.bf16.mxu1 %v2234_v46  ;;  %v2172_v46 = vcombine.high %v62_v40, %v66_v41  ;;  %v2174_v47 = vcombine.high %v63_v42, %v67_v43 }
  0x3a   :  { %867 = vmatpush1.bf16.msra.mxu0 %v2231_v51  ;;  %910 = vmatpush1.bf16.msra.mxu1 %v2233_v52  ;;  %v75_v51 = vld [vmem:[%s3334_s1 + $0x1b8] sm:$0xff]  ;;  %v2171_v52 = vcombine.low %v62_v40, %v66_v41  ;;  %v126_v41 = vld [vmem:[%s3334_s1 + $0x350] sm:$0xff] }
  0x3b   :  { %868 = vmatprep.subr.bf16.mxu0 %v2240_v53  ;;  %911 = vmatprep.subr.bf16.mxu1 %v2242_v54  ;;  %v2173_v53 = vcombine.low %v63_v42, %v67_v43  ;;  %v2180_v54 = vcombine.high %v70_v48, %v74_v49  ;;  %v2182_v55 = vcombine.high %v71_v50, %v75_v51  ;;  %v130_v42 = vld [vmem:[%s3334_s1 + $0x370] sm:$0xff]  ;;  %v127_v43 = vld [vmem:[%s3334_s1 + $0x358] sm:$0xff] }
  0x3e   :  { %869 = vmatpush1.bf16.msra.mxu0 %v2239_v60  ;;  %912 = vmatpush1.bf16.msra.mxu1 %v2241_v61  ;;  %v83_v60 = vld [vmem:[%s3334_s1 + $0x1f8] sm:$0xff]  ;;  %v2179_v61 = vcombine.low %v70_v48, %v74_v49  ;;  %v134_v49 = vld [vmem:[%s3334_s1 + $0x390] sm:$0xff] }
  0x3f   :  { %870 = vmatprep.subr.bf16.mxu0 %v2248_v62  ;;  %913 = vmatprep.subr.bf16.mxu1 %v2250_v63  ;;  %v2181_v62 = vcombine.low %v71_v50, %v75_v51  ;;  %v2188_v63 = vcombine.high %v78_v57, %v82_v58  ;;  %v2190_v0 = vcombine.high %v79_v59, %v83_v60  ;;  %v138_v50 = vld [vmem:[%s3334_s1 + $0x3b0] sm:$0xff]  ;;  %v135_v51 = vld [vmem:[%s3334_s1 + $0x398] sm:$0xff] }
  0x42   :  { %871 = vmatpush1.bf16.msra.mxu0 %v2247_v4  ;;  %914 = vmatpush1.bf16.msra.mxu1 %v2249_v5  ;;  %v91_v4 = vld [vmem:[%s3334_s1 + $0x238] sm:$0xff]  ;;  %v2187_v5 = vcombine.low %v78_v57, %v82_v58  ;;  %v142_v58 = vld [vmem:[%s3334_s1 + $0x3d0] sm:$0xff] }
  0x43   :  { %926 = vmatprep.subr.bf16.mxu0 %v2132_v6  ;;  %969 = vmatprep.subr.bf16.mxu1 %v2134_v7  ;;  %v2189_v6 = vcombine.low %v79_v59, %v83_v60  ;;  %v2196_v7 = vcombine.high %v86_v1, %v90_v2  ;;  %v2198_v8 = vcombine.high %v87_v3, %v91_v4  ;;  %v146_v59 = vld [vmem:[%s3334_s1 + $0x3f0] sm:$0xff]  ;;  %v143_v60 = vld [vmem:[%s3334_s1 + $0x3d8] sm:$0xff] }
  0x45   :  { %873 = vmatmul.mubr.bf16.vlgmr.msra.gmra.mrb[0].mxu0 %v2726_v10  ;;  %916 = vmatmul.mubr.bf16.vlgmr.msra.gmra.mrb[0].mxu1 %v2726_v10 }
  0x46   :  { %927 = vmatpush1.bf16.msra.mxu0 %v2131_v13  ;;  %970 = vmatpush1.bf16.msra.mxu1 %v2133_v14  ;;  %v99_v13 = vld [vmem:[%s3334_s1 + $0x278] sm:$0xff]  ;;  %v2195_v14 = vcombine.low %v86_v1, %v90_v2  ;;  %v2251_v2 = vcombine.low %v142_v58, %v146_v59 }
  0x47   :  { %928 = vmatprep.subr.bf16.mxu0 %v2140_v15  ;;  %971 = vmatprep.subr.bf16.mxu1 %v2142_v16  ;;  %v2197_v15 = vcombine.low %v87_v3, %v91_v4  ;;  %v2204_v16 = vcombine.high %v94_v9, %v98_v11  ;;  %v2206_v17 = vcombine.high %v95_v12, %v99_v13  ;;  %v2479_v4 = vmov 0  }
  0x48   :  { %958 = vmatprep.mubr.bf16.mxu0 %v2599_v56  ;;  %1001 = vmatprep.mubr.bf16.mxu1 %v2599_v56  ;;  %v55_v56 = vld [vmem:[%s3334_s1 + $0x118] sm:$0xff]  ;;  %1068 = vst [vmem:[#allocation3] sm:$0xff] %v2479_v4 }
  0x49   :  { %v2166_v39 = vcombine.high %v55_v56, %v59_v35  ;;  %v2165_v45 = vcombine.low %v55_v56, %v59_v35  ;;  %v122_v56 = vld [vmem:[%s3334_s1 + $0x330] sm:$0xff]  ;;  %v119_v35 = vld [vmem:[%s3334_s1 + $0x318] sm:$0xff] }
  0x4a   :  { %929 = vmatpush1.bf16.msra.mxu0 %v2139_v21  ;;  %972 = vmatpush1.bf16.msra.mxu1 %v2141_v22  ;;  %v107_v21 = vld [vmem:[%s3334_s1 + $0x2b8] sm:$0xff]  ;;  %v2203_v22 = vcombine.low %v94_v9, %v98_v11  ;;  %v148_v9 = vld [vmem:[%s3338_s3] sm:$0xff]  ;;  %s2911_s3 = smov 0  }
  0x4b   :  { %930 = vmatprep.subr.bf16.mxu0 %v2148_v23  ;;  %973 = vmatprep.subr.bf16.mxu1 %v2150_v24  ;;  %v2205_v23 = vcombine.low %v95_v12, %v99_v13  ;;  %v2212_v24 = vcombine.high %v102_v18, %v106_v19  ;;  %v2214_v25 = vcombine.high %v103_v20, %v107_v21 }
  0x4e   :  { %931 = vmatpush1.bf16.msra.mxu0 %v2147_v29  ;;  %974 = vmatpush1.bf16.msra.mxu1 %v2149_v30  ;;  %v115_v29 = vld [vmem:[%s3334_s1 + $0x2f8] sm:$0xff]  ;;  %v2211_v30 = vcombine.low %v102_v18, %v106_v19 }
  0x4f   :  { %932 = vmatprep.subr.bf16.mxu0 %v2156_v31  ;;  %975 = vmatprep.subr.bf16.mxu1 %v2158_v32  ;;  %v2213_v31 = vcombine.low %v103_v20, %v107_v21  ;;  %v2220_v32 = vcombine.high %v110_v26, %v114_v27  ;;  %v2222_v33 = vcombine.high %v111_v28, %v115_v29 }
  0x52   :  { %933 = vmatpush1.bf16.msra.mxu0 %v2155_v36  ;;  %976 = vmatpush1.bf16.msra.mxu1 %v2157_v37  ;;  %v123_v36 = vld [vmem:[%s3334_s1 + $0x338] sm:$0xff]  ;;  %v2219_v37 = vcombine.low %v110_v26, %v114_v27 }
  0x53   :  { %934 = vmatprep.subr.bf16.mxu0 %v2164_v38  ;;  %977 = vmatprep.subr.bf16.mxu1 %v2166_v39  ;;  %v2221_v38 = vcombine.low %v111_v28, %v115_v29  ;;  %v2228_v39 = vcombine.high %v118_v34, %v122_v56  ;;  %v2230_v40 = vcombine.high %v119_v35, %v123_v36 }
  0x56   :  { %935 = vmatpush1.bf16.msra.mxu0 %v2163_v44  ;;  %978 = vmatpush1.bf16.msra.mxu1 %v2165_v45  ;;  %v131_v44 = vld [vmem:[%s3334_s1 + $0x378] sm:$0xff]  ;;  %v2227_v45 = vcombine.low %v118_v34, %v122_v56 }
  0x57   :  { %936 = vmatprep.subr.bf16.mxu0 %v2172_v46  ;;  %979 = vmatprep.subr.bf16.mxu1 %v2174_v47  ;;  %v2229_v46 = vcombine.low %v119_v35, %v123_v36  ;;  %v2236_v47 = vcombine.high %v126_v41, %v130_v42  ;;  %v2238_v48 = vcombine.high %v127_v43, %v131_v44 }
  0x5a   :  { %937 = vmatpush1.bf16.msra.mxu0 %v2171_v52  ;;  %980 = vmatpush1.bf16.msra.mxu1 %v2173_v53  ;;  %v139_v52 = vld [vmem:[%s3334_s1 + $0x3b8] sm:$0xff]  ;;  %v2235_v53 = vcombine.low %v126_v41, %v130_v42 }
  0x5b   :  { %938 = vmatprep.subr.bf16.mxu0 %v2180_v54  ;;  %981 = vmatprep.subr.bf16.mxu1 %v2182_v55  ;;  %v2237_v54 = vcombine.low %v127_v43, %v131_v44  ;;  %v2244_v55 = vcombine.high %v134_v49, %v138_v50  ;;  %v2246_v57 = vcombine.high %v135_v51, %v139_v52 }
  0x5e   :  { %939 = vmatpush1.bf16.msra.mxu0 %v2179_v61  ;;  %982 = vmatpush1.bf16.msra.mxu1 %v2181_v62  ;;  %v147_v61 = vld [vmem:[%s3334_s1 + $0x3f8] sm:$0xff]  ;;  %v2243_v62 = vcombine.low %v134_v49, %v138_v50 }
  0x5f   :  { %940 = vmatprep.subr.bf16.mxu0 %v2188_v63  ;;  %983 = vmatprep.subr.bf16.mxu1 %v2190_v0  ;;  %v2245_v63 = vcombine.low %v135_v51, %v139_v52  ;;  %v2252_v0 = vcombine.high %v142_v58, %v146_v59  ;;  %v2254_v1 = vcombine.high %v143_v60, %v147_v61 }
  0x60   :  { %v2253_v3 = vcombine.low %v143_v60, %v147_v61 }
  0x62   :  { %941 = vmatpush1.bf16.msra.mxu0 %v2187_v5  ;;  %984 = vmatpush1.bf16.msra.mxu1 %v2189_v6  ;;  %v2480_v5 = vmov 0.0   ;;  %v150_v6 = vlaneseq }
  0x63   :  { %942 = vmatprep.subr.bf16.mxu0 %v2196_v7  ;;  %985 = vmatprep.subr.bf16.mxu1 %v2198_v8  ;;  %1069 = vst [vmem:[#allocation4] sm:$0xff] %v2480_v5  ;;  %1070 = vst [vmem:[#allocation5] sm:$0xff] %v2480_v5 }
  0x64   :  { %v151_v7 = vshrl.u32 %v150_v6, 7 }
  0x66   :  { %943 = vmatpush1.bf16.msra.mxu0 %v2195_v14  ;;  %986 = vmatpush1.bf16.msra.mxu1 %v2197_v15  ;;  %v152_v8 = vsub.s32 0, %v151_v7  ;;  %v160_v11 = vsub.s32 2, %v151_v7  ;;  %v156_v12 = vsub.s32 1, %v151_v7  ;;  %v164_v13 = vsub.s32 3, %v151_v7 }
  0x67   :  { %944 = vmatprep.subr.bf16.mxu0 %v2204_v16  ;;  %987 = vmatprep.subr.bf16.mxu1 %v2206_v17  ;;  %v168_v36 = vsub.s32 4, %v151_v7 }
  0x68   :  { %v153_v14 = vrot.slane %v148_v9, %v152_v8  ;;  %v161_v15 = vrot.slane %v148_v9, %v160_v11  ;;  %v157_v16 = vrot.slane %v148_v9, %v156_v12  ;;  %v165_v17 = vrot.slane %v148_v9, %v164_v13 }
  0x6a   :  { %945 = vmatpush1.bf16.msra.mxu0 %v2203_v22  ;;  %988 = vmatpush1.bf16.msra.mxu1 %v2205_v23 }
  0x6b   :  { %946 = vmatprep.subr.bf16.mxu0 %v2212_v24  ;;  %989 = vmatprep.subr.bf16.mxu1 %v2214_v25 }
  0x6e   :  { %947 = vmatpush1.bf16.msra.mxu0 %v2211_v30  ;;  %990 = vmatpush1.bf16.msra.mxu1 %v2213_v31 }
  0x6f   :  { %948 = vmatprep.subr.bf16.mxu0 %v2220_v32  ;;  %991 = vmatprep.subr.bf16.mxu1 %v2222_v33 }
  0x72   :  { %949 = vmatpush1.bf16.msra.mxu0 %v2219_v37  ;;  %992 = vmatpush1.bf16.msra.mxu1 %v2221_v38  ;;  %v176_v37 = vsub.s32 6, %v151_v7  ;;  %v172_v38 = vsub.s32 5, %v151_v7 }
  0x73   :  { %950 = vmatprep.subr.bf16.mxu0 %v2228_v39  ;;  %993 = vmatprep.subr.bf16.mxu1 %v2230_v40  ;;  %v180_v39 = vsub.s32 7, %v151_v7  ;;  %v169_v40 = vrot.slane %v148_v9, %v168_v36 }
  0x74   :  { %v177_v41 = vrot.slane %v148_v9, %v176_v37  ;;  %v173_v42 = vrot.slane %v148_v9, %v172_v38 }
  0x75   :  { %v181_v43 = vrot.slane %v148_v9, %v180_v39 }
  0x76   :  { %951 = vmatpush1.bf16.msra.mxu0 %v2227_v45  ;;  %994 = vmatpush1.bf16.msra.mxu1 %v2229_v46 }
  0x77   :  { %952 = vmatprep.subr.bf16.mxu0 %v2236_v47  ;;  %995 = vmatprep.subr.bf16.mxu1 %v2238_v48 }
  0x7a   :  { %953 = vmatpush1.bf16.msra.mxu0 %v2235_v53  ;;  %996 = vmatpush1.bf16.msra.mxu1 %v2237_v54 }
  0x7b   :  { %954 = vmatprep.subr.bf16.mxu0 %v2244_v55  ;;  %997 = vmatprep.subr.bf16.mxu1 %v2246_v57 }
  0x7e   :  { %955 = vmatpush1.bf16.msra.mxu0 %v2243_v62  ;;  %998 = vmatpush1.bf16.msra.mxu1 %v2245_v63 }
  0x7f   :  { %956 = vmatprep.subr.bf16.mxu0 %v2252_v0  ;;  %999 = vmatprep.subr.bf16.mxu1 %v2254_v1 }
  0x82   :  { %957 = vmatpush1.bf16.msra.mxu0 %v2251_v2  ;;  %1000 = vmatpush1.bf16.msra.mxu1 %v2253_v3 }
  0x85   :  { %959 = vmatmul.mubr.bf16.vlgmr.msra.gmra.mrb[4].mxu0 %v2726_v10  ;;  %1002 = vmatmul.mubr.bf16.vlgmr.msra.gmra.mrb[4].mxu1 %v2726_v10 }
 0x118   :  { %v874_v10 = vpop.f32.mrb[0].mxu0  ;;  %v917_v19 = vpop.f32.mrb[0].mxu1 }
 0x119   :  { %v875_v18 = vadd.f32 %v874_v10, %v153_v14  ;;  %v876_v20 = vpop.f32.mrb[1].mxu0  ;;  %v918_v21 = vadd.f32 %v917_v19, %v161_v15  ;;  %v919_v23 = vpop.f32.mrb[1].mxu1 }
 0x11a   :  { %v877_v22 = vadd.f32 %v876_v20, %v157_v16  ;;  %v878_v24 = vpop.f32.mrb[2].mxu0  ;;  %v920_v25 = vadd.f32 %v919_v23, %v165_v17  ;;  %v921_v27 = vpop.f32.mrb[2].mxu1 }
 0x11b   :  { %v879_v26 = vadd.f32 %v878_v24, %v153_v14  ;;  %v880_v28 = vpop.f32.mrb[3].mxu0  ;;  %v922_v30 = vadd.f32 %v921_v27, %v161_v15  ;;  %v923_v32 = vpop.f32.mrb[3].mxu1 }
 0x11c   :  { %v2407_v29 = vpack.c.bf16 %v877_v22, %v875_v18  ;;  %v881_v31 = vadd.f32 %v880_v28, %v157_v16  ;;  %v2408_v33 = vpack.c.bf16 %v920_v25, %v918_v21  ;;  %v924_v34 = vadd.f32 %v923_v32, %v165_v17 }
 0x11e   :  { %1060 = vst [vmem:[#allocation2] sm:$0xff] %v2407_v29  ;;  %v2411_v56 = vpack.c.bf16 %v881_v31, %v879_v26  ;;  %1061 = vst [vmem:[#allocation2 + $0x8] sm:$0xff] %v2408_v33  ;;  %v2412_v35 = vpack.c.bf16 %v924_v34, %v922_v30 }
 0x120   :  { %1064 = vst [vmem:[#allocation2 + $0x20] sm:$0xff] %v2411_v56  ;;  %1065 = vst [vmem:[#allocation2 + $0x28] sm:$0xff] %v2412_v35 }
 0x158   :  { %v960_v44 = vpop.f32.mrb[4].mxu0  ;;  %v1003_v46 = vpop.f32.mrb[4].mxu1 }
 0x159   :  { %v961_v45 = vadd.f32 %v960_v44, %v169_v40  ;;  %v962_v47 = vpop.f32.mrb[5].mxu0  ;;  %v1004_v48 = vadd.f32 %v1003_v46, %v177_v41  ;;  %v1005_v50 = vpop.f32.mrb[5].mxu1 }
 0x15a   :  { %v963_v49 = vadd.f32 %v962_v47, %v173_v42  ;;  %v964_v51 = vpop.f32.mrb[6].mxu0  ;;  %v1006_v52 = vadd.f32 %v1005_v50, %v181_v43  ;;  %v1007_v54 = vpop.f32.mrb[6].mxu1 }
 0x15b   :  { %v965_v53 = vadd.f32 %v964_v51, %v169_v40  ;;  %v966_v55 = vpop.f32.mrb[7].mxu0  ;;  %v1008_v58 = vadd.f32 %v1007_v54, %v177_v41  ;;  %v1009_v60 = vpop.f32.mrb[7].mxu1 }
 0x15c   :  { %v2409_v57 = vpack.c.bf16 %v963_v49, %v961_v45  ;;  %v967_v59 = vadd.f32 %v966_v55, %v173_v42  ;;  %v2410_v61 = vpack.c.bf16 %v1006_v52, %v1004_v48  ;;  %v1010_v62 = vadd.f32 %v1009_v60, %v181_v43 }
 0x15e   :  { %1062 = vst [vmem:[#allocation2 + $0x10] sm:$0xff] %v2409_v57  ;;  %v2413_v63 = vpack.c.bf16 %v967_v59, %v965_v53  ;;  %1063 = vst [vmem:[#allocation2 + $0x18] sm:$0xff] %v2410_v61  ;;  %v2414_v0 = vpack.c.bf16 %v1010_v62, %v1008_v58 }
 0x160   :  { %1066 = vst [vmem:[#allocation2 + $0x30] sm:$0xff] %v2413_v63  ;;  %1067 = vst [vmem:[#allocation2 + $0x38] sm:$0xff] %v2414_v0 }
 0x161 LB: > { %v1097_v1 = vld [vmem:[%s3335_s2] sm:$0xff]  ;;  %v1098_v11 = vld [vmem:[%s3335_s2 + $0x8] sm:$0xff]  ;;  %s2415_s15 = sshll.u32 %s2477_s3, 5  ;;  %s2417_s17 = sshll.u32 %s2477_s3, 3  ;;  %s2477_s3 = sphi %s2911_s3, %s1076_s3  }
 0x162   : > { %v1101_v2 = vld [vmem:[%s3335_s2 + $0x20] sm:$0xff]  ;;  %v1102_v12 = vld [vmem:[%s3335_s2 + $0x28] sm:$0xff]  ;;  %s1080_s16 = scalar_lea.vmem [#allocation2], %s2415_s15  ;;  %s2102_s20 = scalar_lea.vmem %s3336_s4, %s2417_s17 }
 0x163   : > { %v1105_v3 = vld [vmem:[%s3335_s2 + $0x40] sm:$0xff]  ;;  %v2270_v4 = vcombine.high %v1097_v1, %v1101_v2  ;;  %v2269_v5 = vcombine.low %v1097_v1, %v1101_v2  ;;  %v2272_v14 = vcombine.high %v1098_v11, %v1102_v12  ;;  %v2271_v15 = vcombine.low %v1098_v11, %v1102_v12  ;;  %v1106_v16 = vld [vmem:[%s3335_s2 + $0x48] sm:$0xff]  ;;  %s1077_s21 = ssub.s32 1, %s2477_s3  ;;  %s1076_s3 = sadd.s32 1, %s2477_s3  }
 0x164   : > { %v1109_v6 = vld [vmem:[%s3335_s2 + $0x60] sm:$0xff]  ;;  %v1110_v17 = vld [vmem:[%s3335_s2 + $0x68] sm:$0xff]  ;;  %s2416_s22 = sshll.u32 %s1077_s21, 5  ;;  %s2418_s24 = sshll.u32 %s1077_s21, 3 }
 0x165   : > { %v2278_v7 = vcombine.high %v1105_v3, %v1109_v6  ;;  %v1113_v8 = vld [vmem:[%s3335_s2 + $0x80] sm:$0xff]  ;;  %1872 = vmatprep.subr.bf16.mxu0 %v2270_v4  ;;  %v2277_v13 = vcombine.low %v1105_v3, %v1109_v6  ;;  %v2280_v18 = vcombine.high %v1106_v16, %v1110_v17  ;;  %v1114_v19 = vld [vmem:[%s3335_s2 + $0x88] sm:$0xff]  ;;  %1913 = vmatprep.subr.bf16.mxu1 %v2272_v14  ;;  %s1089_s23 = scalar_lea.vmem [#allocation2], %s2416_s22  ;;  %s2106_s27 = scalar_lea.vmem %s3336_s4, %s2418_s24 }
 0x166   : > { %v1117_v9 = vld [vmem:[%s3335_s2 + $0xa0] sm:$0xff]  ;;  %1873 = vmatpush1.bf16.msra.mxu0 %v2269_v5  ;;  %v1118_v20 = vld [vmem:[%s3335_s2 + $0xa8] sm:$0xff]  ;;  %1914 = vmatpush1.bf16.msra.mxu1 %v2271_v15  ;;  %v2279_v23 = vcombine.low %v1106_v16, %v1110_v17  ;;  %p1073_p0 = scmp.ge.s32.totalorder %s1076_s3, 2  }
 0x167   : > { %1874 = vmatprep.subr.bf16.mxu0 %v2278_v7  ;;  %v2286_v10 = vcombine.high %v1113_v8, %v1117_v9  ;;  %v1121_v21 = vld [vmem:[%s3335_s2 + $0xc0] sm:$0xff]  ;;  %v2285_v24 = vcombine.low %v1113_v8, %v1117_v9  ;;  %1915 = vmatprep.subr.bf16.mxu1 %v2280_v18  ;;  %v2288_v25 = vcombine.high %v1114_v19, %v1118_v20  ;;  %v1122_v27 = vld [vmem:[%s3335_s2 + $0xc8] sm:$0xff] }
 0x168   : > { %v1125_v22 = vld [vmem:[%s3335_s2 + $0xe0] sm:$0xff]  ;;  %v1126_v28 = vld [vmem:[%s3335_s2 + $0xe8] sm:$0xff]  ;;  %v2287_v31 = vcombine.low %v1114_v19, %v1118_v20 }
 0x169   : > { %v2294_v26 = vcombine.high %v1121_v21, %v1125_v22  ;;  %v1129_v29 = vld [vmem:[%s3335_s2 + $0x100] sm:$0xff]  ;;  %v2293_v32 = vcombine.low %v1121_v21, %v1125_v22  ;;  %v2296_v33 = vcombine.high %v1122_v27, %v1126_v28  ;;  %v1130_v56 = vld [vmem:[%s3335_s2 + $0x108] sm:$0xff]  ;;  %v2295_v38 = vcombine.low %v1122_v27, %v1126_v28 }
 0x16a   : > { %1875 = vmatpush1.bf16.msra.mxu0 %v2277_v13  ;;  %v1133_v30 = vld [vmem:[%s3335_s2 + $0x120] sm:$0xff]  ;;  %1916 = vmatpush1.bf16.msra.mxu1 %v2279_v23  ;;  %v1134_v35 = vld [vmem:[%s3335_s2 + $0x128] sm:$0xff] }
 0x16b   : > { %1876 = vmatprep.subr.bf16.mxu0 %v2286_v10  ;;  %1917 = vmatprep.subr.bf16.mxu1 %v2288_v25  ;;  %v2302_v34 = vcombine.high %v1129_v29, %v1133_v30  ;;  %v1137_v36 = vld [vmem:[%s3335_s2 + $0x140] sm:$0xff]  ;;  %v2301_v39 = vcombine.low %v1129_v29, %v1133_v30  ;;  %v2304_v40 = vcombine.high %v1130_v56, %v1134_v35  ;;  %v1138_v42 = vld [vmem:[%s3335_s2 + $0x148] sm:$0xff] }
 0x16c   : > { %v1141_v37 = vld [vmem:[%s3335_s2 + $0x160] sm:$0xff]  ;;  %v1142_v43 = vld [vmem:[%s3335_s2 + $0x168] sm:$0xff]  ;;  %v2303_v46 = vcombine.low %v1130_v56, %v1134_v35 }
 0x16d   : > { %v2310_v41 = vcombine.high %v1137_v36, %v1141_v37  ;;  %v1145_v44 = vld [vmem:[%s3335_s2 + $0x180] sm:$0xff]  ;;  %v2309_v48 = vcombine.low %v1137_v36, %v1141_v37  ;;  %v2312_v49 = vcombine.high %v1138_v42, %v1142_v43  ;;  %v1146_v52 = vld [vmem:[%s3335_s2 + $0x188] sm:$0xff]  ;;  %v2311_v57 = vcombine.low %v1138_v42, %v1142_v43 }
 0x16e   : > { %1877 = vmatpush1.bf16.msra.mxu0 %v2285_v24  ;;  %1918 = vmatpush1.bf16.msra.mxu1 %v2287_v31  ;;  %v1149_v45 = vld [vmem:[%s3335_s2 + $0x1a0] sm:$0xff]  ;;  %v1150_v53 = vld [vmem:[%s3335_s2 + $0x1a8] sm:$0xff] }
 0x16f   : > { %1878 = vmatprep.subr.bf16.mxu0 %v2294_v26  ;;  %1919 = vmatprep.subr.bf16.mxu1 %v2296_v33  ;;  %v2994_v47 = vld [vmem:[#allocation3] sm:$0xff]  ;;  %v2318_v51 = vcombine.high %v1145_v44, %v1149_v45  ;;  %v2317_v58 = vcombine.low %v1145_v44, %v1149_v45  ;;  %v2320_v59 = vcombine.high %v1146_v52, %v1150_v53  ;;  %v1154_v61 = vld [vmem:[%s3335_s2 + $0x1c8] sm:$0xff] }
 0x170   : > { %v2998_v50 = vcombine.high %v2994_v47, %v2994_v47  ;;  %v1153_v54 = vld [vmem:[%s3335_s2 + $0x1c0] sm:$0xff]  ;;  %v1158_v62 = vld [vmem:[%s3335_s2 + $0x1e8] sm:$0xff]  ;;  %v2319_v1 = vcombine.low %v1146_v52, %v1150_v53 }
 0x171   : > { %v1157_v55 = vld [vmem:[%s3335_s2 + $0x1e0] sm:$0xff]  ;;  %v2328_v3 = vcombine.high %v1154_v61, %v1158_v62  ;;  %v1162_v5 = vld [vmem:[%s3335_s2 + $0x208] sm:$0xff]  ;;  %v2327_v9 = vcombine.low %v1154_v61, %v1158_v62 }
 0x172   : > { %1879 = vmatpush1.bf16.msra.mxu0 %v2293_v32  ;;  %1920 = vmatpush1.bf16.msra.mxu1 %v2295_v38  ;;  %v2326_v60 = vcombine.high %v1153_v54, %v1157_v55  ;;  %v1161_v63 = vld [vmem:[%s3335_s2 + $0x200] sm:$0xff]  ;;  %v2325_v2 = vcombine.low %v1153_v54, %v1157_v55  ;;  %v1166_v6 = vld [vmem:[%s3335_s2 + $0x228] sm:$0xff] }
 0x173   : > { %1880 = vmatprep.subr.bf16.mxu0 %v2302_v34  ;;  %1921 = vmatprep.subr.bf16.mxu1 %v2304_v40  ;;  %v1165_v0 = vld [vmem:[%s3335_s2 + $0x220] sm:$0xff]  ;;  %v2336_v12 = vcombine.high %v1162_v5, %v1166_v6  ;;  %v1170_v14 = vld [vmem:[%s3335_s2 + $0x248] sm:$0xff]  ;;  %v2335_v10 = vcombine.low %v1162_v5, %v1166_v6 }
 0x174   : > { %1904 = vmatprep.mubr.bf16.mxu0 %v2998_v50  ;;  %1945 = vmatprep.mubr.bf16.mxu1 %v2998_v50  ;;  %v2334_v4 = vcombine.high %v1161_v63, %v1165_v0  ;;  %v1169_v7 = vld [vmem:[%s3335_s2 + $0x240] sm:$0xff]  ;;  %v2333_v11 = vcombine.low %v1161_v63, %v1165_v0  ;;  %v1174_v15 = vld [vmem:[%s3335_s2 + $0x268] sm:$0xff] }
 0x175   : > { %v1173_v8 = vld [vmem:[%s3335_s2 + $0x260] sm:$0xff]  ;;  %v2344_v19 = vcombine.high %v1170_v14, %v1174_v15  ;;  %v1178_v21 = vld [vmem:[%s3335_s2 + $0x288] sm:$0xff]  ;;  %v2343_v25 = vcombine.low %v1170_v14, %v1174_v15 }
 0x176   : > { %1881 = vmatpush1.bf16.msra.mxu0 %v2301_v39  ;;  %1922 = vmatpush1.bf16.msra.mxu1 %v2303_v46  ;;  %v2342_v13 = vcombine.high %v1169_v7, %v1173_v8  ;;  %v1177_v16 = vld [vmem:[%s3335_s2 + $0x280] sm:$0xff]  ;;  %v2341_v18 = vcombine.low %v1169_v7, %v1173_v8  ;;  %v1182_v22 = vld [vmem:[%s3335_s2 + $0x2a8] sm:$0xff]  ;;  %v1100_v7 = vld [vmem:[%s3335_s2 + $0x18] sm:$0xff] }
 0x177   : > { %1882 = vmatprep.subr.bf16.mxu0 %v2310_v41  ;;  %1923 = vmatprep.subr.bf16.mxu1 %v2312_v49  ;;  %v1181_v17 = vld [vmem:[%s3335_s2 + $0x2a0] sm:$0xff]  ;;  %v2352_v27 = vcombine.high %v1178_v21, %v1182_v22  ;;  %v1186_v29 = vld [vmem:[%s3335_s2 + $0x2c8] sm:$0xff]  ;;  %v2351_v33 = vcombine.low %v1178_v21, %v1182_v22  ;;  %v1104_v8 = vld [vmem:[%s3335_s2 + $0x38] sm:$0xff] }
 0x178   : > { %v2350_v20 = vcombine.high %v1177_v16, %v1181_v17  ;;  %v1185_v23 = vld [vmem:[%s3335_s2 + $0x2c0] sm:$0xff]  ;;  %v2349_v26 = vcombine.low %v1177_v16, %v1181_v17  ;;  %v1190_v30 = vld [vmem:[%s3335_s2 + $0x2e8] sm:$0xff]  ;;  %v2276_v15 = vcombine.high %v1100_v7, %v1104_v8  ;;  %v1108_v17 = vld [vmem:[%s3335_s2 + $0x58] sm:$0xff] }
 0x179   : > { %v1189_v24 = vld [vmem:[%s3335_s2 + $0x2e0] sm:$0xff]  ;;  %v2360_v56 = vcombine.high %v1186_v29, %v1190_v30  ;;  %v1194_v36 = vld [vmem:[%s3335_s2 + $0x308] sm:$0xff]  ;;  %v2359_v40 = vcombine.low %v1186_v29, %v1190_v30 }
 0x17a   : > { %1883 = vmatpush1.bf16.msra.mxu0 %v2309_v48  ;;  %1924 = vmatpush1.bf16.msra.mxu1 %v2311_v57  ;;  %v2358_v28 = vcombine.high %v1185_v23, %v1189_v24  ;;  %v1193_v31 = vld [vmem:[%s3335_s2 + $0x300] sm:$0xff]  ;;  %v2357_v34 = vcombine.low %v1185_v23, %v1189_v24  ;;  %v1198_v37 = vld [vmem:[%s3335_s2 + $0x328] sm:$0xff]  ;;  %v1116_v23 = vld [vmem:[%s3335_s2 + $0x98] sm:$0xff] }
 0x17b   : > { %1884 = vmatprep.subr.bf16.mxu0 %v2318_v51  ;;  %1925 = vmatprep.subr.bf16.mxu1 %v2320_v59  ;;  %v1197_v32 = vld [vmem:[%s3335_s2 + $0x320] sm:$0xff]  ;;  %v2368_v42 = vcombine.high %v1194_v36, %v1198_v37  ;;  %v1202_v44 = vld [vmem:[%s3335_s2 + $0x348] sm:$0xff]  ;;  %v2367_v49 = vcombine.low %v1194_v36, %v1198_v37  ;;  %v1120_v24 = vld [vmem:[%s3335_s2 + $0xb8] sm:$0xff] }
 0x17c   : > { %v2366_v35 = vcombine.high %v1193_v31, %v1197_v32  ;;  %v1201_v38 = vld [vmem:[%s3335_s2 + $0x340] sm:$0xff]  ;;  %v2365_v41 = vcombine.low %v1193_v31, %v1197_v32  ;;  %v1206_v45 = vld [vmem:[%s3335_s2 + $0x368] sm:$0xff]  ;;  %v2292_v29 = vcombine.high %v1116_v23, %v1120_v24  ;;  %v1124_v31 = vld [vmem:[%s3335_s2 + $0xd8] sm:$0xff] }
 0x17d   : > { %v1205_v39 = vld [vmem:[%s3335_s2 + $0x360] sm:$0xff]  ;;  %v2376_v52 = vcombine.high %v1202_v44, %v1206_v45  ;;  %v1210_v54 = vld [vmem:[%s3335_s2 + $0x388] sm:$0xff]  ;;  %v2375_v59 = vcombine.low %v1202_v44, %v1206_v45  ;;  %v1128_v32 = vld [vmem:[%s3335_s2 + $0xf8] sm:$0xff] }
 0x17e   : > { %1885 = vmatpush1.bf16.msra.mxu0 %v2317_v58  ;;  %1926 = vmatpush1.bf16.msra.mxu1 %v2319_v1  ;;  %v2374_v43 = vcombine.high %v1201_v38, %v1205_v39  ;;  %v1209_v46 = vld [vmem:[%s3335_s2 + $0x380] sm:$0xff]  ;;  %v2373_v51 = vcombine.low %v1201_v38, %v1205_v39  ;;  %v1214_v55 = vld [vmem:[%s3335_s2 + $0x3a8] sm:$0xff]  ;;  %v1099_v1 = vld [vmem:[%s3335_s2 + $0x10] sm:$0xff] }
 0x17f   : > { %1886 = vmatprep.subr.bf16.mxu0 %v2326_v60  ;;  %1927 = vmatprep.subr.bf16.mxu1 %v2328_v3  ;;  %v1213_v48 = vld [vmem:[%s3335_s2 + $0x3a0] sm:$0xff]  ;;  %v2384_v61 = vcombine.high %v1210_v54, %v1214_v55  ;;  %v1218_v63 = vld [vmem:[%s3335_s2 + $0x3c8] sm:$0xff]  ;;  %v2383_v3 = vcombine.low %v1210_v54, %v1214_v55  ;;  %v1132_v37 = vld [vmem:[%s3335_s2 + $0x118] sm:$0xff] }
 0x180   : > { %v2382_v53 = vcombine.high %v1209_v46, %v1213_v48  ;;  %v1217_v57 = vld [vmem:[%s3335_s2 + $0x3c0] sm:$0xff]  ;;  %v2381_v60 = vcombine.low %v1209_v46, %v1213_v48  ;;  %v1222_v0 = vld [vmem:[%s3335_s2 + $0x3e8] sm:$0xff]  ;;  %v1136_v38 = vld [vmem:[%s3335_s2 + $0x138] sm:$0xff] }
 0x181   : > { %v1221_v58 = vld [vmem:[%s3335_s2 + $0x3e0] sm:$0xff]  ;;  %v2392_v5 = vcombine.high %v1218_v63, %v1222_v0  ;;  %v1139_v39 = vld [vmem:[%s3335_s2 + $0x150] sm:$0xff]  ;;  %v1140_v45 = vld [vmem:[%s3335_s2 + $0x158] sm:$0xff] }
 0x182   : > { %1887 = vmatpush1.bf16.msra.mxu0 %v2325_v2  ;;  %1928 = vmatpush1.bf16.msra.mxu1 %v2327_v9  ;;  %v2390_v62 = vcombine.high %v1217_v57, %v1221_v58  ;;  %v1103_v2 = vld [vmem:[%s3335_s2 + $0x30] sm:$0xff]  ;;  %v1144_v46 = vld [vmem:[%s3335_s2 + $0x178] sm:$0xff] }
 0x183   : > { %1888 = vmatprep.subr.bf16.mxu0 %v2334_v4  ;;  %1929 = vmatprep.subr.bf16.mxu1 %v2336_v12  ;;  %v2389_v4 = vcombine.low %v1217_v57, %v1221_v58  ;;  %v2274_v6 = vcombine.high %v1099_v1, %v1103_v2  ;;  %v1107_v9 = vld [vmem:[%s3335_s2 + $0x50] sm:$0xff]  ;;  %v3136_v12 = vcombine.low %v2994_v47, %v2994_v47  ;;  %v1148_v55 = vld [vmem:[%s3335_s2 + $0x198] sm:$0xff] }
 0x184   : > { %v2273_v14 = vcombine.low %v1099_v1, %v1103_v2  ;;  %v1115_v47 = vld [vmem:[%s3335_s2 + $0x90] sm:$0xff]  ;;  %v1152_v57 = vld [vmem:[%s3335_s2 + $0x1b8] sm:$0xff] }
 0x185   : > { %v1147_v48 = vld [vmem:[%s3335_s2 + $0x190] sm:$0xff]  ;;  %v1160_v1 = vld [vmem:[%s3335_s2 + $0x1f8] sm:$0xff] }
 0x186   : > { %1889 = vmatpush1.bf16.msra.mxu0 %v2333_v11  ;;  %1930 = vmatpush1.bf16.msra.mxu1 %v2335_v10  ;;  %v1111_v11 = vld [vmem:[%s3335_s2 + $0x70] sm:$0xff]  ;;  %v1112_v10 = vld [vmem:[%s3335_s2 + $0x78] sm:$0xff] }
 0x187   : > { %1890 = vmatprep.subr.bf16.mxu0 %v2342_v13  ;;  %1931 = vmatprep.subr.bf16.mxu1 %v2344_v19  ;;  %v2391_v13 = vcombine.low %v1218_v63, %v1222_v0  ;;  %v2282_v16 = vcombine.high %v1107_v9, %v1111_v11  ;;  %v2275_v19 = vcombine.low %v1100_v7, %v1104_v8  ;;  %v1155_v58 = vld [vmem:[%s3335_s2 + $0x1d0] sm:$0xff]  ;;  %v1156_v0 = vld [vmem:[%s3335_s2 + $0x1d8] sm:$0xff] }
 0x188   : > { %v2284_v21 = vcombine.high %v1108_v17, %v1112_v10  ;;  %v1163_v2 = vld [vmem:[%s3335_s2 + $0x210] sm:$0xff]  ;;  %v1164_v8 = vld [vmem:[%s3335_s2 + $0x218] sm:$0xff] }
 0x18a   : > { %1891 = vmatpush1.bf16.msra.mxu0 %v2341_v18  ;;  %1932 = vmatpush1.bf16.msra.mxu1 %v2343_v25  ;;  %v1119_v18 = vld [vmem:[%s3335_s2 + $0xb0] sm:$0xff] }
 0x18b   : > { %1892 = vmatprep.subr.bf16.mxu0 %v2350_v20  ;;  %1933 = vmatprep.subr.bf16.mxu1 %v2352_v27  ;;  %v2281_v20 = vcombine.low %v1107_v9, %v1111_v11  ;;  %v2290_v22 = vcombine.high %v1115_v47, %v1119_v18  ;;  %v1123_v25 = vld [vmem:[%s3335_s2 + $0xd0] sm:$0xff]  ;;  %v2283_v27 = vcombine.low %v1108_v17, %v1112_v10  ;;  %v1168_v9 = vld [vmem:[%s3335_s2 + $0x238] sm:$0xff] }
 0x18c   : > { %v1171_v11 = vld [vmem:[%s3335_s2 + $0x250] sm:$0xff]  ;;  %v1172_v10 = vld [vmem:[%s3335_s2 + $0x258] sm:$0xff] }
 0x18e   : > { %1893 = vmatpush1.bf16.msra.mxu0 %v2349_v26  ;;  %1934 = vmatpush1.bf16.msra.mxu1 %v2351_v33  ;;  %v1127_v26 = vld [vmem:[%s3335_s2 + $0xf0] sm:$0xff] }
 0x18f   : > { %1894 = vmatprep.subr.bf16.mxu0 %v2358_v28  ;;  %1935 = vmatprep.subr.bf16.mxu1 %v2360_v56  ;;  %v2289_v28 = vcombine.low %v1115_v47, %v1119_v18  ;;  %v2298_v30 = vcombine.high %v1123_v25, %v1127_v26  ;;  %v1131_v33 = vld [vmem:[%s3335_s2 + $0x110] sm:$0xff]  ;;  %v2297_v56 = vcombine.low %v1123_v25, %v1127_v26  ;;  %v1176_v47 = vld [vmem:[%s3335_s2 + $0x278] sm:$0xff] }
 0x190   : > { %v1179_v18 = vld [vmem:[%s3335_s2 + $0x290] sm:$0xff]  ;;  %v1184_v25 = vld [vmem:[%s3335_s2 + $0x2b8] sm:$0xff] }
 0x191   : > { %v1187_v26 = vld [vmem:[%s3335_s2 + $0x2d0] sm:$0xff] }
 0x192   : > { %1895 = vmatpush1.bf16.msra.mxu0 %v2357_v34  ;;  %1936 = vmatpush1.bf16.msra.mxu1 %v2359_v40  ;;  %v2291_v34 = vcombine.low %v1116_v23, %v1120_v24  ;;  %v1143_v40 = vld [vmem:[%s3335_s2 + $0x170] sm:$0xff]  ;;  %v1180_v24 = vld [vmem:[%s3335_s2 + $0x298] sm:$0xff] }
 0x193   : > { %1896 = vmatprep.subr.bf16.mxu0 %v2366_v35  ;;  %1937 = vmatprep.subr.bf16.mxu1 %v2368_v42  ;;  %v2300_v35 = vcombine.high %v1124_v31, %v1128_v32  ;;  %v2314_v44 = vcombine.high %v1139_v39, %v1143_v40 }
 0x196   : > { %1897 = vmatpush1.bf16.msra.mxu0 %v2365_v41  ;;  %1938 = vmatpush1.bf16.msra.mxu1 %v2367_v49  ;;  %v2299_v41 = vcombine.low %v1124_v31, %v1128_v32  ;;  %v1151_v49 = vld [vmem:[%s3335_s2 + $0x1b0] sm:$0xff]  ;;  %v1188_v32 = vld [vmem:[%s3335_s2 + $0x2d8] sm:$0xff] }
 0x197   : > { %1898 = vmatprep.subr.bf16.mxu0 %v2374_v43  ;;  %1939 = vmatprep.subr.bf16.mxu1 %v2376_v52  ;;  %v2308_v43 = vcombine.high %v1132_v37, %v1136_v38  ;;  %v2313_v52 = vcombine.low %v1139_v39, %v1143_v40  ;;  %v2322_v54 = vcombine.high %v1147_v48, %v1151_v49  ;;  %v1200_v39 = vld [vmem:[%s3335_s2 + $0x338] sm:$0xff]  ;;  %v1203_v40 = vld [vmem:[%s3335_s2 + $0x350] sm:$0xff] }
 0x19a   : > { %1899 = vmatpush1.bf16.msra.mxu0 %v2373_v51  ;;  %1940 = vmatpush1.bf16.msra.mxu1 %v2375_v59  ;;  %v2307_v51 = vcombine.low %v1132_v37, %v1136_v38  ;;  %v1159_v59 = vld [vmem:[%s3335_s2 + $0x1f0] sm:$0xff]  ;;  %v1196_v38 = vld [vmem:[%s3335_s2 + $0x318] sm:$0xff] }
 0x19b   : > { %1900 = vmatprep.subr.bf16.mxu0 %v2382_v53  ;;  %1941 = vmatprep.subr.bf16.mxu1 %v2384_v61  ;;  %v2316_v53 = vcombine.high %v1140_v45, %v1144_v46  ;;  %v2321_v61 = vcombine.low %v1147_v48, %v1151_v49  ;;  %v2330_v63 = vcombine.high %v1155_v58, %v1159_v59  ;;  %v1208_v48 = vld [vmem:[%s3335_s2 + $0x378] sm:$0xff]  ;;  %v1211_v49 = vld [vmem:[%s3335_s2 + $0x390] sm:$0xff] }
 0x19e   : > { %1901 = vmatpush1.bf16.msra.mxu0 %v2381_v60  ;;  %1942 = vmatpush1.bf16.msra.mxu1 %v2383_v3  ;;  %v2315_v60 = vcombine.low %v1140_v45, %v1144_v46  ;;  %v1167_v3 = vld [vmem:[%s3335_s2 + $0x230] sm:$0xff]  ;;  %v1204_v46 = vld [vmem:[%s3335_s2 + $0x358] sm:$0xff] }
 0x19f   : > { %1902 = vmatprep.subr.bf16.mxu0 %v2390_v62  ;;  %1943 = vmatprep.subr.bf16.mxu1 %v2392_v5  ;;  %v2324_v62 = vcombine.high %v1148_v55, %v1152_v57  ;;  %v2329_v5 = vcombine.low %v1155_v58, %v1159_v59  ;;  %v2338_v7 = vcombine.high %v1163_v2, %v1167_v3  ;;  %v1216_v58 = vld [vmem:[%s3335_s2 + $0x3b8] sm:$0xff]  ;;  %v1219_v59 = vld [vmem:[%s3335_s2 + $0x3d0] sm:$0xff] }
 0x1a2   : > { %1903 = vmatpush1.bf16.msra.mxu0 %v2389_v4  ;;  %1944 = vmatpush1.bf16.msra.mxu1 %v2391_v13  ;;  %v2323_v4 = vcombine.low %v1148_v55, %v1152_v57  ;;  %v1175_v13 = vld [vmem:[%s3335_s2 + $0x270] sm:$0xff]  ;;  %v1212_v57 = vld [vmem:[%s3335_s2 + $0x398] sm:$0xff] }
 0x1a3   : > { %1954 = vmatprep.subr.bf16.mxu0 %v2274_v6  ;;  %1995 = vmatprep.subr.bf16.mxu1 %v2276_v15  ;;  %v2332_v6 = vcombine.high %v1156_v0, %v1160_v1  ;;  %v2337_v15 = vcombine.low %v1163_v2, %v1167_v3  ;;  %v2346_v17 = vcombine.high %v1171_v11, %v1175_v13  ;;  %v1224_v2 = vld [vmem:[%s3335_s2 + $0x3f8] sm:$0xff] }
 0x1a4   : > { %v2387_v3 = vcombine.low %v1212_v57, %v1216_v58 }
 0x1a5   : > { %1905 = vmatmul.mubr.bf16.vlgmr.msra.gmra.mrb[0].mxu0 %v3136_v12  ;;  %1946 = vmatmul.mubr.bf16.vlgmr.msra.gmra.mrb[0].mxu1 %v3136_v12 }
 0x1a6   : > { %1955 = vmatpush1.bf16.msra.mxu0 %v2273_v14  ;;  %1986 = vmatprep.mubr.bf16.mxu0 %v2998_v50  ;;  %v2331_v14 = vcombine.low %v1156_v0, %v1160_v1  ;;  %v1220_v1 = vld [vmem:[%s3335_s2 + $0x3d8] sm:$0xff] }
 0x1a7   : > { %1956 = vmatprep.subr.bf16.mxu0 %v2282_v16  ;;  %1996 = vmatpush1.bf16.msra.mxu1 %v2275_v19  ;;  %v2340_v16 = vcombine.high %v1164_v8, %v1168_v9  ;;  %v1183_v19 = vld [vmem:[%s3335_s2 + $0x2b0] sm:$0xff] }
 0x1a8   : > { %2027 = vmatprep.mubr.bf16.mxu1 %v2998_v50  ;;  %1997 = vmatprep.subr.bf16.mxu1 %v2284_v21  ;;  %v1135_v50 = vld [vmem:[%s3335_s2 + $0x130] sm:$0xff]  ;;  %v2345_v21 = vcombine.low %v1171_v11, %v1175_v13  ;;  %v2354_v23 = vcombine.high %v1179_v18, %v1183_v19  ;;  %v1082_v13 = vld [vmem:[%s1080_s16 + $0x8] sm:$0xff] }
 0x1a9   : > { %v2306_v36 = vcombine.high %v1131_v33, %v1135_v50  ;;  %v2305_v42 = vcombine.low %v1131_v33, %v1135_v50  ;;  %v1192_v33 = vld [vmem:[%s3335_s2 + $0x2f8] sm:$0xff]  ;;  %v1195_v50 = vld [vmem:[%s3335_s2 + $0x310] sm:$0xff] }
 0x1aa   : > { %1957 = vmatpush1.bf16.msra.mxu0 %v2281_v20  ;;  %v2339_v20 = vcombine.low %v1164_v8, %v1168_v9 }
 0x1ab   : > { %1958 = vmatprep.subr.bf16.mxu0 %v2290_v22  ;;  %1998 = vmatpush1.bf16.msra.mxu1 %v2283_v27  ;;  %v2348_v22 = vcombine.high %v1172_v10, %v1176_v47  ;;  %v1191_v27 = vld [vmem:[%s3335_s2 + $0x2f0] sm:$0xff] }
 0x1ac   : > { %1999 = vmatprep.subr.bf16.mxu1 %v2292_v29  ;;  %v2353_v29 = vcombine.low %v1179_v18, %v1183_v19  ;;  %v2362_v31 = vcombine.high %v1187_v26, %v1191_v27  ;;  %v1086_v19 = vunpack.c.h.bf16 %v1082_v13 }
 0x1ae   : > { %1959 = vmatpush1.bf16.msra.mxu0 %v2289_v28  ;;  %v2347_v28 = vcombine.low %v1172_v10, %v1176_v47 }
 0x1af   : > { %1960 = vmatprep.subr.bf16.mxu0 %v2298_v30  ;;  %2000 = vmatpush1.bf16.msra.mxu1 %v2291_v34  ;;  %v2356_v30 = vcombine.high %v1180_v24, %v1184_v25  ;;  %v1199_v34 = vld [vmem:[%s3335_s2 + $0x330] sm:$0xff] }
 0x1b0   : > { %2001 = vmatprep.subr.bf16.mxu1 %v2300_v35  ;;  %v2361_v35 = vcombine.low %v1187_v26, %v1191_v27  ;;  %v2370_v37 = vcombine.high %v1195_v50, %v1199_v34 }
 0x1b2   : > { %1961 = vmatpush1.bf16.msra.mxu0 %v2297_v56  ;;  %v2355_v56 = vcombine.low %v1180_v24, %v1184_v25  ;;  %v1085_v24 = vunpack.c.l.bf16 %v1082_v13 }
 0x1b3   : > { %1962 = vmatprep.subr.bf16.mxu0 %v2306_v36  ;;  %2002 = vmatpush1.bf16.msra.mxu1 %v2299_v41  ;;  %v2364_v36 = vcombine.high %v1188_v32, %v1192_v33  ;;  %v1207_v41 = vld [vmem:[%s3335_s2 + $0x370] sm:$0xff] }
 0x1b4   : > { %2003 = vmatprep.subr.bf16.mxu1 %v2308_v43  ;;  %v2369_v43 = vcombine.low %v1195_v50, %v1199_v34  ;;  %v2378_v45 = vcombine.high %v1203_v40, %v1207_v41 }
 0x1b6   : > { %1963 = vmatpush1.bf16.msra.mxu0 %v2305_v42  ;;  %v2363_v42 = vcombine.low %v1188_v32, %v1192_v33  ;;  %v2044_v33 = vld [vmem:[#allocation4] sm:$0xff] }
 0x1b7   : > { %1964 = vmatprep.subr.bf16.mxu0 %v2314_v44  ;;  %2004 = vmatpush1.bf16.msra.mxu1 %v2307_v51  ;;  %v2372_v44 = vcombine.high %v1196_v38, %v1200_v39  ;;  %v1215_v51 = vld [vmem:[%s3335_s2 + $0x3b0] sm:$0xff] }
 0x1b8   : > { %2005 = vmatprep.subr.bf16.mxu1 %v2316_v53  ;;  %v2377_v53 = vcombine.low %v1203_v40, %v1207_v41  ;;  %v2386_v55 = vcombine.high %v1211_v49, %v1215_v51 }
 0x1ba   : > { %1965 = vmatpush1.bf16.msra.mxu0 %v2313_v52  ;;  %v2371_v52 = vcombine.low %v1196_v38, %v1200_v39 }
 0x1bb   : > { %1966 = vmatprep.subr.bf16.mxu0 %v2322_v54  ;;  %2006 = vmatpush1.bf16.msra.mxu1 %v2315_v60  ;;  %v2380_v54 = vcombine.high %v1204_v46, %v1208_v48  ;;  %v1223_v60 = vld [vmem:[%s3335_s2 + $0x3f0] sm:$0xff] }
 0x1bc   : > { %2007 = vmatprep.subr.bf16.mxu1 %v2324_v62  ;;  %v2385_v62 = vcombine.low %v1211_v49, %v1215_v51  ;;  %v2394_v0 = vcombine.high %v1219_v59, %v1223_v60 }
 0x1be   : > { %1967 = vmatpush1.bf16.msra.mxu0 %v2321_v61  ;;  %v2379_v61 = vcombine.low %v1204_v46, %v1208_v48  ;;  %v1091_v46 = vld [vmem:[%s1089_s23 + $0x18] sm:$0xff] }
 0x1bf   : > { %1968 = vmatprep.subr.bf16.mxu0 %v2330_v63  ;;  %2008 = vmatpush1.bf16.msra.mxu1 %v2323_v4  ;;  %v2388_v63 = vcombine.high %v1212_v57, %v1216_v58  ;;  %v2393_v4 = vcombine.low %v1219_v59, %v1223_v60  ;;  %v1095_v57 = vunpack.c.h.bf16 %v1091_v46 }
 0x1c0   : > { %2009 = vmatprep.subr.bf16.mxu1 %v2332_v6  ;;  %v2395_v6 = vcombine.low %v1220_v1, %v1224_v2 }
 0x1c2   : > { %1969 = vmatpush1.bf16.msra.mxu0 %v2329_v5  ;;  %v2396_v5 = vcombine.high %v1220_v1, %v1224_v2 }
 0x1c3   : > { %1970 = vmatprep.subr.bf16.mxu0 %v2338_v7  ;;  %2010 = vmatpush1.bf16.msra.mxu1 %v2331_v14  ;;  %v1081_v7 = vld [vmem:[%s1080_s16] sm:$0xff] }
 0x1c4   : > { %2011 = vmatprep.subr.bf16.mxu1 %v2340_v16  ;;  %v1083_v8 = vunpack.c.l.bf16 %v1081_v7  ;;  %v1084_v9 = vunpack.c.h.bf16 %v1081_v7 }
 0x1c6   : > { %1971 = vmatpush1.bf16.msra.mxu0 %v2337_v15 }
 0x1c7   : > { %1972 = vmatprep.subr.bf16.mxu0 %v2346_v17  ;;  %2012 = vmatpush1.bf16.msra.mxu1 %v2339_v20 }
 0x1c8   : > { %2013 = vmatprep.subr.bf16.mxu1 %v2348_v22 }
 0x1ca   : > { %1973 = vmatpush1.bf16.msra.mxu0 %v2345_v21 }
 0x1cb   : > { %1974 = vmatprep.subr.bf16.mxu0 %v2354_v23  ;;  %2014 = vmatpush1.bf16.msra.mxu1 %v2347_v28 }
 0x1cc   : > { %2015 = vmatprep.subr.bf16.mxu1 %v2356_v30 }
 0x1ce   : > { %1975 = vmatpush1.bf16.msra.mxu0 %v2353_v29 }
 0x1cf   : > { %1976 = vmatprep.subr.bf16.mxu0 %v2362_v31  ;;  %2016 = vmatpush1.bf16.msra.mxu1 %v2355_v56 }
 0x1d0   : > { %2017 = vmatprep.subr.bf16.mxu1 %v2364_v36 }
 0x1d2   : > { %1977 = vmatpush1.bf16.msra.mxu0 %v2361_v35 }
 0x1d3   : > { %1978 = vmatprep.subr.bf16.mxu0 %v2370_v37  ;;  %2018 = vmatpush1.bf16.msra.mxu1 %v2363_v42  ;;  %v1090_v42 = vld [vmem:[%s1089_s23 + $0x10] sm:$0xff] }
 0x1d4   : > { %2019 = vmatprep.subr.bf16.mxu1 %v2372_v44  ;;  %v1093_v44 = vunpack.c.h.bf16 %v1090_v42 }
 0x1d6   : > { %1979 = vmatpush1.bf16.msra.mxu0 %v2369_v43  ;;  %v1092_v43 = vunpack.c.l.bf16 %v1090_v42 }
 0x1d7   : > { %1980 = vmatprep.subr.bf16.mxu0 %v2378_v45  ;;  %2020 = vmatpush1.bf16.msra.mxu1 %v2371_v52 }
 0x1d8   : > { %2021 = vmatprep.subr.bf16.mxu1 %v2380_v54 }
 0x1da   : > { %1981 = vmatpush1.bf16.msra.mxu0 %v2377_v53 }
 0x1db   : > { %1982 = vmatprep.subr.bf16.mxu0 %v2386_v55  ;;  %2022 = vmatpush1.bf16.msra.mxu1 %v2379_v61 }
 0x1dc   : > { %2023 = vmatprep.subr.bf16.mxu1 %v2388_v63  ;;  %v1094_v63 = vunpack.c.l.bf16 %v1091_v46 }
 0x1de   : > { %1983 = vmatpush1.bf16.msra.mxu0 %v2385_v62 }
 0x1df   : > { %1984 = vmatprep.subr.bf16.mxu0 %v2394_v0  ;;  %2024 = vmatpush1.bf16.msra.mxu1 %v2387_v3 }
 0x1e0   : > { %2025 = vmatprep.subr.bf16.mxu1 %v2396_v5 }
 0x1e2   : > { %1985 = vmatpush1.bf16.msra.mxu0 %v2393_v4 }
 0x1e3   : > { %2026 = vmatpush1.bf16.msra.mxu1 %v2395_v6 }
 0x1e5   : > { %1987 = vmatmul.mubr.bf16.vlgmr.msra.gmra.mrb[4].mxu0 %v3136_v12 }
 0x1e6   : > { %2028 = vmatmul.mubr.bf16.vlgmr.msra.gmra.mrb[4].mxu1 %v3136_v12 }
 0x278   : > { %v1906_v11 = vpop.f32.mrb[0].mxu0  ;;  %v1947_v18 = vpop.f32.mrb[0].mxu1 }
 0x279   : > { %v2036_v14 = vadd.f32 %v1906_v11, %v1083_v8  ;;  %v1908_v15 = vpop.f32.mrb[1].mxu0  ;;  %v1949_v21 = vpop.f32.mrb[1].mxu1  ;;  %v2038_v26 = vadd.f32 %v1947_v18, %v1085_v24  ;;  %v2069_v8 = vld [vmem:[#allocation5] sm:$0xff] }
 0x27a   : > { %v2037_v16 = vadd.f32 %v1908_v15, %v1084_v9  ;;  %v1910_v17 = vpop.f32.mrb[2].mxu0  ;;  %v1951_v22 = vpop.f32.mrb[2].mxu1  ;;  %v2039_v23 = vadd.f32 %v1949_v21, %v1086_v19 }
 0x27b   : > { %v2397_v10 = vmul.f32 -1.442695, %v2036_v14  ;;  %v1911_v47 = vpop.f32.mrb[3].mxu0  ;;  %v1952_v12 = vpop.f32.mrb[3].mxu1 }
 0x27c   : > { %v2398_v20 = vmul.f32 -1.442695, %v2037_v16  ;;  %v2399_v25 = vmul.f32 -1.442695, %v2039_v23 }
 0x27d   : > { %2439 = vpow2.f32 %v2397_v10 }
 0x27e   : > { %2441 = vpow2.f32 %v2398_v20 }
 0x27f   : > { %2443 = vpow2.f32 %v2399_v25 }
 0x280   : > { %2445 = vtanh.f32 %v2038_v26 }
 0x287   : > { %v2440_v27 = vpop.eup %2439 }
 0x288   : > { %v2442_v28 = vpop.eup %2441  ;;  %v2048_v29 = vadd.f32 1.0, %v2440_v27 }
 0x289   : > { %v2054_v30 = vadd.f32 1.0, %v2442_v28  ;;  %v2444_v31 = vpop.eup %2443 }
 0x28a   : > { %2447 = vrcp.f32 %v2048_v29  ;;  %v2446_v32 = vpop.eup %2445  ;;  %v2061_v34 = vadd.f32 1.0, %v2444_v31 }
 0x28b   : > { %2449 = vrcp.f32 %v2054_v30 }
 0x28c   : > { %2451 = vrcp.f32 %v2061_v34 }
 0x294   : > { %v2448_v50 = vpop.eup %2447 }
 0x295   : > { %v2450_v56 = vpop.eup %2449  ;;  %v2065_v35 = vmul.f32 %v2448_v50, %v2446_v32 }
 0x296   : > { %v2064_v36 = vmul.f32 %v2450_v56, %v2044_v33  ;;  %v2452_v38 = vpop.eup %2451 }
 0x298   : > { %v2066_v37 = vadd.f32 %v2065_v35, %v2064_v36 }
 0x29a   : > { %2453 = vtanh.f32 %v2066_v37  ;;  %2094 = vst [vmem:[#allocation4] sm:$0xff] %v2066_v37 }
 0x2a4   : > { %v2454_v39 = vpop.eup %2453 }
 0x2a5   : > { %v2068_v40 = vmul.f32 %v2454_v39, %v2452_v38 }
 0x2a7   : > { %v2096_v41 = vpack.c.bf16 %v2068_v40, %v2068_v40 }
 0x2a9   : > { %2103 = vst [vmem:[%s2102_s20] sm:$0xf] %v2096_v41 }
 0x2b8   : > { %v1988_v45 = vpop.f32.mrb[4].mxu0 }
 0x2b9   : > { %v2040_v48 = vadd.f32 %v1988_v45, %v1092_v43  ;;  %v1990_v49 = vpop.f32.mrb[5].mxu0  ;;  %v2029_v55 = vpop.f32.mrb[4].mxu1 }
 0x2ba   : > { %v2041_v51 = vadd.f32 %v1990_v49, %v1093_v44  ;;  %v1992_v52 = vpop.f32.mrb[6].mxu0  ;;  %v2031_v59 = vpop.f32.mrb[5].mxu1  ;;  %v2042_v1 = vadd.f32 %v2029_v55, %v1094_v63 }
 0x2bb   : > { %v2400_v53 = vmul.f32 -1.442695, %v2040_v48  ;;  %v1993_v54 = vpop.f32.mrb[7].mxu0  ;;  %v2033_v60 = vpop.f32.mrb[6].mxu1  ;;  %v2043_v62 = vadd.f32 %v2031_v59, %v1095_v57 }
 0x2bc   : > { %v2401_v58 = vmul.f32 -1.442695, %v2041_v51  ;;  %v2034_v61 = vpop.f32.mrb[7].mxu1 }
 0x2bd   : > { %2455 = vpow2.f32 %v2400_v53  ;;  %v2402_v0 = vmul.f32 -1.442695, %v2043_v62 }
 0x2be   : > { %2457 = vpow2.f32 %v2401_v58 }
 0x2bf   : > { %2459 = vpow2.f32 %v2402_v0 }
 0x2c0   : > { %2461 = vtanh.f32 %v2042_v1 }
 0x2c7   : > { %v2456_v2 = vpop.eup %2455 }
 0x2c8   : > { %v2458_v3 = vpop.eup %2457  ;;  %v2073_v4 = vadd.f32 1.0, %v2456_v2 }
 0x2c9   : > { %v2079_v5 = vadd.f32 1.0, %v2458_v3  ;;  %v2460_v6 = vpop.eup %2459 }
 0x2ca   : > { %2463 = vrcp.f32 %v2073_v4  ;;  %v2462_v7 = vpop.eup %2461  ;;  %v2086_v11 = vadd.f32 1.0, %v2460_v6 }
 0x2cb   : > { %2465 = vrcp.f32 %v2079_v5 }
 0x2cc   : > { %2467 = vrcp.f32 %v2086_v11 }
 0x2d4   : > { %v2464_v9 = vpop.eup %2463 }
 0x2d5   : > { %v2466_v13 = vpop.eup %2465  ;;  %v2090_v14 = vmul.f32 %v2464_v9, %v2462_v7 }
 0x2d6   : > { %v2089_v15 = vmul.f32 %v2466_v13, %v2069_v8  ;;  %v2468_v17 = vpop.eup %2467 }
 0x2d8   : > { %v2091_v16 = vadd.f32 %v2090_v14, %v2089_v15 }
 0x2da   : > { %2469 = vtanh.f32 %v2091_v16  ;;  %2095 = vst [vmem:[#allocation5] sm:$0xff] %v2091_v16 }
 0x2e3   :  { %1075 = sbr.rel (!%p1073_p0) target bundleno = 353 (0x161), region = 47 }
 0x2e4   : > { %v2470_v10 = vpop.eup %2469 }
 0x2e5   : > { %v2093_v47 = vmul.f32 %v2470_v10, %v2468_v17 }
 0x2e7   : > { %v2097_v18 = vpack.c.bf16 %v2093_v47, %v2093_v47  ;;  %v2422_v19 = vpack.c.bf16 %v2093_v47, %v2068_v40 }
 0x2e9   : > { %2423 = vst [vmem:[#allocation3] sm:$0xff] %v2422_v19   ;;  %2107 = vst [vmem:[%s2106_s27 + $0x4] sm:$0xf] %v2097_v18 }

</bundles_post_ra>
